<compile_context>
chip_gen: v7x
topology: tpu7x:2x2x1
jax: 0.10.0
libtpu: 0.0.40
codegen_flags: <defaults>
</compile_context>

<pallas_src>
import functools

import jax
import jax.numpy as jnp
from jax import lax
from jax.experimental import pallas as pl
from jax.experimental.pallas import tpu as pltpu

EPS = 1e-5


# --------------------------------------------------------------------------- #
# Generation-aware VMEM budgeting
# --------------------------------------------------------------------------- #
def _tpu_vmem_capacity_bytes():
    try:
        info = pltpu.get_tpu_info()
        for name in ("vmem_capacity_bytes", "vmem_size_bytes", "vmem_bytes"):
            v = getattr(info, name, None)
            if v:
                return int(v)
    except Exception:
        pass
    return 64 * 1024 * 1024  # conservative fallback = v7x per-TC physical VMEM


def _vmem_limit_bytes():
    # ~3/4 of physical: ~96 MiB on v5e/v6e (128 MiB), ~48 MiB on v7x (64 MiB).
    return int(_tpu_vmem_capacity_bytes() * 3 // 4)


def _pick_tile_h(H, W, cin, cout, mxu_bytes, budget_bytes):
    """Largest H-tile whose *whole* per-step working set fits the budget."""
    best = 1
    for th in range(1, H + 1):
        if H % th:
            continue
        wset = (
            2 * th * W * cin * 4                     # center input block (double-buffered, f32)
            + 2 * 2 * W * cin * 4                    # two 1-row halo views (double-buffered)
            + 2 * 9 * cin * cout * mxu_bytes         # resident weights (double-buffered)
            + 2 * th * W * cout * 4                  # conv output block (double-buffered, f32)
            + (th + 2) * (W + 2) * cin * mxu_bytes   # assembled halo tile scratch
            + th * W * 9 * cin * mxu_bytes           # im2col lhs (vregs / spill)
            + 2 * th * W * cout * 4                  # f32 dot result + store staging headroom
        )
        if wset <= budget_bytes:
            best = th
    return best


# --------------------------------------------------------------------------- #
# Conv3x3 (pad=1, bias=False) + BN partial stats, optional fused input BN+ReLU
# --------------------------------------------------------------------------- #
def _conv_bn_stats_kernel(*refs, fuse_input_act):
    if fuse_input_act:
        (xc_ref, xt_ref, xb_ref, w_ref, sc_ref, sh_ref,
         y_ref, ssum_ref, ssq_ref, xtile_ref) = refs
    else:
        (xc_ref, xt_ref, xb_ref, w_ref,
         y_ref, ssum_ref, ssq_ref, xtile_ref) = refs
        sc_ref = sh_ref = None

    _, th, w_out, cout = y_ref.shape
    cin = xc_ref.shape[3]

    t = pl.program_id(1)
    n_t = pl.num_programs(1)

    def _prep(piece):
        # piece: (1, rows, W, Cin) raw f32 activations of the previous stage.
        if fuse_input_act:
            # BN(prev block) + ReLU as one per-channel FMA + max, in f32.
            piece = jnp.maximum(piece * sc_ref[...] + sh_ref[...], 0.0)
        # Single downcast to the MXU dtype on the scratch store (not per tap).
        return piece.astype(xtile_ref.dtype)

    # ---- assemble the zero-padded (TH+2, W+2, Cin) halo tile in scratch ----
    # W zero-padding lives in two scratch columns (scratch is uninitialized,
    # so re-zero them each step; 2 columns only -> cheap).
    zcol = jnp.zeros((1, th + 2, 1, cin), xtile_ref.dtype)
    xtile_ref[:, :, 0:1, :] = zcol
    xtile_ref[:, :, w_out + 1:w_out + 2, :] = zcol

    # Center rows.
    xtile_ref[:, 1:th + 1, 1:w_out + 1, :] = _prep(xc_ref[...])

    # Halo rows: pl.when-gated stores (no multiply-masking / NaN propagation).
    zrow = jnp.zeros((1, 1, w_out, cin), xtile_ref.dtype)

    @pl.when(t == 0)
    def _():
        xtile_ref[:, 0:1, 1:w_out + 1, :] = zrow

    @pl.when(t > 0)
    def _():
        xtile_ref[:, 0:1, 1:w_out + 1, :] = _prep(xt_ref[...])

    @pl.when(t == n_t - 1)
    def _():
        xtile_ref[:, th + 1:th + 2, 1:w_out + 1, :] = zrow

    @pl.when(t < n_t - 1)
    def _():
        xtile_ref[:, th + 1:th + 2, 1:w_out + 1, :] = _prep(xb_ref[...])

    # ---- 3x3 conv as ONE im2col contraction (vreg accumulation) -----------
    # lhs: (TH*W, 9*Cin), ordering (dh, dw, c) to match w.reshape(9*Cin, Cout).
    patches = [xtile_ref[:, dh:dh + th, dw:dw + w_out, :]
               for dh in range(3) for dw in range(3)]
    lhs = jnp.concatenate(patches, axis=-1).reshape(th * w_out, 9 * cin)
    acc = lax.dot_general(lhs, w_ref[...],
                          (((1,), (0,)), ((), ())),
                          preferred_element_type=jnp.float32)

    y_ref[...] = acc.reshape(1, th, w_out, cout).astype(y_ref.dtype)
    # BN partials from the f32 dot result (never from a rounded intermediate).
    # TODO(synk): E[x^2]-E[x]^2 can cancel for large-mean activations; a shifted
    # two-pass formulation would be tighter if needed.
    ssum_ref[...] = jnp.sum(acc, axis=0).reshape(1, 1, 1, cout)
    ssq_ref[...] = jnp.sum(acc * acc, axis=0).reshape(1, 1, 1, cout)


def _conv_bn_stats(x, w9, tile_h, *, in_scale=None, in_shift=None, mxu_dtype):
    """Tiled conv3x3 over an UNPADDED NHWC input, with BN partial stats."""
    N, H, W, Cin = x.shape
    Cout = w9.shape[-1]
    if H % tile_h:
        raise ValueError(f"tile_h={tile_h} must divide H={H}")
    n_t = H // tile_h
    fuse = in_scale is not None

    in_specs = [
        # center rows of the tile
        pl.BlockSpec((1, tile_h, W, Cin), lambda n, t: (n, t, 0, 0)),
        # top halo row (row t*TH - 1, clamped; zeroed in-kernel when t == 0)
        pl.BlockSpec((1, 1, W, Cin),
                     lambda n, t: (n, jnp.maximum(t * tile_h - 1, 0), 0, 0)),
        # bottom halo row (row (t+1)*TH, clamped; zeroed in-kernel when last)
        pl.BlockSpec((1, 1, W, Cin),
                     lambda n, t: (n, jnp.minimum((t + 1) * tile_h, H - 1), 0, 0)),
        # weights (9*Cin, Cout), resident for the whole grid.
        # TODO(synk): single-buffer via pipeline_mode=pl.Buffered(1) to reclaim
        # ~half the weight VMEM at real channel counts (kept default-buffered
        # here for lowering safety).
        pl.BlockSpec((9 * Cin, Cout), lambda n, t: (0, 0)),
    ]
    args = [x, x, x, w9]
    if fuse:
        in_specs += [pl.BlockSpec((1, 1, 1, Cin), lambda n, t: (0, 0, 0, 0)),
                     pl.BlockSpec((1, 1, 1, Cin), lambda n, t: (0, 0, 0, 0))]
        args += [in_scale, in_shift]

    out_shape = (
        jax.ShapeDtypeStruct((N, H, W, Cout), jnp.float32),     # raw conv output
        jax.ShapeDtypeStruct((N, n_t, 1, Cout), jnp.float32),   # per-tile sum
        jax.ShapeDtypeStruct((N, n_t, 1, Cout), jnp.float32),   # per-tile sum sq
    )
    out_specs = (
        pl.BlockSpec((1, tile_h, W, Cout), lambda n, t: (n, t, 0, 0)),
        pl.BlockSpec((1, 1, 1, Cout), lambda n, t: (n, t, 0, 0)),
        pl.BlockSpec((1, 1, 1, Cout), lambda n, t: (n, t, 0, 0)),
    )

    kernel = functools.partial(_conv_bn_stats_kernel, fuse_input_act=fuse)
    return pl.pallas_call(
        kernel,
        grid=(N, n_t),
        in_specs=in_specs,
        out_specs=out_specs,
        out_shape=out_shape,
        scratch_shapes=[
            # assembled halo tile, stored in the MXU dtype (bf16 by default)
            pltpu.VMEM((1, tile_h + 2, W + 2, Cin), mxu_dtype),
        ],
        compiler_params=pltpu.CompilerParams(
            dimension_semantics=("parallel", "parallel"),
            vmem_limit_bytes=_vmem_limit_bytes()),
    )(*args)


# --------------------------------------------------------------------------- #
# BN affine fold (wrapper side)
# --------------------------------------------------------------------------- #
def _bn_affine(ssum, ssq, count, gamma, beta):
    """Fold per-tile partials into per-channel BN scale/shift (training mode)."""
    s = jnp.sum(ssum, axis=(0, 1, 2))
    q = jnp.sum(ssq, axis=(0, 1, 2))
    mean = s / count
    var = jnp.maximum(q / count - mean * mean, 0.0)    # biased variance
    scale = gamma.astype(jnp.float32) * lax.rsqrt(var + EPS)
    shift = beta.astype(jnp.float32) - mean * scale
    return scale.reshape(1, 1, 1, -1), shift.reshape(1, 1, 1, -1)


# --------------------------------------------------------------------------- #
# DoubleConv forward
# --------------------------------------------------------------------------- #
@functools.partial(jax.jit, static_argnames=("tile_h", "mxu_dtype"))
def double_conv(x_nchw, w1, g1, b1, w2, g2, b2, *,
                tile_h=None, mxu_dtype=jnp.bfloat16):
    x = jnp.transpose(x_nchw, (0, 2, 3, 1)).astype(jnp.float32)   # NCHW -> NHWC
    N, H, W, Cin = x.shape
    Cout = w1.shape[-1]
    mxu_bytes = jnp.dtype(mxu_dtype).itemsize

    if tile_h is None:
        budget = int(_vmem_limit_bytes() * 0.8)
        tile_h = _pick_tile_h(H, W, max(Cin, Cout), Cout, mxu_bytes, budget)
    count = float(N * H * W)

    # Weights folded to the im2col contraction shape (9*Cin, Cout), MXU dtype.
    w1r = w1.astype(mxu_dtype).reshape(9 * Cin, Cout)
    w2r = w2.astype(mxu_dtype).reshape(9 * Cout, Cout)

    # ---- block 1: conv1 + per-tile BN1 partial stats (no HBM-side padding) --
    y1, s1, q1 = _conv_bn_stats(x, w1r, tile_h, mxu_dtype=mxu_dtype)
    sc1, sh1 = _bn_affine(s1, q1, count, g1, b1)

    # ---- block 2: BN1+ReLU fused into conv2's input path + BN2 partials -----
    y2, s2, q2 = _conv_bn_stats(y1, w2r, tile_h, in_scale=sc1, in_shift=sh1,
                                mxu_dtype=mxu_dtype)
    sc2, sh2 = _bn_affine(s2, q2, count, g2, b2)

    # ---- final BN2 + ReLU fused with the NHWC->NCHW transpose ---------------
    # Left to a single XLA fusion pass over y2 (FMA + max + transpose), which
    # avoids the extra HBM read/write a separate elementwise kernel would add.
    out = jnp.maximum(y2 * sc2 + sh2, 0.0)
    return jnp.transpose(out, (0, 3, 1, 2))                        # NHWC -> NCHW


# --------------------------------------------------------------------------- #
# Pure-JAX reference (training-mode BatchNorm2d, eps=1e-5, bias=False convs)
# --------------------------------------------------------------------------- #
def ref_double_conv(x_nchw, w1, g1, b1, w2, g2, b2):
    def block(x, w, g, b):
        y = lax.conv_general_dilated(
            x, w, window_strides=(1, 1), padding=((1, 1), (1, 1)),
            dimension_numbers=('NHWC', 'HWIO', 'NHWC'))
        m = jnp.mean(y, axis=(0, 1, 2), keepdims=True)
        v = jnp.mean((y - m) ** 2, axis=(0, 1, 2), keepdims=True)
        y = (y - m) * lax.rsqrt(v + EPS) * g.reshape(1, 1, 1, -1) + b.reshape(1, 1, 1, -1)
        return jnp.maximum(y, 0.0)

    x = jnp.transpose(x_nchw, (0, 2, 3, 1))
    y = block(block(x, w1, g1, b1), w2, g2, b2)
    return jnp.transpose(y, (0, 3, 1, 2))


if __name__ == "__main__":
    in_channels, out_channels = 4, 8
    N, H, W = 2, 16, 16

    key = jax.random.PRNGKey(0)
    kx, kw1, kw2 = jax.random.split(key, 3)

    x = jax.random.normal(kx, (N, in_channels, H, W), dtype=jnp.float32)

    # Conv weights (HWIO), kaiming-like scaling; bias=False as in the module.
    w1 = jax.random.normal(kw1, (3, 3, in_channels, out_channels), jnp.float32)
    w1 = w1 * jnp.sqrt(2.0 / (9 * in_channels))
    w2 = jax.random.normal(kw2, (3, 3, out_channels, out_channels), jnp.float32)
    w2 = w2 * jnp.sqrt(2.0 / (9 * out_channels))

    # BatchNorm2d default init: gamma=1, beta=0.
    g1 = jnp.ones((out_channels,), jnp.float32)
    b1 = jnp.zeros((out_channels,), jnp.float32)
    g2 = jnp.ones((out_channels,), jnp.float32)
    b2 = jnp.zeros((out_channels,), jnp.float32)

    ref = ref_double_conv(x, w1, g1, b1, w2, g2, b2)

    # Explicit tile_h=8 exercises the halo / multi-H-tile path.
    out_f32 = jax.block_until_ready(
        double_conv(x, w1, g1, b1, w2, g2, b2, tile_h=8, mxu_dtype=jnp.float32))
    assert out_f32.shape == (N, out_channels, H, W), out_f32.shape
    err_f32 = float(jnp.max(jnp.abs(out_f32 - ref)))
    assert err_f32 < 2e-2, err_f32

    # Default path: auto tile_h (generation-aware budget) + bf16 MXU operands.
    out_bf16 = jax.block_until_ready(
        double_conv(x, w1, g1, b1, w2, g2, b2))
    err_bf16 = float(jnp.max(jnp.abs(out_bf16 - ref)))
    assert err_bf16 < 5e-2, err_bf16

    print("KERNEL_OK")
</pallas_src>

<mosaic_0001>
module attributes {stable_mosaic.version = 11 : i64} {
  func.func @_conv_bn_stats_kernel(%arg0: i32, %arg1: i32, %arg2: memref<1x8x16x4xf32, #tpu.memory_space<vmem>>, %arg3: memref<1x1x16x4xf32, #tpu.memory_space<vmem>>, %arg4: memref<1x1x16x4xf32, #tpu.memory_space<vmem>>, %arg5: memref<36x8xf32, #tpu.memory_space<vmem>>, %arg6: memref<1x8x16x8xf32, #tpu.memory_space<vmem>>, %arg7: memref<1x1x1x8xf32, #tpu.memory_space<vmem>>, %arg8: memref<1x1x1x8xf32, #tpu.memory_space<vmem>>, %arg9: memref<1x10x18x4xf32, #tpu.memory_space<vmem>>) attributes {dimension_semantics = [#tpu.dimension_semantics<parallel>, #tpu.dimension_semantics<parallel>], iteration_bounds = array<i64: 2, 2>, scalar_prefetch = 0 : i64, scratch_operands = 1 : i64, tpu.core_type = #tpu.core_type<tc>, window_params = [{transform_indices = @transform_0, window_bounds = array<i64: 1, 8, 16, 4>}, {transform_indices = @transform_1, window_bounds = array<i64: 1, 1, 16, 4>}, {transform_indices = @transform_2, window_bounds = array<i64: 1, 1, 16, 4>}, {pipeline_mode = #tpu.pipeline_mode<synchronous>, transform_indices = @transform_3, window_bounds = array<i64: 36, 8>}, {transform_indices = @transform_4, window_bounds = array<i64: 1, 8, 16, 8>}, {transform_indices = @transform_5, window_bounds = array<i64: 1, 1, 1, 8>}, {transform_indices = @transform_6, window_bounds = array<i64: 1, 1, 1, 8>}]} {
    %cst = arith.constant 0.000000e+00 : f32
    %0 = vector.broadcast %cst : f32 to vector<1x10x1x4xf32>
    %c0 = arith.constant 0 : index
    %c0_0 = arith.constant 0 : index
    %c0_1 = arith.constant 0 : index
    %c0_2 = arith.constant 0 : index
    %1 = vector.load %arg9[%c0, %c0_0, %c0_1, %c0_2] : memref<1x10x18x4xf32, #tpu.memory_space<vmem>>, vector<1x10x1x4xf32>
    tpu.vector_store %arg9[%c0, %c0_0, %c0_1, %c0_2], %0 {strides = array<i32>} : memref<1x10x18x4xf32, #tpu.memory_space<vmem>>, vector<1x10x1x4xf32>,
    %c0_3 = arith.constant 0 : index
    %c0_4 = arith.constant 0 : index
    %c17 = arith.constant 17 : index
    %c0_5 = arith.constant 0 : index
    %2 = vector.load %arg9[%c0_3, %c0_4, %c17, %c0_5] : memref<1x10x18x4xf32, #tpu.memory_space<vmem>>, vector<1x10x1x4xf32>
    tpu.vector_store %arg9[%c0_3, %c0_4, %c17, %c0_5], %0 {strides = array<i32>} : memref<1x10x18x4xf32, #tpu.memory_space<vmem>>, vector<1x10x1x4xf32>,
    %c0_6 = arith.constant 0 : index
    %c0_7 = arith.constant 0 : index
    %c0_8 = arith.constant 0 : index
    %c0_9 = arith.constant 0 : index
    %3 = vector.load %arg2[%c0_6, %c0_7, %c0_8, %c0_9] : memref<1x8x16x4xf32, #tpu.memory_space<vmem>>, vector<1x8x16x4xf32>
    %c0_10 = arith.constant 0 : index
    %c1 = arith.constant 1 : index
    %c1_11 = arith.constant 1 : index
    %c0_12 = arith.constant 0 : index
    %4 = vector.load %arg9[%c0_10, %c1, %c1_11, %c0_12] : memref<1x10x18x4xf32, #tpu.memory_space<vmem>>, vector<1x8x16x4xf32>
    tpu.vector_store %arg9[%c0_10, %c1, %c1_11, %c0_12], %3 {strides = array<i32>} : memref<1x10x18x4xf32, #tpu.memory_space<vmem>>, vector<1x8x16x4xf32>,
    %cst_13 = arith.constant 0.000000e+00 : f32
    %5 = vector.broadcast %cst_13 : f32 to vector<1x1x16x4xf32>
    %c0_i32 = arith.constant 0 : i32
    %6 = arith.cmpi eq, %arg1, %c0_i32 : i32
    %7 = arith.extui %6 : i1 to i32
    %c0_i32_14 = arith.constant 0 : i32
    %8 = arith.cmpi ne, %7, %c0_i32_14 : i32
    scf.if %8 {
      %c0_72 = arith.constant 0 : index
      %c0_73 = arith.constant 0 : index
      %c1_74 = arith.constant 1 : index
      %c0_75 = arith.constant 0 : index
      %40 = vector.load %arg9[%c0_72, %c0_73, %c1_74, %c0_75] : memref<1x10x18x4xf32, #tpu.memory_space<vmem>>, vector<1x1x16x4xf32>
      tpu.vector_store %arg9[%c0_72, %c0_73, %c1_74, %c0_75], %5 {strides = array<i32>} : memref<1x10x18x4xf32, #tpu.memory_space<vmem>>, vector<1x1x16x4xf32>,
    } else {
    }
    %c0_i32_15 = arith.constant 0 : i32
    %9 = arith.cmpi sgt, %arg1, %c0_i32_15 : i32
    %10 = arith.extui %9 : i1 to i32
    %c0_i32_16 = arith.constant 0 : i32
    %11 = arith.cmpi ne, %10, %c0_i32_16 : i32
    scf.if %11 {
      %c0_72 = arith.constant 0 : index
      %c0_73 = arith.constant 0 : index
      %c0_74 = arith.constant 0 : index
      %c0_75 = arith.constant 0 : index
      %40 = vector.load %arg3[%c0_72, %c0_73, %c0_74, %c0_75] : memref<1x1x16x4xf32, #tpu.memory_space<vmem>>, vector<1x1x16x4xf32>
      %c0_76 = arith.constant 0 : index
      %c0_77 = arith.constant 0 : index
      %c1_78 = arith.constant 1 : index
      %c0_79 = arith.constant 0 : index
      %41 = vector.load %arg9[%c0_76, %c0_77, %c1_78, %c0_79] : memref<1x10x18x4xf32, #tpu.memory_space<vmem>>, vector<1x1x16x4xf32>
      tpu.vector_store %arg9[%c0_76, %c0_77, %c1_78, %c0_79], %40 {strides = array<i32>} : memref<1x10x18x4xf32, #tpu.memory_space<vmem>>, vector<1x1x16x4xf32>,
    } else {
    }
    %c1_i32 = arith.constant 1 : i32
    %12 = arith.cmpi eq, %arg1, %c1_i32 : i32
    %13 = arith.extui %12 : i1 to i32
    %c0_i32_17 = arith.constant 0 : i32
    %14 = arith.cmpi ne, %13, %c0_i32_17 : i32
    scf.if %14 {
      %c0_72 = arith.constant 0 : index
      %c9 = arith.constant 9 : index
      %c1_73 = arith.constant 1 : index
      %c0_74 = arith.constant 0 : index
      %40 = vector.load %arg9[%c0_72, %c9, %c1_73, %c0_74] : memref<1x10x18x4xf32, #tpu.memory_space<vmem>>, vector<1x1x16x4xf32>
      tpu.vector_store %arg9[%c0_72, %c9, %c1_73, %c0_74], %5 {strides = array<i32>} : memref<1x10x18x4xf32, #tpu.memory_space<vmem>>, vector<1x1x16x4xf32>,
    } else {
    }
    %c1_i32_18 = arith.constant 1 : i32
    %15 = arith.cmpi slt, %arg1, %c1_i32_18 : i32
    %16 = arith.extui %15 : i1 to i32
    %c0_i32_19 = arith.constant 0 : i32
    %17 = arith.cmpi ne, %16, %c0_i32_19 : i32
    scf.if %17 {
      %c0_72 = arith.constant 0 : index
      %c0_73 = arith.constant 0 : index
      %c0_74 = arith.constant 0 : index
      %c0_75 = arith.constant 0 : index
      %40 = vector.load %arg4[%c0_72, %c0_73, %c0_74, %c0_75] : memref<1x1x16x4xf32, #tpu.memory_space<vmem>>, vector<1x1x16x4xf32>
      %c0_76 = arith.constant 0 : index
      %c9 = arith.constant 9 : index
      %c1_77 = arith.constant 1 : index
      %c0_78 = arith.constant 0 : index
      %41 = vector.load %arg9[%c0_76, %c9, %c1_77, %c0_78] : memref<1x10x18x4xf32, #tpu.memory_space<vmem>>, vector<1x1x16x4xf32>
      tpu.vector_store %arg9[%c0_76, %c9, %c1_77, %c0_78], %40 {strides = array<i32>} : memref<1x10x18x4xf32, #tpu.memory_space<vmem>>, vector<1x1x16x4xf32>,
    } else {
    }
    %c0_20 = arith.constant 0 : index
    %c0_21 = arith.constant 0 : index
    %c0_22 = arith.constant 0 : index
    %c0_23 = arith.constant 0 : index
    %18 = vector.load %arg9[%c0_20, %c0_21, %c0_22, %c0_23] : memref<1x10x18x4xf32, #tpu.memory_space<vmem>>, vector<1x8x16x4xf32>
    %c0_24 = arith.constant 0 : index
    %c0_25 = arith.constant 0 : index
    %c1_26 = arith.constant 1 : index
    %c0_27 = arith.constant 0 : index
    %19 = vector.load %arg9[%c0_24, %c0_25, %c1_26, %c0_27] : memref<1x10x18x4xf32, #tpu.memory_space<vmem>>, vector<1x8x16x4xf32>
    %c0_28 = arith.constant 0 : index
    %c0_29 = arith.constant 0 : index
    %c2 = arith.constant 2 : index
    %c0_30 = arith.constant 0 : index
    %20 = vector.load %arg9[%c0_28, %c0_29, %c2, %c0_30] : memref<1x10x18x4xf32, #tpu.memory_space<vmem>>, vector<1x8x16x4xf32>
    %c0_31 = arith.constant 0 : index
    %c1_32 = arith.constant 1 : index
    %c0_33 = arith.constant 0 : index
    %c0_34 = arith.constant 0 : index
    %21 = vector.load %arg9[%c0_31, %c1_32, %c0_33, %c0_34] : memref<1x10x18x4xf32, #tpu.memory_space<vmem>>, vector<1x8x16x4xf32>
    %c0_35 = arith.constant 0 : index
    %c1_36 = arith.constant 1 : index
    %c1_37 = arith.constant 1 : index
    %c0_38 = arith.constant 0 : index
    %22 = vector.load %arg9[%c0_35, %c1_36, %c1_37, %c0_38] : memref<1x10x18x4xf32, #tpu.memory_space<vmem>>, vector<1x8x16x4xf32>
    %c0_39 = arith.constant 0 : index
    %c1_40 = arith.constant 1 : index
    %c2_41 = arith.constant 2 : index
    %c0_42 = arith.constant 0 : index
    %23 = vector.load %arg9[%c0_39, %c1_40, %c2_41, %c0_42] : memref<1x10x18x4xf32, #tpu.memory_space<vmem>>, vector<1x8x16x4xf32>
    %c0_43 = arith.constant 0 : index
    %c2_44 = arith.constant 2 : index
    %c0_45 = arith.constant 0 : index
    %c0_46 = arith.constant 0 : index
    %24 = vector.load %arg9[%c0_43, %c2_44, %c0_45, %c0_46] : memref<1x10x18x4xf32, #tpu.memory_space<vmem>>, vector<1x8x16x4xf32>
    %c0_47 = arith.constant 0 : index
    %c2_48 = arith.constant 2 : index
    %c1_49 = arith.constant 1 : index
    %c0_50 = arith.constant 0 : index
    %25 = vector.load %arg9[%c0_47, %c2_48, %c1_49, %c0_50] : memref<1x10x18x4xf32, #tpu.memory_space<vmem>>, vector<1x8x16x4xf32>
    %c0_51 = arith.constant 0 : index
    %c2_52 = arith.constant 2 : index
    %c2_53 = arith.constant 2 : index
    %c0_54 = arith.constant 0 : index
    %26 = vector.load %arg9[%c0_51, %c2_52, %c2_53, %c0_54] : memref<1x10x18x4xf32, #tpu.memory_space<vmem>>, vector<1x8x16x4xf32>
    %27 = tpu.concatenate %18, %19, %20, %21, %22, %23, %24, %25, %26 in 3 : vector<1x8x16x4xf32>, vector<1x8x16x4xf32>, vector<1x8x16x4xf32>, vector<1x8x16x4xf32>, vector<1x8x16x4xf32>, vector<1x8x16x4xf32>, vector<1x8x16x4xf32>, vector<1x8x16x4xf32>, vector<1x8x16x4xf32> -> vector<1x8x16x36xf32>
    %28 = vector.shape_cast %27 : vector<1x8x16x36xf32> to vector<128x36xf32>
    %c0_55 = arith.constant 0 : index
    %c0_56 = arith.constant 0 : index
    %29 = vector.load %arg5[%c0_55, %c0_56] : memref<36x8xf32, #tpu.memory_space<vmem>>, vector<36x8xf32>
    %cst_57 = arith.constant dense<0.000000e+00> : vector<128x8xf32>
    %30 = tpu.matmul %28, %29, %cst_57 {dimension_numbers = #tpu.dot_dimension_numbers<[1], [0], [0], [1], [0, 0, 1, 1], [], []>} : vector<128x36xf32>, vector<36x8xf32>, vector<128x8xf32> -> vector<128x8xf32>
    %31 = vector.shape_cast %30 : vector<128x8xf32> to vector<1x8x16x8xf32>
    %c0_58 = arith.constant 0 : index
    %c0_59 = arith.constant 0 : index
    %c0_60 = arith.constant 0 : index
    %c0_61 = arith.constant 0 : index
    %32 = vector.load %arg6[%c0_58, %c0_59, %c0_60, %c0_61] : memref<1x8x16x8xf32, #tpu.memory_space<vmem>>, vector<1x8x16x8xf32>
    tpu.vector_store %arg6[%c0_58, %c0_59, %c0_60, %c0_61], %31 {strides = array<i32>} : memref<1x8x16x8xf32, #tpu.memory_space<vmem>>, vector<1x8x16x8xf32>,
    %cst_62 = arith.constant dense<0.000000e+00> : vector<8xf32>
    %33 = vector.multi_reduction <add>, %30, %cst_62 [0] : vector<128x8xf32> to vector<8xf32>
    %34 = vector.shape_cast %33 : vector<8xf32> to vector<1x1x1x8xf32>
    %c0_63 = arith.constant 0 : index
    %c0_64 = arith.constant 0 : index
    %c0_65 = arith.constant 0 : index
    %c0_66 = arith.constant 0 : index
    %35 = vector.load %arg7[%c0_63, %c0_64, %c0_65, %c0_66] : memref<1x1x1x8xf32, #tpu.memory_space<vmem>>, vector<1x1x1x8xf32>
    tpu.vector_store %arg7[%c0_63, %c0_64, %c0_65, %c0_66], %34 {strides = array<i32>} : memref<1x1x1x8xf32, #tpu.memory_space<vmem>>, vector<1x1x1x8xf32>,
    %36 = arith.mulf %30, %30 : vector<128x8xf32>
    %cst_67 = arith.constant dense<0.000000e+00> : vector<8xf32>
    %37 = vector.multi_reduction <add>, %36, %cst_67 [0] : vector<128x8xf32> to vector<8xf32>
    %38 = vector.shape_cast %37 : vector<8xf32> to vector<1x1x1x8xf32>
    %c0_68 = arith.constant 0 : index
    %c0_69 = arith.constant 0 : index
    %c0_70 = arith.constant 0 : index
    %c0_71 = arith.constant 0 : index
    %39 = vector.load %arg8[%c0_68, %c0_69, %c0_70, %c0_71] : memref<1x1x1x8xf32, #tpu.memory_space<vmem>>, vector<1x1x1x8xf32>
    tpu.vector_store %arg8[%c0_68, %c0_69, %c0_70, %c0_71], %38 {strides = array<i32>} : memref<1x1x1x8xf32, #tpu.memory_space<vmem>>, vector<1x1x1x8xf32>,
    return
  }
  func.func @transform_0(%arg0: i32, %arg1: i32) -> (i32, i32, i32, i32) {
    %c0_i32 = arith.constant 0 : i32
    %c0_i32_0 = arith.constant 0 : i32
    %c0_i32_1 = arith.constant 0 : i32
    return %arg0, %arg1, %c0_i32, %c0_i32_0 : i32, i32, i32, i32
  }
  func.func @transform_1(%arg0: i32, %arg1: i32) -> (i32, i32, i32, i32) {
    %c8_i32 = arith.constant 8 : i32
    %0 = arith.muli %arg1, %c8_i32 : i32
    %c1_i32 = arith.constant 1 : i32
    %1 = arith.subi %0, %c1_i32 : i32
    %c0_i32 = arith.constant 0 : i32
    %2 = arith.maxsi %1, %c0_i32 : i32
    %c0_i32_0 = arith.constant 0 : i32
    %c0_i32_1 = arith.constant 0 : i32
    %c0_i32_2 = arith.constant 0 : i32
    return %arg0, %2, %c0_i32_0, %c0_i32_1 : i32, i32, i32, i32
  }
  func.func @transform_2(%arg0: i32, %arg1: i32) -> (i32, i32, i32, i32) {
    %c1_i32 = arith.constant 1 : i32
    %0 = arith.addi %arg1, %c1_i32 : i32
    %c8_i32 = arith.constant 8 : i32
    %1 = arith.muli %0, %c8_i32 : i32
    %c15_i32 = arith.constant 15 : i32
    %2 = arith.minsi %1, %c15_i32 : i32
    %c0_i32 = arith.constant 0 : i32
    %c0_i32_0 = arith.constant 0 : i32
    %c0_i32_1 = arith.constant 0 : i32
    return %arg0, %2, %c0_i32, %c0_i32_0 : i32, i32, i32, i32
  }
  func.func @transform_3(%arg0: i32, %arg1: i32) -> (i32, i32) {
    %c0_i32 = arith.constant 0 : i32
    %c0_i32_0 = arith.constant 0 : i32
    %c0_i32_1 = arith.constant 0 : i32
    return %c0_i32, %c0_i32_0 : i32, i32
  }
  func.func @transform_4(%arg0: i32, %arg1: i32) -> (i32, i32, i32, i32) {
    %c0_i32 = arith.constant 0 : i32
    %c0_i32_0 = arith.constant 0 : i32
    %c0_i32_1 = arith.constant 0 : i32
    return %arg0, %arg1, %c0_i32, %c0_i32_0 : i32, i32, i32, i32
  }
  func.func @transform_5(%arg0: i32, %arg1: i32) -> (i32, i32, i32, i32) {
    %c0_i32 = arith.constant 0 : i32
    %c0_i32_0 = arith.constant 0 : i32
    %c0_i32_1 = arith.constant 0 : i32
    return %arg0, %arg1, %c0_i32, %c0_i32_0 : i32, i32, i32, i32
  }
  func.func @transform_6(%arg0: i32, %arg1: i32) -> (i32, i32, i32, i32) {
    %c0_i32 = arith.constant 0 : i32
    %c0_i32_0 = arith.constant 0 : i32
    %c0_i32_1 = arith.constant 0 : i32
    return %arg0, %arg1, %c0_i32, %c0_i32_0 : i32, i32, i32, i32
  }
}

module attributes {stable_mosaic.version = 11 : i64} {
  func.func @_conv_bn_stats_kernel(%arg0: i32, %arg1: i32, %arg2: memref<1x8x16x8xf32, #tpu.memory_space<vmem>>, %arg3: memref<1x1x16x8xf32, #tpu.memory_space<vmem>>, %arg4: memref<1x1x16x8xf32, #tpu.memory_space<vmem>>, %arg5: memref<72x8xf32, #tpu.memory_space<vmem>>, %arg6: memref<1x1x1x8xf32, #tpu.memory_space<vmem>>, %arg7: memref<1x1x1x8xf32, #tpu.memory_space<vmem>>, %arg8: memref<1x8x16x8xf32, #tpu.memory_space<vmem>>, %arg9: memref<1x1x1x8xf32, #tpu.memory_space<vmem>>, %arg10: memref<1x1x1x8xf32, #tpu.memory_space<vmem>>, %arg11: memref<1x10x18x8xf32, #tpu.memory_space<vmem>>) attributes {dimension_semantics = [#tpu.dimension_semantics<parallel>, #tpu.dimension_semantics<parallel>], iteration_bounds = array<i64: 2, 2>, scalar_prefetch = 0 : i64, scratch_operands = 1 : i64, tpu.core_type = #tpu.core_type<tc>, window_params = [{transform_indices = @transform_0, window_bounds = array<i64: 1, 8, 16, 8>}, {transform_indices = @transform_1, window_bounds = array<i64: 1, 1, 16, 8>}, {transform_indices = @transform_2, window_bounds = array<i64: 1, 1, 16, 8>}, {pipeline_mode = #tpu.pipeline_mode<synchronous>, transform_indices = @transform_3, window_bounds = array<i64: 72, 8>}, {pipeline_mode = #tpu.pipeline_mode<synchronous>, transform_indices = @transform_4, window_bounds = array<i64: 1, 1, 1, 8>}, {pipeline_mode = #tpu.pipeline_mode<synchronous>, transform_indices = @transform_5, window_bounds = array<i64: 1, 1, 1, 8>}, {transform_indices = @transform_6, window_bounds = array<i64: 1, 8, 16, 8>}, {transform_indices = @transform_7, window_bounds = array<i64: 1, 1, 1, 8>}, {transform_indices = @transform_8, window_bounds = array<i64: 1, 1, 1, 8>}]} {
    %cst = arith.constant 0.000000e+00 : f32
    %0 = vector.broadcast %cst : f32 to vector<1x10x1x8xf32>
    %c0 = arith.constant 0 : index
    %c0_0 = arith.constant 0 : index
    %c0_1 = arith.constant 0 : index
    %c0_2 = arith.constant 0 : index
    %1 = vector.load %arg11[%c0, %c0_0, %c0_1, %c0_2] : memref<1x10x18x8xf32, #tpu.memory_space<vmem>>, vector<1x10x1x8xf32>
    tpu.vector_store %arg11[%c0, %c0_0, %c0_1, %c0_2], %0 {strides = array<i32>} : memref<1x10x18x8xf32, #tpu.memory_space<vmem>>, vector<1x10x1x8xf32>,
    %c0_3 = arith.constant 0 : index
    %c0_4 = arith.constant 0 : index
    %c17 = arith.constant 17 : index
    %c0_5 = arith.constant 0 : index
    %2 = vector.load %arg11[%c0_3, %c0_4, %c17, %c0_5] : memref<1x10x18x8xf32, #tpu.memory_space<vmem>>, vector<1x10x1x8xf32>
    tpu.vector_store %arg11[%c0_3, %c0_4, %c17, %c0_5], %0 {strides = array<i32>} : memref<1x10x18x8xf32, #tpu.memory_space<vmem>>, vector<1x10x1x8xf32>,
    %c0_6 = arith.constant 0 : index
    %c0_7 = arith.constant 0 : index
    %c0_8 = arith.constant 0 : index
    %c0_9 = arith.constant 0 : index
    %3 = vector.load %arg2[%c0_6, %c0_7, %c0_8, %c0_9] : memref<1x8x16x8xf32, #tpu.memory_space<vmem>>, vector<1x8x16x8xf32>
    %c0_10 = arith.constant 0 : index
    %c0_11 = arith.constant 0 : index
    %c0_12 = arith.constant 0 : index
    %c0_13 = arith.constant 0 : index
    %4 = vector.load %arg6[%c0_10, %c0_11, %c0_12, %c0_13] : memref<1x1x1x8xf32, #tpu.memory_space<vmem>>, vector<1x1x1x8xf32>
    %5 = vector.broadcast %4 : vector<1x1x1x8xf32> to vector<1x8x16x8xf32>
    %6 = arith.mulf %3, %5 : vector<1x8x16x8xf32>
    %c0_14 = arith.constant 0 : index
    %c0_15 = arith.constant 0 : index
    %c0_16 = arith.constant 0 : index
    %c0_17 = arith.constant 0 : index
    %7 = vector.load %arg7[%c0_14, %c0_15, %c0_16, %c0_17] : memref<1x1x1x8xf32, #tpu.memory_space<vmem>>, vector<1x1x1x8xf32>
    %8 = vector.broadcast %7 : vector<1x1x1x8xf32> to vector<1x8x16x8xf32>
    %9 = arith.addf %6, %8 : vector<1x8x16x8xf32>
    %cst_18 = arith.constant 0.000000e+00 : f32
    %10 = vector.broadcast %cst_18 : f32 to vector<1x8x16x8xf32>
    %11 = arith.maximumf %9, %10 : vector<1x8x16x8xf32>
    %c0_19 = arith.constant 0 : index
    %c1 = arith.constant 1 : index
    %c1_20 = arith.constant 1 : index
    %c0_21 = arith.constant 0 : index
    %12 = vector.load %arg11[%c0_19, %c1, %c1_20, %c0_21] : memref<1x10x18x8xf32, #tpu.memory_space<vmem>>, vector<1x8x16x8xf32>
    tpu.vector_store %arg11[%c0_19, %c1, %c1_20, %c0_21], %11 {strides = array<i32>} : memref<1x10x18x8xf32, #tpu.memory_space<vmem>>, vector<1x8x16x8xf32>,
    %cst_22 = arith.constant 0.000000e+00 : f32
    %13 = vector.broadcast %cst_22 : f32 to vector<1x1x16x8xf32>
    %c0_i32 = arith.constant 0 : i32
    %14 = arith.cmpi eq, %arg1, %c0_i32 : i32
    %15 = arith.extui %14 : i1 to i32
    %c0_i32_23 = arith.constant 0 : i32
    %16 = arith.cmpi ne, %15, %c0_i32_23 : i32
    scf.if %16 {
      %c0_81 = arith.constant 0 : index
      %c0_82 = arith.constant 0 : index
      %c1_83 = arith.constant 1 : index
      %c0_84 = arith.constant 0 : index
      %48 = vector.load %arg11[%c0_81, %c0_82, %c1_83, %c0_84] : memref<1x10x18x8xf32, #tpu.memory_space<vmem>>, vector<1x1x16x8xf32>
      tpu.vector_store %arg11[%c0_81, %c0_82, %c1_83, %c0_84], %13 {strides = array<i32>} : memref<1x10x18x8xf32, #tpu.memory_space<vmem>>, vector<1x1x16x8xf32>,
    } else {
    }
    %c0_i32_24 = arith.constant 0 : i32
    %17 = arith.cmpi sgt, %arg1, %c0_i32_24 : i32
    %18 = arith.extui %17 : i1 to i32
    %c0_i32_25 = arith.constant 0 : i32
    %19 = arith.cmpi ne, %18, %c0_i32_25 : i32
    scf.if %19 {
      %c0_81 = arith.constant 0 : index
      %c0_82 = arith.constant 0 : index
      %c0_83 = arith.constant 0 : index
      %c0_84 = arith.constant 0 : index
      %48 = vector.load %arg3[%c0_81, %c0_82, %c0_83, %c0_84] : memref<1x1x16x8xf32, #tpu.memory_space<vmem>>, vector<1x1x16x8xf32>
      %c0_85 = arith.constant 0 : index
      %c0_86 = arith.constant 0 : index
      %c0_87 = arith.constant 0 : index
      %c0_88 = arith.constant 0 : index
      %49 = vector.load %arg6[%c0_85, %c0_86, %c0_87, %c0_88] : memref<1x1x1x8xf32, #tpu.memory_space<vmem>>, vector<1x1x1x8xf32>
      %50 = vector.broadcast %49 : vector<1x1x1x8xf32> to vector<1x1x16x8xf32>
      %51 = arith.mulf %48, %50 : vector<1x1x16x8xf32>
      %c0_89 = arith.constant 0 : index
      %c0_90 = arith.constant 0 : index
      %c0_91 = arith.constant 0 : index
      %c0_92 = arith.constant 0 : index
      %52 = vector.load %arg7[%c0_89, %c0_90, %c0_91, %c0_92] : memref<1x1x1x8xf32, #tpu.memory_space<vmem>>, vector<1x1x1x8xf32>
      %53 = vector.broadcast %52 : vector<1x1x1x8xf32> to vector<1x1x16x8xf32>
      %54 = arith.addf %51, %53 : vector<1x1x16x8xf32>
      %cst_93 = arith.constant 0.000000e+00 : f32
      %55 = vector.broadcast %cst_93 : f32 to vector<1x1x16x8xf32>
      %56 = arith.maximumf %54, %55 : vector<1x1x16x8xf32>
      %c0_94 = arith.constant 0 : index
      %c0_95 = arith.constant 0 : index
      %c1_96 = arith.constant 1 : index
      %c0_97 = arith.constant 0 : index
      %57 = vector.load %arg11[%c0_94, %c0_95, %c1_96, %c0_97] : memref<1x10x18x8xf32, #tpu.memory_space<vmem>>, vector<1x1x16x8xf32>
      tpu.vector_store %arg11[%c0_94, %c0_95, %c1_96, %c0_97], %56 {strides = array<i32>} : memref<1x10x18x8xf32, #tpu.memory_space<vmem>>, vector<1x1x16x8xf32>,
    } else {
    }
    %c1_i32 = arith.constant 1 : i32
    %20 = arith.cmpi eq, %arg1, %c1_i32 : i32
    %21 = arith.extui %20 : i1 to i32
    %c0_i32_26 = arith.constant 0 : i32
    %22 = arith.cmpi ne, %21, %c0_i32_26 : i32
    scf.if %22 {
      %c0_81 = arith.constant 0 : index
      %c9 = arith.constant 9 : index
      %c1_82 = arith.constant 1 : index
      %c0_83 = arith.constant 0 : index
      %48 = vector.load %arg11[%c0_81, %c9, %c1_82, %c0_83] : memref<1x10x18x8xf32, #tpu.memory_space<vmem>>, vector<1x1x16x8xf32>
      tpu.vector_store %arg11[%c0_81, %c9, %c1_82, %c0_83], %13 {strides = array<i32>} : memref<1x10x18x8xf32, #tpu.memory_space<vmem>>, vector<1x1x16x8xf32>,
    } else {
    }
    %c1_i32_27 = arith.constant 1 : i32
    %23 = arith.cmpi slt, %arg1, %c1_i32_27 : i32
    %24 = arith.extui %23 : i1 to i32
    %c0_i32_28 = arith.constant 0 : i32
    %25 = arith.cmpi ne, %24, %c0_i32_28 : i32
    scf.if %25 {
      %c0_81 = arith.constant 0 : index
      %c0_82 = arith.constant 0 : index
      %c0_83 = arith.constant 0 : index
      %c0_84 = arith.constant 0 : index
      %48 = vector.load %arg4[%c0_81, %c0_82, %c0_83, %c0_84] : memref<1x1x16x8xf32, #tpu.memory_space<vmem>>, vector<1x1x16x8xf32>
      %c0_85 = arith.constant 0 : index
      %c0_86 = arith.constant 0 : index
      %c0_87 = arith.constant 0 : index
      %c0_88 = arith.constant 0 : index
      %49 = vector.load %arg6[%c0_85, %c0_86, %c0_87, %c0_88] : memref<1x1x1x8xf32, #tpu.memory_space<vmem>>, vector<1x1x1x8xf32>
      %50 = vector.broadcast %49 : vector<1x1x1x8xf32> to vector<1x1x16x8xf32>
      %51 = arith.mulf %48, %50 : vector<1x1x16x8xf32>
      %c0_89 = arith.constant 0 : index
      %c0_90 = arith.constant 0 : index
      %c0_91 = arith.constant 0 : index
      %c0_92 = arith.constant 0 : index
      %52 = vector.load %arg7[%c0_89, %c0_90, %c0_91, %c0_92] : memref<1x1x1x8xf32, #tpu.memory_space<vmem>>, vector<1x1x1x8xf32>
      %53 = vector.broadcast %52 : vector<1x1x1x8xf32> to vector<1x1x16x8xf32>
      %54 = arith.addf %51, %53 : vector<1x1x16x8xf32>
      %cst_93 = arith.constant 0.000000e+00 : f32
      %55 = vector.broadcast %cst_93 : f32 to vector<1x1x16x8xf32>
      %56 = arith.maximumf %54, %55 : vector<1x1x16x8xf32>
      %c0_94 = arith.constant 0 : index
      %c9 = arith.constant 9 : index
      %c1_95 = arith.constant 1 : index
      %c0_96 = arith.constant 0 : index
      %57 = vector.load %arg11[%c0_94, %c9, %c1_95, %c0_96] : memref<1x10x18x8xf32, #tpu.memory_space<vmem>>, vector<1x1x16x8xf32>
      tpu.vector_store %arg11[%c0_94, %c9, %c1_95, %c0_96], %56 {strides = array<i32>} : memref<1x10x18x8xf32, #tpu.memory_space<vmem>>, vector<1x1x16x8xf32>,
    } else {
    }
    %c0_29 = arith.constant 0 : index
    %c0_30 = arith.constant 0 : index
    %c0_31 = arith.constant 0 : index
    %c0_32 = arith.constant 0 : index
    %26 = vector.load %arg11[%c0_29, %c0_30, %c0_31, %c0_32] : memref<1x10x18x8xf32, #tpu.memory_space<vmem>>, vector<1x8x16x8xf32>
    %c0_33 = arith.constant 0 : index
    %c0_34 = arith.constant 0 : index
    %c1_35 = arith.constant 1 : index
    %c0_36 = arith.constant 0 : index
    %27 = vector.load %arg11[%c0_33, %c0_34, %c1_35, %c0_36] : memref<1x10x18x8xf32, #tpu.memory_space<vmem>>, vector<1x8x16x8xf32>
    %c0_37 = arith.constant 0 : index
    %c0_38 = arith.constant 0 : index
    %c2 = arith.constant 2 : index
    %c0_39 = arith.constant 0 : index
    %28 = vector.load %arg11[%c0_37, %c0_38, %c2, %c0_39] : memref<1x10x18x8xf32, #tpu.memory_space<vmem>>, vector<1x8x16x8xf32>
    %c0_40 = arith.constant 0 : index
    %c1_41 = arith.constant 1 : index
    %c0_42 = arith.constant 0 : index
    %c0_43 = arith.constant 0 : index
    %29 = vector.load %arg11[%c0_40, %c1_41, %c0_42, %c0_43] : memref<1x10x18x8xf32, #tpu.memory_space<vmem>>, vector<1x8x16x8xf32>
    %c0_44 = arith.constant 0 : index
    %c1_45 = arith.constant 1 : index
    %c1_46 = arith.constant 1 : index
    %c0_47 = arith.constant 0 : index
    %30 = vector.load %arg11[%c0_44, %c1_45, %c1_46, %c0_47] : memref<1x10x18x8xf32, #tpu.memory_space<vmem>>, vector<1x8x16x8xf32>
    %c0_48 = arith.constant 0 : index
    %c1_49 = arith.constant 1 : index
    %c2_50 = arith.constant 2 : index
    %c0_51 = arith.constant 0 : index
    %31 = vector.load %arg11[%c0_48, %c1_49, %c2_50, %c0_51] : memref<1x10x18x8xf32, #tpu.memory_space<vmem>>, vector<1x8x16x8xf32>
    %c0_52 = arith.constant 0 : index
    %c2_53 = arith.constant 2 : index
    %c0_54 = arith.constant 0 : index
    %c0_55 = arith.constant 0 : index
    %32 = vector.load %arg11[%c0_52, %c2_53, %c0_54, %c0_55] : memref<1x10x18x8xf32, #tpu.memory_space<vmem>>, vector<1x8x16x8xf32>
    %c0_56 = arith.constant 0 : index
    %c2_57 = arith.constant 2 : index
    %c1_58 = arith.constant 1 : index
    %c0_59 = arith.constant 0 : index
    %33 = vector.load %arg11[%c0_56, %c2_57, %c1_58, %c0_59] : memref<1x10x18x8xf32, #tpu.memory_space<vmem>>, vector<1x8x16x8xf32>
    %c0_60 = arith.constant 0 : index
    %c2_61 = arith.constant 2 : index
    %c2_62 = arith.constant 2 : index
    %c0_63 = arith.constant 0 : index
    %34 = vector.load %arg11[%c0_60, %c2_61, %c2_62, %c0_63] : memref<1x10x18x8xf32, #tpu.memory_space<vmem>>, vector<1x8x16x8xf32>
    %35 = tpu.concatenate %26, %27, %28, %29, %30, %31, %32, %33, %34 in 3 : vector<1x8x16x8xf32>, vector<1x8x16x8xf32>, vector<1x8x16x8xf32>, vector<1x8x16x8xf32>, vector<1x8x16x8xf32>, vector<1x8x16x8xf32>, vector<1x8x16x8xf32>, vector<1x8x16x8xf32>, vector<1x8x16x8xf32> -> vector<1x8x16x72xf32>
    %36 = vector.shape_cast %35 : vector<1x8x16x72xf32> to vector<128x72xf32>
    %c0_64 = arith.constant 0 : index
    %c0_65 = arith.constant 0 : index
    %37 = vector.load %arg5[%c0_64, %c0_65] : memref<72x8xf32, #tpu.memory_space<vmem>>, vector<72x8xf32>
    %cst_66 = arith.constant dense<0.000000e+00> : vector<128x8xf32>
    %38 = tpu.matmul %36, %37, %cst_66 {dimension_numbers = #tpu.dot_dimension_numbers<[1], [0], [0], [1], [0, 0, 1, 1], [], []>} : vector<128x72xf32>, vector<72x8xf32>, vector<128x8xf32> -> vector<128x8xf32>
    %39 = vector.shape_cast %38 : vector<128x8xf32> to vector<1x8x16x8xf32>
    %c0_67 = arith.constant 0 : index
    %c0_68 = arith.constant 0 : index
    %c0_69 = arith.constant 0 : index
    %c0_70 = arith.constant 0 : index
    %40 = vector.load %arg8[%c0_67, %c0_68, %c0_69, %c0_70] : memref<1x8x16x8xf32, #tpu.memory_space<vmem>>, vector<1x8x16x8xf32>
    tpu.vector_store %arg8[%c0_67, %c0_68, %c0_69, %c0_70], %39 {strides = array<i32>} : memref<1x8x16x8xf32, #tpu.memory_space<vmem>>, vector<1x8x16x8xf32>,
    %cst_71 = arith.constant dense<0.000000e+00> : vector<8xf32>
    %41 = vector.multi_reduction <add>, %38, %cst_71 [0] : vector<128x8xf32> to vector<8xf32>
    %42 = vector.shape_cast %41 : vector<8xf32> to vector<1x1x1x8xf32>
    %c0_72 = arith.constant 0 : index
    %c0_73 = arith.constant 0 : index
    %c0_74 = arith.constant 0 : index
    %c0_75 = arith.constant 0 : index
    %43 = vector.load %arg9[%c0_72, %c0_73, %c0_74, %c0_75] : memref<1x1x1x8xf32, #tpu.memory_space<vmem>>, vector<1x1x1x8xf32>
    tpu.vector_store %arg9[%c0_72, %c0_73, %c0_74, %c0_75], %42 {strides = array<i32>} : memref<1x1x1x8xf32, #tpu.memory_space<vmem>>, vector<1x1x1x8xf32>,
    %44 = arith.mulf %38, %38 : vector<128x8xf32>
    %cst_76 = arith.constant dense<0.000000e+00> : vector<8xf32>
    %45 = vector.multi_reduction <add>, %44, %cst_76 [0] : vector<128x8xf32> to vector<8xf32>
    %46 = vector.shape_cast %45 : vector<8xf32> to vector<1x1x1x8xf32>
    %c0_77 = arith.constant 0 : index
    %c0_78 = arith.constant 0 : index
    %c0_79 = arith.constant 0 : index
    %c0_80 = arith.constant 0 : index
    %47 = vector.load %arg10[%c0_77, %c0_78, %c0_79, %c0_80] : memref<1x1x1x8xf32, #tpu.memory_space<vmem>>, vector<1x1x1x8xf32>
    tpu.vector_store %arg10[%c0_77, %c0_78, %c0_79, %c0_80], %46 {strides = array<i32>} : memref<1x1x1x8xf32, #tpu.memory_space<vmem>>, vector<1x1x1x8xf32>,
    return
  }
  func.func @transform_0(%arg0: i32, %arg1: i32) -> (i32, i32, i32, i32) {
    %c0_i32 = arith.constant 0 : i32
    %c0_i32_0 = arith.constant 0 : i32
    %c0_i32_1 = arith.constant 0 : i32
    return %arg0, %arg1, %c0_i32, %c0_i32_0 : i32, i32, i32, i32
  }
  func.func @transform_1(%arg0: i32, %arg1: i32) -> (i32, i32, i32, i32) {
    %c8_i32 = arith.constant 8 : i32
    %0 = arith.muli %arg1, %c8_i32 : i32
    %c1_i32 = arith.constant 1 : i32
    %1 = arith.subi %0, %c1_i32 : i32
    %c0_i32 = arith.constant 0 : i32
    %2 = arith.maxsi %1, %c0_i32 : i32
    %c0_i32_0 = arith.constant 0 : i32
    %c0_i32_1 = arith.constant 0 : i32
    %c0_i32_2 = arith.constant 0 : i32
    return %arg0, %2, %c0_i32_0, %c0_i32_1 : i32, i32, i32, i32
  }
  func.func @transform_2(%arg0: i32, %arg1: i32) -> (i32, i32, i32, i32) {
    %c1_i32 = arith.constant 1 : i32
    %0 = arith.addi %arg1, %c1_i32 : i32
    %c8_i32 = arith.constant 8 : i32
    %1 = arith.muli %0, %c8_i32 : i32
    %c15_i32 = arith.constant 15 : i32
    %2 = arith.minsi %1, %c15_i32 : i32
    %c0_i32 = arith.constant 0 : i32
    %c0_i32_0 = arith.constant 0 : i32
    %c0_i32_1 = arith.constant 0 : i32
    return %arg0, %2, %c0_i32, %c0_i32_0 : i32, i32, i32, i32
  }
  func.func @transform_3(%arg0: i32, %arg1: i32) -> (i32, i32) {
    %c0_i32 = arith.constant 0 : i32
    %c0_i32_0 = arith.constant 0 : i32
    %c0_i32_1 = arith.constant 0 : i32
    return %c0_i32, %c0_i32_0 : i32, i32
  }
  func.func @transform_4(%arg0: i32, %arg1: i32) -> (i32, i32, i32, i32) {
    %c0_i32 = arith.constant 0 : i32
    %c0_i32_0 = arith.constant 0 : i32
    %c0_i32_1 = arith.constant 0 : i32
    %c0_i32_2 = arith.constant 0 : i32
    %c0_i32_3 = arith.constant 0 : i32
    return %c0_i32, %c0_i32_0, %c0_i32_1, %c0_i32_2 : i32, i32, i32, i32
  }
  func.func @transform_5(%arg0: i32, %arg1: i32) -> (i32, i32, i32, i32) {
    %c0_i32 = arith.constant 0 : i32
    %c0_i32_0 = arith.constant 0 : i32
    %c0_i32_1 = arith.constant 0 : i32
    %c0_i32_2 = arith.constant 0 : i32
    %c0_i32_3 = arith.constant 0 : i32
    return %c0_i32, %c0_i32_0, %c0_i32_1, %c0_i32_2 : i32, i32, i32, i32
  }
  func.func @transform_6(%arg0: i32, %arg1: i32) -> (i32, i32, i32, i32) {
    %c0_i32 = arith.constant 0 : i32
    %c0_i32_0 = arith.constant 0 : i32
    %c0_i32_1 = arith.constant 0 : i32
    return %arg0, %arg1, %c0_i32, %c0_i32_0 : i32, i32, i32, i32
  }
  func.func @transform_7(%arg0: i32, %arg1: i32) -> (i32, i32, i32, i32) {
    %c0_i32 = arith.constant 0 : i32
    %c0_i32_0 = arith.constant 0 : i32
    %c0_i32_1 = arith.constant 0 : i32
    return %arg0, %arg1, %c0_i32, %c0_i32_0 : i32, i32, i32, i32
  }
  func.func @transform_8(%arg0: i32, %arg1: i32) -> (i32, i32, i32, i32) {
    %c0_i32 = arith.constant 0 : i32
    %c0_i32_0 = arith.constant 0 : i32
    %c0_i32_1 = arith.constant 0 : i32
    return %arg0, %arg1, %c0_i32, %c0_i32_0 : i32, i32, i32, i32
  }
}

</mosaic_0001>

<bundles_post_ra>
// kernel: double_conv.3
= control target key start
LH: loop header
LB: loop body
LE: loop exit
PB: predicated region body
PF: predicated region fallthrough
CT: control target
= control target key end

     0   :  { %s2338_s27 = smov 0   ;;  %s2340_s28 = smov 0   ;;  %s3093_s0 = inlined_call_operand.vmem [shape: f32[2,16,16,8], index: 0, kind: input, shape index: {}, may-alias: {0,1,2}]   ;;  %s3094_s1 = inlined_call_operand.vmem [shape: f32[2,16,16,8], index: 1, kind: input, shape index: {}, may-alias: {0,1,2}]   ;;  %s3095_s2 = inlined_call_operand.vmem [shape: f32[2,16,16,8], index: 2, kind: input, shape index: {}, may-alias: {0,1,2}]   ;;  %s3096_s3 = inlined_call_operand.vmem [shape: f32[72,8], index: 3, kind: input, shape index: {}]   ;;  %s3097_s4 = inlined_call_operand.vmem [shape: f32[1,1,1,8], index: 4, kind: input, shape index: {}]   ;;  %s3098_s5 = inlined_call_operand.vmem [shape: f32[1,1,1,8], index: 5, kind: input, shape index: {}]   ;;  %s3099_s6 = inlined_call_operand.vmem [shape: f32[2,16,16,8], index: 6, kind: output, shape index: {0}]   ;;  %s3100_s7 = inlined_call_operand.vmem [shape: f32[2,2,1,8], index: 7, kind: output, shape index: {1}]   ;;  %s3101_s8 = inlined_call_operand.vmem [shape: f32[2,2,1,8], index: 8, kind: output, shape index: {2}]  }
   0x1   :  { %s2342_s29 = smov 0   ;;  %s2344_s30 = smov 0  }
   0x2   :  { %s2346_s9 = smov 0  }
   0x3 LB: > { %s28_s10 = sadd.s32 1, %s2272_s29  ;;  %s31_s11 = sadd.s32 1, %s2276_s30  ;;  %s2280_s9 = sphi %s2346_s9, %s19_s9   ;;  %s2276_s30 = sphi %s2344_s30, %s3106_s30   ;;  %s2272_s29 = sphi %s2342_s29, %s3105_s29   ;;  %s2268_s28 = sphi %s2340_s28, %s3104_s28   ;;  %s2264_s27 = sphi %s2338_s27, %s3103_s27  }
   0x4   : > { %p29_p0 = scmp.ge.s32.totalorder %s28_s10, 2  ;;  %p2034_p1 = scmp.ge.s32.totalorder %s2280_s9, 1 }
   0x5   : > { %p357_p2 = scmp.lt.s32.totalorder %s2280_s9, 5 }
   0x6   : > { %s3108_s10 = smov (%p29_p0, %s28_s10), 0  ;;  %s3110_s11 = smov (!%p29_p0, %s31_s11), %s2276_s30 }
   0x7   : > { %p358_p3 = pnand %p2034_p1, %p357_p2  ;;  %p33_p4 = scmp.ge.s32.totalorder %s3110_s11, 2 }
   0x8   : > { %vm511_vm0 = vcmask (!%p358_p3), 57344   ;;  %s2373_s12 = sshll.u32 (!%p358_p3), %s2264_s27, 3  ;;  %p442_p5 = scmp.lt.s32.totalorder (!%p358_p3), %s2268_s28, 1  ;;  %v2282_v0 = vmov (!%p358_p3), 0.0   ;;  %v2416_v1 = vld [vmem:[%s3097_s4] ss:$0 sm:$0xff] (!%p358_p3) }
   0x9   : > { %s3112_s11 = smov (%p33_p4, %s3110_s11), 0  ;;  %361 = sbr.rel (%p358_p3) target bundleno = 674 (0x2a2), region = 44 }
   0xa   : > { %512 = vst.msk [vmem:[#allocation2] sm:$0x1] (!%p358_p3), %vm511_vm0, %v2282_v0  ;;  %513 = vst.msk [vmem:[#allocation2 + $0x18] sm:$0x1] (!%p358_p3), %vm511_vm0, %v2282_v0  ;;  %p444_p6 = scmp.lt.s32.totalorder (!%p358_p3), %s2373_s12, 15  ;;  %s2040_s13 = sadd.s32 (!%p358_p3), 4294967295, %s2373_s12 }
   0xb   : > { %514 = vst.msk [vmem:[#allocation2 + $0x30] sm:$0x1] (!%p358_p3), %vm511_vm0, %v2282_v0  ;;  %515 = vst.msk [vmem:[#allocation2 + $0x48] sm:$0x1] (!%p358_p3), %vm511_vm0, %v2282_v0  ;;  %p454_p7 = scmp.gt.s32.totalorder (!%p358_p3), %s2040_s13, 0  ;;  %p2041_p8 = scmp.lt.s32.totalorder (!%p358_p3), %s2040_s13, 15 }
   0xc   : > { %516 = vst.msk [vmem:[#allocation2 + $0x60] sm:$0x1] (!%p358_p3), %vm511_vm0, %v2282_v0  ;;  %517 = vst.msk [vmem:[#allocation2 + $0x78] sm:$0x1] (!%p358_p3), %vm511_vm0, %v2282_v0  ;;  %s2097_s18 = sadd.s32 (!%p358_p3), 8, %s2373_s12  ;;  %vm611_vm1 = vcmask (!%p358_p3), 64512  }
   0xd   : > { %518 = vst.msk [vmem:[#allocation2 + $0x90] sm:$0x1] (!%p358_p3), %vm511_vm0, %v2282_v0  ;;  %519 = vst.msk [vmem:[#allocation2 + $0xa8] sm:$0x1] (!%p358_p3), %vm511_vm0, %v2282_v0  ;;  %p2409_p9 = scmp.lt.s32.totalorder (!%p358_p3), %s2097_s18, 15  ;;  %p499_p10 = scmp.lt.s32.totalorder (!%p358_p3), %s2264_s27, 1 }
   0xe   : > { %520 = vst.msk [vmem:[#allocation2 + $0xc0] sm:$0x1] (!%p358_p3), %vm511_vm0, %v2282_v0  ;;  %521 = vst.msk [vmem:[#allocation2 + $0xd8] sm:$0x1] (!%p358_p3), %vm511_vm0, %v2282_v0  ;;  %v2431_v2 = vld [vmem:[%s3098_s5] ss:$0 sm:$0xff] (!%p358_p3) }
   0xf   : > { %522 = vst.msk [vmem:[#allocation2 + $0x11] sm:$0x1] (!%p358_p3), %vm511_vm0, %v2282_v0  ;;  %523 = vst.msk [vmem:[#allocation2 + $0x29] sm:$0x1] (!%p358_p3), %vm511_vm0, %v2282_v0  ;;  %p2064_p11 = scmp.ne.s32.totalorder (!%p358_p3), %s2264_s27, 0 }
  0x10   : > { %524 = vst.msk [vmem:[#allocation2 + $0x41] sm:$0x1] %vm511_vm0, %v2282_v0  ;;  %525 = vst.msk [vmem:[#allocation2 + $0x59] sm:$0x1] %vm511_vm0, %v2282_v0  ;;  %s3114_s28 = smov (!%p442_p5, %s2268_s28), 1  ;;  %s3116_s18 = smov (!%p2409_p9, %s2097_s18), 15 }
  0x11   : > { %526 = vst.msk [vmem:[#allocation2 + $0x71] sm:$0x1] %vm511_vm0, %v2282_v0  ;;  %527 = vst.msk [vmem:[#allocation2 + $0x89] sm:$0x1] %vm511_vm0, %v2282_v0  ;;  %s445_s14 = scalar_select %p444_p6, %s2373_s12, 15 }
  0x12   : > { %528 = vst.msk [vmem:[#allocation2 + $0xa1] sm:$0x1] %vm511_vm0, %v2282_v0  ;;  %529 = vst.msk [vmem:[#allocation2 + $0xb9] sm:$0x1] %vm511_vm0, %v2282_v0  ;;  %s2405_s15 = sshll.u32 %s3114_s28, 5  ;;  %s3120_s18 = smov (!%p2409_p9, %s3116_s18), 15 }
  0x13   : > { %530 = vst.msk [vmem:[#allocation2 + $0xd1] sm:$0x1] %vm511_vm0, %v2282_v0  ;;  %531 = vst.msk [vmem:[#allocation2 + $0xe9] sm:$0x1] %vm511_vm0, %v2282_v0  ;;  %s2036_s16 = sshll.u32 %s445_s14, 1  ;;  %s2053_s20 = sshll.u32 %s3120_s18, 1 }
  0x14   : > { %s448_s17 = sadd.s32 %s2405_s15, %s2036_s16  ;;  %s479_s23 = sadd.s32 %s2053_s20, %s2405_s15 }
  0x15   : > { %s2038_s19 = sshll.u32 %s448_s17, 3  ;;  %s2055_s14 = sshll.u32 %s479_s23, 3 }
  0x16   : > { %s2421_s25 = scalar_lea.vmem %s3093_s0, %s2038_s19  ;;  %s2426_s12 = scalar_lea.vmem %s3099_s6, %s2038_s19 }
  0x17   : > { %s455_s21 = scalar_select %p454_p7, %s2040_s13, 0  ;;  %v532_v3 = vld [vmem:[%s2421_s25] sm:$0xff]  ;;  %v533_v4 = vld [vmem:[%s2421_s25 + $0x8] sm:$0xff]  ;;  %v534_v5 = vld [vmem:[%s2421_s25 + $0x10] sm:$0xff] }
  0x18   : > { %v555_v6 = vmul.f32 %v2416_v1, %v532_v3  ;;  %v556_v7 = vmul.f32 %v2416_v1, %v533_v4  ;;  %v557_v8 = vmul.f32 %v2416_v1, %v534_v5  ;;  %v535_v9 = vld [vmem:[%s2421_s25 + $0x18] sm:$0xff]  ;;  %v536_v10 = vld [vmem:[%s2421_s25 + $0x20] sm:$0xff]  ;;  %v537_v11 = vld [vmem:[%s2421_s25 + $0x28] sm:$0xff]  ;;  %s2490_s17 = scalar_lea.vmem %s3095_s2, %s2055_s14 }
  0x19   : > { %s3118_s21 = smov (!%p2041_p8, %s455_s21), 15  ;;  %v558_v12 = vmul.f32 %v2416_v1, %v535_v9  ;;  %v559_v13 = vmul.f32 %v2416_v1, %v536_v10  ;;  %v560_v14 = vmul.f32 %v2416_v1, %v537_v11  ;;  %v538_v15 = vld [vmem:[%s2421_s25 + $0x30] sm:$0xff]  ;;  %v539_v16 = vld [vmem:[%s2421_s25 + $0x38] sm:$0xff]  ;;  %v540_v21 = vld [vmem:[%s2421_s25 + $0x40] sm:$0xff] }
  0x1a   : > { %v578_v17 = vadd.f32 %v2431_v2, %v555_v6  ;;  %v579_v18 = vadd.f32 %v2431_v2, %v556_v7  ;;  %v580_v19 = vadd.f32 %v2431_v2, %v557_v8  ;;  %v561_v20 = vmul.f32 %v2416_v1, %v538_v15  ;;  %s2046_s13 = sshll.u32 %s3118_s21, 1  ;;  %v541_v26 = vld [vmem:[%s2421_s25 + $0x48] sm:$0xff]  ;;  %v542_v27 = vld [vmem:[%s2421_s25 + $0x50] sm:$0xff]  ;;  %v543_v28 = vld [vmem:[%s2421_s25 + $0x58] sm:$0xff]  ;;  %s2060_s21 = sshll.u32 %s3114_s28, 1 }
  0x1b   : > { %v581_v22 = vadd.f32 %v2431_v2, %v558_v12  ;;  %v582_v23 = vadd.f32 %v2431_v2, %v559_v13  ;;  %v583_v24 = vadd.f32 %v2431_v2, %v560_v14  ;;  %v562_v25 = vmul.f32 %v2416_v1, %v539_v16  ;;  %s462_s19 = sadd.s32 %s2046_s13, %s2405_s15  ;;  %v544_v33 = vld [vmem:[%s2421_s25 + $0x60] sm:$0xff]  ;;  %v545_v34 = vld [vmem:[%s2421_s25 + $0x68] sm:$0xff]  ;;  %v546_v39 = vld [vmem:[%s2421_s25 + $0x70] sm:$0xff] }
  0x1c   : > { %v594_v29 = vmax.f32 %v578_v17, 0.0  ;;  %v595_v30 = vmax.f32 %v579_v18, 0.0  ;;  %v596_v31 = vmax.f32 %v580_v19, 0.0  ;;  %v584_v32 = vadd.f32 %v2431_v2, %v561_v20  ;;  %s2048_s22 = sshll.u32 %s462_s19, 3  ;;  %v547_v44 = vld [vmem:[%s2421_s25 + $0x78] sm:$0xff] }
  0x1d   : > { %v597_v35 = vmax.f32 %v581_v22, 0.0  ;;  %v598_v36 = vmax.f32 %v582_v23, 0.0  ;;  %v599_v37 = vmax.f32 %v583_v24, 0.0  ;;  %v585_v38 = vadd.f32 %v2431_v2, %v562_v25  ;;  %s2478_s18 = scalar_lea.vmem %s3094_s1, %s2048_s22 }
  0x1e   : > { %612 = vst.msk [vmem:[#allocation2 + $0x19] sm:$0xff] %vm611_vm1, %v594_v29  ;;  %613 = vst.msk [vmem:[#allocation2 + $0x21] sm:$0xff] %vm611_vm1, %v595_v30  ;;  %v600_v40 = vmax.f32 %v584_v32, 0.0  ;;  %v563_v41 = vmul.f32 %v2416_v1, %v540_v21  ;;  %v564_v42 = vmul.f32 %v2416_v1, %v541_v26  ;;  %v565_v43 = vmul.f32 %v2416_v1, %v542_v27  ;;  %s500_s25 = scalar_select %p499_p10, %s2264_s27, 1 }
  0x1f   : > { %614 = vst.msk [vmem:[#allocation2 + $0x31] sm:$0xff] %vm611_vm1, %v596_v31  ;;  %615 = vst.msk [vmem:[#allocation2 + $0x39] sm:$0xff] %vm611_vm1, %v597_v35  ;;  %v601_v45 = vmax.f32 %v585_v38, 0.0  ;;  %v566_v46 = vmul.f32 %v2416_v1, %v543_v28  ;;  %v567_v47 = vmul.f32 %v2416_v1, %v544_v33  ;;  %v568_v48 = vmul.f32 %v2416_v1, %v545_v34 }
  0x20   : > { %616 = vst.msk [vmem:[#allocation2 + $0x49] sm:$0xff] %vm611_vm1, %v598_v36  ;;  %617 = vst.msk [vmem:[#allocation2 + $0x51] sm:$0xff] %vm611_vm1, %v599_v37  ;;  %v586_v49 = vadd.f32 %v2431_v2, %v563_v41  ;;  %v587_v50 = vadd.f32 %v2431_v2, %v564_v42  ;;  %v588_v51 = vadd.f32 %v2431_v2, %v565_v43  ;;  %s2512_s28 = sadd.s32 %s2060_s21, %s500_s25 }
  0x21   : > { %618 = vst.msk [vmem:[#allocation2 + $0x61] sm:$0xff] %vm611_vm1, %v600_v40  ;;  %v569_v52 = vmul.f32 %v2416_v1, %v546_v39  ;;  %619 = vst.msk [vmem:[#allocation2 + $0x69] sm:$0xff] %vm611_vm1, %v601_v45  ;;  %v589_v53 = vadd.f32 %v2431_v2, %v566_v46  ;;  %v590_v54 = vadd.f32 %v2431_v2, %v567_v47  ;;  %s503_s20 = scalar_lea.vmem %s3100_s7, %s2512_s28  ;;  %s510_s24 = scalar_lea.vmem %s3101_s8, %s2512_s28 }
  0x22   : > { %v591_v55 = vadd.f32 %v2431_v2, %v568_v48  ;;  %v570_v56 = vmul.f32 %v2416_v1, %v547_v44  ;;  %v602_v57 = vmax.f32 %v586_v49, 0.0  ;;  %v603_v58 = vmax.f32 %v587_v50, 0.0  ;;  %631 = sbr.rel (%p2064_p11) target bundleno = 41 (0x29), region = 48 }
  0x23   : > { %v604_v59 = vmax.f32 %v588_v51, 0.0  ;;  %v592_v60 = vadd.f32 %v2431_v2, %v569_v52  ;;  %v605_v61 = vmax.f32 %v589_v53, 0.0  ;;  %v606_v62 = vmax.f32 %v590_v54, 0.0 }
  0x24   : > { %v607_v63 = vmax.f32 %v591_v55, 0.0  ;;  %v593_v0 = vadd.f32 %v2431_v2, %v570_v56  ;;  %620 = vst.msk [vmem:[#allocation2 + $0x79] sm:$0xff] %vm611_vm1, %v602_v57  ;;  %621 = vst.msk [vmem:[#allocation2 + $0x81] sm:$0xff] %vm611_vm1, %v603_v58  ;;  %v2283_v2 = vmov (!%p2064_p11), 0.0  }
  0x25   : > { %622 = vst.msk [vmem:[#allocation2 + $0x91] sm:$0xff] %vm611_vm1, %v604_v59  ;;  %v608_v1 = vmax.f32 %v592_v60, 0.0  ;;  %623 = vst.msk [vmem:[#allocation2 + $0x99] sm:$0xff] %vm611_vm1, %v605_v61 }
  0x26   : > { %624 = vst.msk [vmem:[#allocation2 + $0xa9] sm:$0xff] %vm611_vm1, %v606_v62  ;;  %625 = vst.msk [vmem:[#allocation2 + $0xb1] sm:$0xff] %vm611_vm1, %v607_v63  ;;  %v609_v3 = vmax.f32 %v593_v0, 0.0 }
  0x27   : > { %626 = vst.msk [vmem:[#allocation2 + $0xc1] sm:$0xff] %vm611_vm1, %v608_v1  ;;  %632 = vst.msk [vmem:[#allocation2 + $0x1] sm:$0xff] (!%p2064_p11), %vm611_vm1, %v2283_v2 }
  0x28   : > { %627 = vst.msk [vmem:[#allocation2 + $0xc9] sm:$0xff] %vm611_vm1, %v609_v3  ;;  %633 = vst.msk [vmem:[#allocation2 + $0x9] sm:$0xff] (!%p2064_p11), %vm611_vm1, %v2283_v2 }
  0x29 PF: > { %p2065_p12 = scmp.le.s32.totalorder %s2264_s27, 0 }
  0x2a   : > { %v638_v4 = vld [vmem:[%s2478_s18] sm:$0xff] (!%p2065_p12)  ;;  %v639_v8 = vld [vmem:[%s2478_s18 + $0x8] sm:$0xff] (!%p2065_p12) }
  0x2b   : > { %637 = sbr.rel (%p2065_p12) target bundleno = 51 (0x33), region = 52  ;;  %v2066_v5 = vld [vmem:[%s3097_s4] ss:$0 sm:$0xff] (!%p2065_p12) }
  0x2c   : > { %v2067_v6 = vld [vmem:[%s3098_s5] ss:$0 sm:$0xff] (!%p2065_p12)  ;;  %v647_v7 = vmul.f32 (!%p2065_p12), %v2066_v5, %v638_v4  ;;  %v648_v9 = vmul.f32 (!%p2065_p12), %v2066_v5, %v639_v8 }
  0x2e   : > { %v656_v10 = vadd.f32 (!%p2065_p12), %v2067_v6, %v647_v7  ;;  %v657_v11 = vadd.f32 (!%p2065_p12), %v2067_v6, %v648_v9 }
  0x30   : > { %v658_v12 = vmax.f32 (!%p2065_p12), %v656_v10, 0.0  ;;  %v659_v13 = vmax.f32 (!%p2065_p12), %v657_v11, 0.0 }
  0x32   : > { %660 = vst.msk [vmem:[#allocation2 + $0x1] sm:$0xff] %vm611_vm1, %v658_v12  ;;  %661 = vst.msk [vmem:[#allocation2 + $0x9] sm:$0xff] %vm611_vm1, %v659_v13 }
  0x33 PF: > { %p2068_p13 = scmp.ne.s32.totalorder %s2264_s27, 1 }
  0x34   : > { %v2284_v14 = vmov (!%p2068_p13), 0.0  }
  0x35   : > { %665 = sbr.rel (%p2068_p13) target bundleno = 60 (0x3c), region = 56  ;;  %667 = vst.msk [vmem:[#allocation2 + $0xd9] sm:$0xff] (!%p2068_p13), %vm611_vm1, %v2284_v14  ;;  %668 = vst.msk [vmem:[#allocation2 + $0xe1] sm:$0xff] (!%p2068_p13), %vm611_vm1, %v2284_v14 }
  0x3c PF: > { %p2069_p0 = scmp.ge.s32.totalorder %s2264_s27, 1 }
  0x3d   : > { %v673_v15 = vld [vmem:[%s2490_s17] sm:$0xff] (!%p2069_p0)  ;;  %v674_v19 = vld [vmem:[%s2490_s17 + $0x8] sm:$0xff] (!%p2069_p0) }
  0x3e   : > { %672 = sbr.rel (%p2069_p0) target bundleno = 70 (0x46), region = 60  ;;  %v2070_v16 = vld [vmem:[%s3097_s4] ss:$0 sm:$0xff] (!%p2069_p0) }
  0x3f   : > { %v2071_v17 = vld [vmem:[%s3098_s5] ss:$0 sm:$0xff] (!%p2069_p0)  ;;  %v682_v18 = vmul.f32 (!%p2069_p0), %v2070_v16, %v673_v15  ;;  %v683_v20 = vmul.f32 (!%p2069_p0), %v2070_v16, %v674_v19 }
  0x41   : > { %v691_v21 = vadd.f32 (!%p2069_p0), %v2071_v17, %v682_v18  ;;  %v692_v22 = vadd.f32 (!%p2069_p0), %v2071_v17, %v683_v20 }
  0x43   : > { %v693_v23 = vmax.f32 (!%p2069_p0), %v691_v21, 0.0  ;;  %v694_v24 = vmax.f32 (!%p2069_p0), %v692_v22, 0.0 }
  0x45   : > { %696 = vst.msk [vmem:[#allocation2 + $0xd9] sm:$0xff] %vm611_vm1, %v693_v23  ;;  %697 = vst.msk [vmem:[#allocation2 + $0xe1] sm:$0xff] %vm611_vm1, %v694_v24 }
  0x46 PF: > { %v730_v25 = vld [vmem:[#allocation2 + $0x2] sm:$0xff]  ;;  %s2285_s27 = smov 16   ;;  %s2286_s19 = smov 8   ;;  %v731_v27 = vld [vmem:[#allocation2 + $0xa] sm:$0xff]  ;;  %v2566_v30 = vld [vmem:[#allocation2 + $0x18] sm:$0xff]  ;;  %vm1371_vm2 = vcmask 130048  }
  0x47   : > { %v714_v26 = vld [vmem:[#allocation2 + $0x1] sm:$0xff]  ;;  %923 = vrot.lane.b32.xlu1 %v730_v25, %s2285_s27  ;;  %v715_v28 = vld [vmem:[#allocation2 + $0x9] sm:$0xff]  ;;  %s2287_s17 = smov 24   ;;  %v716_v31 = vld [vmem:[#allocation2 + $0x19] sm:$0xff]  ;;  %s2288_s22 = smov 32   ;;  %vm1388_vm3 = vcmask 195584  }
  0x48   : > { %859 = vrot.lane.b32.xlu0 %v714_v26, %s2286_s19  ;;  %v2564_v29 = vld [vmem:[#allocation2 + $0x20] sm:$0xff]  ;;  %v1491_v35 = vld [vmem:[%s3096_s3 + $0x8] sm:$0xff]  ;;  %s2289_s16 = smov 40   ;;  %v1492_v37 = vld [vmem:[%s3096_s3 + $0x10] sm:$0xff]  ;;  %s2290_s18 = smov 48   ;;  %vm1405_vm4 = vcmask 261120  }
  0x49   : > { %v778_v32 = vld [vmem:[#allocation2 + $0x1a] sm:$0xff]  ;;  %v2590_v40 = vld [vmem:[#allocation2 + $0x30] sm:$0xff]  ;;  %v779_v41 = vld [vmem:[#allocation2 + $0x22] sm:$0xff]  ;;  %s2291_s26 = smov 56   ;;  %s2292_s21 = smov 64   ;;  %vm1422_vm5 = vcmask 326656  }
  0x4a   : > { %v763_v33 = vld [vmem:[#allocation2 + $0x21] sm:$0xff]  ;;  %v1493_v38 = vld [vmem:[%s3096_s3 + $0x18] sm:$0xff]  ;;  %v1496_v45 = vld [vmem:[%s3096_s3 + $0x30] sm:$0xff]  ;;  %vm1439_vm6 = vcmask 392192   ;;  %vm1456_vm7 = vcmask 457728   ;;  %vm1473_vm8 = vcmask 523264  }
  0x4b   : > { %925 = vrot.lane.b32.xlu1 %v731_v27, %s2285_s27  ;;  %v1490_v34 = vld [vmem:[%s3096_s3] sm:$0xff]  ;;  %v2169_v39 = vpack.c.bf16 %v1493_v38, %v1492_v37  ;;  %v1495_v43 = vld [vmem:[%s3096_s3 + $0x28] sm:$0xff]  ;;  %v1497_v46 = vld [vmem:[%s3096_s3 + $0x38] sm:$0xff]  ;;  %vm1499_vm9 = vcmask 588800  }
  0x4c   : > { %861 = vrot.lane.b32.xlu0 %v715_v28, %s2286_s19  ;;  %v2165_v36 = vpack.c.bf16 %v1491_v35, %v1490_v34  ;;  %v1494_v42 = vld [vmem:[%s3096_s3 + $0x20] sm:$0xff]  ;;  %v811_v47 = vld [vmem:[#allocation2 + $0x31] sm:$0xff]  ;;  %v2177_v49 = vpack.c.bf16 %v1497_v46, %v1496_v45  ;;  %v2629_v54 = vld [vmem:[#allocation2 + $0x48] sm:$0xff] }
  0x4d   : > { %v2173_v44 = vpack.c.bf16 %v1495_v43, %v1494_v42  ;;  %v2610_v48 = vld [vmem:[#allocation2 + $0x38] sm:$0xff]  ;;  %v1498_v50 = vld [vmem:[%s3096_s3 + $0x40] sm:$0xff]  ;;  %v813_v55 = vld [vmem:[#allocation2 + $0x49] sm:$0xff] }
  0x4e   : > { %2166 = vmatprep.subr.bf16.mxu0 %v2165_v36  ;;  %2181 = vmatprep.subr.bf16.mxu1 %v2165_v36  ;;  %v827_v51 = vld [vmem:[#allocation2 + $0x32] sm:$0xff]  ;;  %v828_v53 = vld [vmem:[#allocation2 + $0x3a] sm:$0xff]  ;;  %v829_v57 = vld [vmem:[#allocation2 + $0x4a] sm:$0xff] }
  0x4f   : > { %989 = vrot.lane.b32.xlu1 %v2564_v29, %s2287_s17  ;;  %2168 = vmatpush3.bf16.msra.mxu0 %v2165_v36  ;;  %v812_v52 = vld [vmem:[#allocation2 + $0x39] sm:$0xff]  ;;  %v2637_v56 = vld [vmem:[#allocation2 + $0x50] sm:$0xff]  ;;  %v815_v61 = vld [vmem:[#allocation2 + $0x61] sm:$0xff] }
  0x50   : > { %987 = vrot.lane.b32.xlu0 %v2566_v30, %s2287_s17  ;;  %2186 = vmatpush3.bf16.msra.mxu1 %v2165_v36  ;;  %v814_v58 = vld [vmem:[#allocation2 + $0x51] sm:$0xff]  ;;  %v2653_v60 = vld [vmem:[#allocation2 + $0x60] sm:$0xff]  ;;  %v2661_v62 = vld [vmem:[#allocation2 + $0x68] sm:$0xff] }
  0x51   : > { %2170 = vmatprep.subr.bf16.mxu0 %v2169_v39  ;;  %2182 = vmatprep.subr.bf16.mxu1 %v2169_v39  ;;  %v830_v59 = vld [vmem:[#allocation2 + $0x52] sm:$0xff]  ;;  %v831_v63 = vld [vmem:[#allocation2 + $0x62] sm:$0xff]  ;;  %v832_v1 = vld [vmem:[#allocation2 + $0x6a] sm:$0xff] }
  0x52   : > { %v816_v0 = vld [vmem:[#allocation2 + $0x69] sm:$0xff]  ;;  %v2677_v4 = vld [vmem:[#allocation2 + $0x78] sm:$0xff]  ;;  %v2689_v10 = vld [vmem:[#allocation2 + $0x80] sm:$0xff] }
  0x53   : > { %863 = vrot.lane.b32.xlu1 %v716_v31, %s2286_s19  ;;  %2172 = vmatpush3.bf16.msra.mxu0 %v2169_v39  ;;  %v817_v9 = vld [vmem:[#allocation2 + $0x79] sm:$0xff]  ;;  %v818_v16 = vld [vmem:[#allocation2 + $0x81] sm:$0xff]  ;;  %v819_v46 = vld [vmem:[#allocation2 + $0x91] sm:$0xff] }
  0x54   : > { %1051 = vrot.lane.b32.xlu0 %v716_v31, %s2288_s22  ;;  %2187 = vmatpush3.bf16.msra.mxu1 %v2169_v39  ;;  %v833_v15 = vld [vmem:[#allocation2 + $0x7a] sm:$0xff]  ;;  %v834_v21 = vld [vmem:[#allocation2 + $0x82] sm:$0xff]  ;;  %v2717_v31 = vld [vmem:[#allocation2 + $0x90] sm:$0xff] }
  0x55   : > { %2174 = vmatprep.subr.bf16.mxu0 %v2173_v44  ;;  %2183 = vmatprep.subr.bf16.mxu1 %v2173_v44  ;;  %v698_v24 = vld [vmem:[#allocation2] sm:$0xff]  ;;  %v699_v35 = vld [vmem:[#allocation2 + $0x8] sm:$0xff] }
  0x57   : > { %1115 = vrot.lane.b32.xlu1 %v778_v32, %s2289_s16  ;;  %2176 = vmatpush3.bf16.msra.mxu0 %v2173_v44 }
  0x58   : > { %1053 = vrot.lane.b32.xlu0 %v763_v33, %s2288_s22  ;;  %2188 = vmatpush3.bf16.msra.mxu1 %v2173_v44 }
  0x59   : > { %2178 = vmatprep.subr.bf16.mxu0 %v2177_v49  ;;  %2184 = vmatprep.subr.bf16.mxu1 %v2177_v49 }
  0x5b   : > { %927 = vrot.lane.b32.xlu1 %v778_v32, %s2285_s27  ;;  %2180 = vmatpush3.bf16.msra.mxu0 %v2177_v49 }
  0x5c   : > { %865 = vrot.lane.b32.xlu0 %v763_v33, %s2286_s19  ;;  %2189 = vmatpush3.bf16.msra.mxu1 %v2177_v49 }
  0x5d   : > { %2139 = vmatprep.subr.mxu0 %v1498_v50  ;;  %2185 = vmatprep.subr.mxu1 %v1498_v50 }
  0x5f   : > { %1179 = vrot.lane.b32.xlu1 %v2590_v40, %s2290_s18  ;;  %2140 = vmatpush3.msra.mxu0 %v1498_v50 }
  0x60   : > { %1117 = vrot.lane.b32.xlu0 %v779_v41, %s2289_s16  ;;  %2190 = vmatpush3.msra.mxu1 %v1498_v50 }
  0x63   : > { %991 = vrot.lane.b32.xlu1 %v2590_v40, %s2287_s17 }
  0x64   : > { %929 = vrot.lane.b32.xlu0 %v779_v41, %s2285_s27 }
  0x67   : > { %1243 = vrot.lane.b32.xlu1 %v811_v47, %s2291_s26 }
  0x68   : > { %1181 = vrot.lane.b32.xlu0 %v2610_v48, %s2290_s18 }
  0x6b   : > { %1055 = vrot.lane.b32.xlu1 %v811_v47, %s2288_s22 }
  0x6c   : > { %993 = vrot.lane.b32.xlu0 %v2610_v48, %s2287_s17 }
  0x6f   : > { %1307 = vrot.lane.b32.xlu1 %v827_v51, %s2292_s21 }
  0x70   : > { %1245 = vrot.lane.b32.xlu0 %v812_v52, %s2291_s26 }
  0x73   : > { %1057 = vrot.lane.b32.xlu1 %v812_v52, %s2288_s22 }
  0x74   : > { %867 = vrot.lane.b32.xlu0 %v811_v47, %s2286_s19  ;;  %v2739_v47 = vld [vmem:[#allocation2 + $0x98] sm:$0xff] }
  0x77   : > { %1309 = vrot.lane.b32.xlu1 %v828_v53, %s2292_s21 }
  0x78   : > { %1119 = vrot.lane.b32.xlu0 %v827_v51, %s2289_s16 }
  0x7b   : > { %931 = vrot.lane.b32.xlu1 %v827_v51, %s2285_s27 }
  0x7c   : > { %869 = vrot.lane.b32.xlu0 %v812_v52, %s2286_s19 }
  0x7f   : > { %1183 = vrot.lane.b32.xlu1 %v2629_v54, %s2290_s18 }
  0x80   : > { %1121 = vrot.lane.b32.xlu0 %v828_v53, %s2289_s16 }
  0x83   : > { %995 = vrot.lane.b32.xlu1 %v2629_v54, %s2287_s17 }
  0x84   : > { %933 = vrot.lane.b32.xlu0 %v828_v53, %s2285_s27 }
  0x87   : > { %1247 = vrot.lane.b32.xlu1 %v813_v55, %s2291_s26 }
  0x88   : > { %1185 = vrot.lane.b32.xlu0 %v2637_v56, %s2290_s18 }
  0x8b   : > { %1059 = vrot.lane.b32.xlu1 %v813_v55, %s2288_s22 }
  0x8c   : > { %997 = vrot.lane.b32.xlu0 %v2637_v56, %s2287_s17 }
  0x8f   : > { %1311 = vrot.lane.b32.xlu1 %v829_v57, %s2292_s21 }
  0x90   : > { %1249 = vrot.lane.b32.xlu0 %v814_v58, %s2291_s26 }
  0x93   : > { %1061 = vrot.lane.b32.xlu1 %v814_v58, %s2288_s22 }
  0x94   : > { %871 = vrot.lane.b32.xlu0 %v813_v55, %s2286_s19 }
  0x97   : > { %1313 = vrot.lane.b32.xlu1 %v830_v59, %s2292_s21 }
  0x98   : > { %1123 = vrot.lane.b32.xlu0 %v829_v57, %s2289_s16 }
  0x9b   : > { %935 = vrot.lane.b32.xlu1 %v829_v57, %s2285_s27 }
  0x9c   : > { %873 = vrot.lane.b32.xlu0 %v814_v58, %s2286_s19 }
  0x9f   : > { %1187 = vrot.lane.b32.xlu1 %v2653_v60, %s2290_s18 }
  0xa0   : > { %1125 = vrot.lane.b32.xlu0 %v830_v59, %s2289_s16 }
  0xa3   : > { %999 = vrot.lane.b32.xlu1 %v2653_v60, %s2287_s17 }
  0xa4   : > { %937 = vrot.lane.b32.xlu0 %v830_v59, %s2285_s27 }
  0xa7   : > { %1251 = vrot.lane.b32.xlu1 %v815_v61, %s2291_s26 }
  0xa8   : > { %1189 = vrot.lane.b32.xlu0 %v2661_v62, %s2290_s18 }
  0xab   : > { %1063 = vrot.lane.b32.xlu1 %v815_v61, %s2288_s22 }
  0xac   : > { %1001 = vrot.lane.b32.xlu0 %v2661_v62, %s2287_s17 }
  0xaf   : > { %1315 = vrot.lane.b32.xlu1 %v831_v63, %s2292_s21 }
  0xb0   : > { %1253 = vrot.lane.b32.xlu0 %v816_v0, %s2291_s26 }
  0xb3   : > { %1065 = vrot.lane.b32.xlu1 %v816_v0, %s2288_s22 }
  0xb4   : > { %875 = vrot.lane.b32.xlu0 %v815_v61, %s2286_s19 }
  0xb7   : > { %1317 = vrot.lane.b32.xlu1 %v832_v1, %s2292_s21 }
  0xb8   : > { %1127 = vrot.lane.b32.xlu0 %v831_v63, %s2289_s16 }
  0xb9   : > { %v924_v3 = vpop.permute.xlu1 %923 }
  0xba   : > { %v860_v2 = vpop.permute.xlu0 %859 }
  0xbb   : > { %939 = vrot.lane.b32.xlu1 %v831_v63, %s2285_s27  ;;  %v1355_v25 = vsel %vm611_vm1, %v698_v24, %v860_v2  ;;  %v835_v63 = vld [vmem:[#allocation2 + $0x92] sm:$0xff] }
  0xbc   : > { %877 = vrot.lane.b32.xlu0 %v816_v0, %s2286_s19  ;;  %v1372_v28 = vsel %vm1371_vm2, %v1355_v25, %v924_v3  ;;  %v820_v0 = vld [vmem:[#allocation2 + $0x99] sm:$0xff] }
  0xbd   : > { %v2679_v5 = vpop.permute.xlu1 %925 }
  0xbe   : > { %v862_v6 = vpop.permute.xlu0 %861 }
  0xbf   : > { %1191 = vrot.lane.b32.xlu1 %v2677_v4, %s2290_s18  ;;  %v1356_v39 = vsel %vm611_vm1, %v699_v35, %v862_v6  ;;  %v836_v6 = vld [vmem:[#allocation2 + $0x9a] sm:$0xff] }
  0xc0   : > { %1129 = vrot.lane.b32.xlu0 %v832_v1, %s2289_s16  ;;  %v1373_v45 = vsel %vm1371_vm2, %v1356_v39, %v2679_v5 }
  0xc1   : > { %v2684_v7 = vpop.permute.xlu1 %989 }
  0xc2   : > { %v988_v8 = vpop.permute.xlu0 %987  ;;  %v1390_v49 = vsel %vm1388_vm3, %v1373_v45, %v2684_v7 }
  0xc3   : > { %1003 = vrot.lane.b32.xlu1 %v2677_v4, %s2287_s17  ;;  %v1389_v32 = vsel %vm1388_vm3, %v1372_v28, %v988_v8  ;;  %v821_v28 = vld [vmem:[#allocation2 + $0xa9] sm:$0xff] }
  0xc4   : > { %941 = vrot.lane.b32.xlu0 %v832_v1, %s2285_s27 }
  0xc5   : > { %v2691_v11 = vpop.permute.xlu1 %863 }
  0xc6   : > { %v1052_v12 = vpop.permute.xlu0 %1051 }
  0xc7   : > { %1255 = vrot.lane.b32.xlu1 %v817_v9, %s2291_s26  ;;  %v1406_v36 = vsel %vm1405_vm4, %v1389_v32, %v1052_v12  ;;  %v2802_v32 = vld [vmem:[#allocation2 + $0xb0] sm:$0xff] }
  0xc8   : > { %1193 = vrot.lane.b32.xlu0 %v2689_v10, %s2290_s18 }
  0xc9   : > { %v1116_v13 = vpop.permute.xlu1 %1115 }
  0xca   : > { %v1054_v14 = vpop.permute.xlu0 %1053  ;;  %v1423_v37 = vsel %vm1422_vm5, %v1406_v36, %v1116_v13  ;;  %v1357_v13 = vsel %vm611_vm1, %v2566_v30, %v2691_v11 }
  0xcb   : > { %1067 = vrot.lane.b32.xlu1 %v817_v9, %s2288_s22  ;;  %v1407_v52 = vsel %vm1405_vm4, %v1390_v49, %v1054_v14  ;;  %v838_v49 = vld [vmem:[#allocation2 + $0xb2] sm:$0xff] }
  0xcc   : > { %1005 = vrot.lane.b32.xlu0 %v2689_v10, %s2287_s17 }
  0xcd   : > { %v2699_v17 = vpop.permute.xlu1 %927 }
  0xce   : > { %v2701_v18 = vpop.permute.xlu0 %865  ;;  %v1374_v14 = vsel %vm1371_vm2, %v1357_v13, %v2699_v17  ;;  %v823_v13 = vld [vmem:[#allocation2 + $0xc1] sm:$0xff] }
  0xcf   : > { %1319 = vrot.lane.b32.xlu1 %v833_v15, %s2292_s21 }
  0xd0   : > { %1257 = vrot.lane.b32.xlu0 %v818_v16, %s2291_s26 }
  0xd1   : > { %v1180_v19 = vpop.permute.xlu1 %1179 }
  0xd2   : > { %v1118_v20 = vpop.permute.xlu0 %1117  ;;  %v1440_v38 = vsel %vm1439_vm6, %v1423_v37, %v1180_v19 }
  0xd3   : > { %1069 = vrot.lane.b32.xlu1 %v818_v16, %s2288_s22  ;;  %v1424_v53 = vsel %vm1422_vm5, %v1407_v52, %v1118_v20 }
  0xd4   : > { %879 = vrot.lane.b32.xlu0 %v817_v9, %s2286_s19 }
  0xd5   : > { %v2707_v22 = vpop.permute.xlu1 %991 }
  0xd6   : > { %v2709_v23 = vpop.permute.xlu0 %929 }
  0xd7   : > { %1321 = vrot.lane.b32.xlu1 %v834_v21, %s2292_s21 }
  0xd8   : > { %1131 = vrot.lane.b32.xlu0 %v833_v15, %s2289_s16 }
  0xd9   : > { %v1244_v26 = vpop.permute.xlu1 %1243 }
  0xda   : > { %v1182_v27 = vpop.permute.xlu0 %1181  ;;  %v1457_v41 = vsel %vm1456_vm7, %v1440_v38, %v1244_v26  ;;  %v1358_v26 = vsel %vm611_vm1, %v2564_v29, %v2701_v18 }
  0xdb   : > { %943 = vrot.lane.b32.xlu1 %v833_v15, %s2285_s27  ;;  %v1441_v55 = vsel %vm1439_vm6, %v1424_v53, %v1182_v27  ;;  %v2778_v15 = vld [vmem:[#allocation2 + $0xa8] sm:$0xff]  ;;  %v1375_v27 = vsel %vm1371_vm2, %v1358_v26, %v2709_v23 }
  0xdc   : > { %881 = vrot.lane.b32.xlu0 %v818_v16, %s2286_s19  ;;  %v1391_v16 = vsel %vm1388_vm3, %v1374_v14, %v2707_v22  ;;  %v808_v14 = vld [vmem:[#allocation2 + $0xc8] sm:$0xff] }
  0xdd   : > { %v2720_v33 = vpop.permute.xlu1 %1055 }
  0xde   : > { %v2722_v34 = vpop.permute.xlu0 %993 }
  0xdf   : > { %1195 = vrot.lane.b32.xlu1 %v2717_v31, %s2290_s18 }
  0xe0   : > { %1133 = vrot.lane.b32.xlu0 %v834_v21, %s2289_s16 }
  0xe1   : > { %v1308_v42 = vpop.permute.xlu1 %1307 }
  0xe2   : > { %v1246_v43 = vpop.permute.xlu0 %1245  ;;  %v1474_v44 = vsel %vm1473_vm8, %v1457_v41, %v1308_v42  ;;  %v837_v41 = vld [vmem:[#allocation2 + $0xaa] sm:$0xff] }
  0xe3   : > { %1007 = vrot.lane.b32.xlu1 %v2717_v31, %s2287_s17  ;;  %2141 = vmatprep.mubr.msk.f32.mxu0 %vm1499_vm9, %v1474_v44  ;;  %v1458_v57 = vsel %vm1456_vm7, %v1441_v55, %v1246_v43  ;;  %v822_v42 = vld [vmem:[#allocation2 + $0xb1] sm:$0xff] }
  0xe4   : > { %945 = vrot.lane.b32.xlu0 %v834_v21, %s2285_s27  ;;  %v1408_v21 = vsel %vm1405_vm4, %v1391_v16, %v2720_v33  ;;  %v1392_v33 = vsel %vm1388_vm3, %v1375_v27, %v2722_v34 }
  0xe5   : > { %v1058_v50 = vpop.permute.xlu1 %1057 }
  0xe6   : > { %v2743_v51 = vpop.permute.xlu0 %867  ;;  %v1409_v29 = vsel %vm1405_vm4, %v1392_v33, %v1058_v50  ;;  %v793_v33 = vld [vmem:[#allocation2 + $0xca] sm:$0xff] }
  0xe7   : > { %1259 = vrot.lane.b32.xlu1 %v819_v46, %s2291_s26 }
  0xe8   : > { %1197 = vrot.lane.b32.xlu0 %v2739_v47, %s2290_s18 }
  0xe9   : > { %v1310_v58 = vpop.permute.xlu1 %1309 }
  0xea   : > { %v1120_v59 = vpop.permute.xlu0 %1119  ;;  %v1475_v61 = vsel %vm1473_vm8, %v1458_v57, %v1310_v58  ;;  %v1359_v57 = vsel %vm611_vm1, %v2590_v40, %v2743_v51 }
  0xeb   : > { %1071 = vrot.lane.b32.xlu1 %v819_v46, %s2288_s22  ;;  %2142 = vmatmul.mubr.msk.f32.vlgmr.msra.gmra.mrb[0].mxu0 %vm1499_vm9, %v1475_v61  ;;  %v1425_v30 = vsel %vm1422_vm5, %v1408_v21, %v1120_v59  ;;  %v807_v59 = vld [vmem:[#allocation2 + $0xc0] sm:$0xff] }
  0xec   : > { %1009 = vrot.lane.b32.xlu0 %v2739_v47, %s2287_s17 }
  0xed   : > { %v2757_v1 = vpop.permute.xlu1 %931 }
  0xee   : > { %v2759_v3 = vpop.permute.xlu0 %869  ;;  %v1376_v58 = vsel %vm1371_vm2, %v1359_v57, %v2757_v1  ;;  %v841_v57 = vld [vmem:[#allocation2 + $0xda] sm:$0xff] }
  0xef   : > { %1323 = vrot.lane.b32.xlu1 %v835_v63, %s2292_s21 }
  0xf0   : > { %1261 = vrot.lane.b32.xlu0 %v820_v0, %s2291_s26 }
  0xf1   : > { %v1184_v2 = vpop.permute.xlu1 %1183 }
  0xf2   : > { %v1122_v5 = vpop.permute.xlu0 %1121  ;;  %v1442_v11 = vsel %vm1439_vm6, %v1425_v30, %v1184_v2 }
  0xf3   : > { %1073 = vrot.lane.b32.xlu1 %v820_v0, %s2288_s22  ;;  %v1426_v18 = vsel %vm1422_vm5, %v1409_v29, %v1122_v5 }
  0xf4   : > { %883 = vrot.lane.b32.xlu0 %v819_v46, %s2286_s19 }
  0xf5   : > { %v2765_v7 = vpop.permute.xlu1 %995 }
  0xf6   : > { %v2767_v8 = vpop.permute.xlu0 %933  ;;  %v1393_v61 = vsel %vm1388_vm3, %v1376_v58, %v2765_v7  ;;  %v1360_v7 = vsel %vm611_vm1, %v2610_v48, %v2759_v3 }
  0xf7   : > { %1325 = vrot.lane.b32.xlu1 %v836_v6, %s2292_s21 }
  0xf8   : > { %1135 = vrot.lane.b32.xlu0 %v835_v63, %s2289_s16 }
  0xf9   : > { %v1248_v9 = vpop.permute.xlu1 %1247 }
  0xfa   : > { %v1186_v12 = vpop.permute.xlu0 %1185  ;;  %v1459_v17 = vsel %vm1456_vm7, %v1442_v11, %v1248_v9 }
  0xfb   : > { %947 = vrot.lane.b32.xlu1 %v835_v63, %s2285_s27  ;;  %v1443_v23 = vsel %vm1439_vm6, %v1426_v18, %v1186_v12  ;;  %v1377_v12 = vsel %vm1371_vm2, %v1360_v7, %v2767_v8  ;;  %v810_v18 = vld [vmem:[#allocation2 + $0xe0] sm:$0xff] }
  0xfc   : > { %885 = vrot.lane.b32.xlu0 %v820_v0, %s2286_s19 }
  0xfd   : > { %v1060_v19 = vpop.permute.xlu1 %1059 }
  0xfe   : > { %v2782_v20 = vpop.permute.xlu0 %997  ;;  %v1410_v2 = vsel %vm1405_vm4, %v1393_v61, %v1060_v19 }
  0xff   : > { %1199 = vrot.lane.b32.xlu1 %v2778_v15, %s2290_s18  ;;  %v1394_v16 = vsel %vm1388_vm3, %v1377_v12, %v2782_v20  ;;  %v839_v20 = vld [vmem:[#allocation2 + $0xc2] sm:$0xff] }
 0x100   : > { %1137 = vrot.lane.b32.xlu0 %v836_v6, %s2289_s16 }
 0x101   : > { %v1312_v24 = vpop.permute.xlu1 %1311 }
 0x102   : > { %v1250_v25 = vpop.permute.xlu0 %1249  ;;  %v1476_v22 = vsel %vm1473_vm8, %v1459_v17, %v1312_v24 }
 0x103   : > { %1011 = vrot.lane.b32.xlu1 %v2778_v15, %s2287_s17  ;;  %2144 = vmatprep.mubr.msk.f32.mxu0 %vm1499_vm9, %v1476_v22  ;;  %v1460_v37 = vsel %vm1456_vm7, %v1443_v23, %v1250_v25  ;;  %v824_v25 = vld [vmem:[#allocation2 + $0xc9] sm:$0xff]  ;;  %v809_v23 = vld [vmem:[#allocation2 + $0xd8] sm:$0xff] }
 0x104   : > { %949 = vrot.lane.b32.xlu0 %v836_v6, %s2285_s27 }
 0x105   : > { %v1062_v35 = vpop.permute.xlu1 %1061 }
 0x106   : > { %v2806_v36 = vpop.permute.xlu0 %871  ;;  %v1411_v30 = vsel %vm1405_vm4, %v1394_v16, %v1062_v35 }
 0x107   : > { %1263 = vrot.lane.b32.xlu1 %v821_v28, %s2291_s26 }
 0x108   : > { %1201 = vrot.lane.b32.xlu0 %v2802_v32, %s2290_s18 }
 0x109   : > { %v1314_v38 = vpop.permute.xlu1 %1313 }
 0x10a   : > { %v1124_v39 = vpop.permute.xlu0 %1123  ;;  %v1477_v34 = vsel %vm1473_vm8, %v1460_v37, %v1314_v38 }
 0x10b   : > { %1075 = vrot.lane.b32.xlu1 %v821_v28, %s2288_s22  ;;  %2145 = vmatmul.mubr.msk.f32.gmra.mrb[2].mxu0 %vm1499_vm9, %v1477_v34  ;;  %v1427_v5 = vsel %vm1422_vm5, %v1410_v2, %v1124_v39  ;;  %v1361_v39 = vsel %vm611_vm1, %v2629_v54, %v2806_v36  ;;  %v842_v36 = vld [vmem:[#allocation2 + $0xe2] sm:$0xff] }
 0x10c   : > { %1013 = vrot.lane.b32.xlu0 %v2802_v32, %s2287_s17 }
 0x10d   : > { %v2820_v43 = vpop.permute.xlu1 %935 }
 0x10e   : > { %v2822_v44 = vpop.permute.xlu0 %873  ;;  %v1378_v34 = vsel %vm1371_vm2, %v1361_v39, %v2820_v43 }
 0x10f   : > { %1327 = vrot.lane.b32.xlu1 %v837_v41, %s2292_s21  ;;  %v1362_v61 = vsel %vm611_vm1, %v2637_v56, %v2822_v44 }
 0x110   : > { %1265 = vrot.lane.b32.xlu0 %v822_v42, %s2291_s26 }
 0x111   : > { %v1188_v45 = vpop.permute.xlu1 %1187 }
 0x112   : > { %v1126_v46 = vpop.permute.xlu0 %1125  ;;  %v1444_v40 = vsel %vm1439_vm6, %v1427_v5, %v1188_v45 }
 0x113   : > { %1077 = vrot.lane.b32.xlu1 %v822_v42, %s2288_s22  ;;  %v1428_v48 = vsel %vm1422_vm5, %v1411_v30, %v1126_v46 }
 0x114   : > { %887 = vrot.lane.b32.xlu0 %v821_v28, %s2286_s19 }
 0x115   : > { %v2828_v50 = vpop.permute.xlu1 %999 }
 0x116   : > { %v2830_v52 = vpop.permute.xlu0 %937  ;;  %v1395_v45 = vsel %vm1388_vm3, %v1378_v34, %v2828_v50 }
 0x117   : > { %1329 = vrot.lane.b32.xlu1 %v838_v49, %s2292_s21 }
 0x118   : > { %1139 = vrot.lane.b32.xlu0 %v837_v41, %s2289_s16 }
 0x119   : > { %v1252_v53 = vpop.permute.xlu1 %1251 }
 0x11a   : > { %v1190_v55 = vpop.permute.xlu0 %1189  ;;  %v1461_v51 = vsel %vm1456_vm7, %v1444_v40, %v1252_v53 }
 0x11b   : > { %951 = vrot.lane.b32.xlu1 %v837_v41, %s2285_s27  ;;  %v1445_v3 = vsel %vm1439_vm6, %v1428_v48, %v1190_v55  ;;  %v826_v41 = vld [vmem:[#allocation2 + $0xe1] sm:$0xff] }
 0x11c   : > { %889 = vrot.lane.b32.xlu0 %v822_v42, %s2286_s19  ;;  %v825_v42 = vld [vmem:[#allocation2 + $0xd9] sm:$0xff] }
 0x11d   : > { %v1064_v63 = vpop.permute.xlu1 %1063 }
 0x11e   : > { %v2843_v0 = vpop.permute.xlu0 %1001  ;;  %v1412_v53 = vsel %vm1405_vm4, %v1395_v45, %v1064_v63  ;;  %v1379_v63 = vsel %vm1371_vm2, %v1362_v61, %v2830_v52 }
 0x11f   : > { %1203 = vrot.lane.b32.xlu1 %v807_v59, %s2290_s18  ;;  %v1396_v2 = vsel %vm1388_vm3, %v1379_v63, %v2843_v0 }
 0x120   : > { %1141 = vrot.lane.b32.xlu0 %v838_v49, %s2289_s16 }
 0x121   : > { %v1316_v1 = vpop.permute.xlu1 %1315 }
 0x122   : > { %v1254_v6 = vpop.permute.xlu0 %1253  ;;  %v1478_v9 = vsel %vm1473_vm8, %v1461_v51, %v1316_v1 }
 0x123   : > { %1015 = vrot.lane.b32.xlu1 %v807_v59, %s2287_s17  ;;  %2147 = vmatprep.mubr.msk.f32.mxu0 %vm1499_vm9, %v1478_v9  ;;  %v1462_v8 = vsel %vm1456_vm7, %v1445_v3, %v1254_v6 }
 0x124   : > { %953 = vrot.lane.b32.xlu0 %v838_v49, %s2285_s27 }
 0x125   : > { %v1066_v19 = vpop.permute.xlu1 %1065 }
 0x126   : > { %v2862_v21 = vpop.permute.xlu0 %875  ;;  %v1413_v51 = vsel %vm1405_vm4, %v1396_v2, %v1066_v19 }
 0x127   : > { %1267 = vrot.lane.b32.xlu1 %v823_v13, %s2291_s26  ;;  %v1363_v48 = vsel %vm611_vm1, %v2653_v60, %v2862_v21 }
 0x128   : > { %1205 = vrot.lane.b32.xlu0 %v808_v14, %s2290_s18 }
 0x129   : > { %v1318_v11 = vpop.permute.xlu1 %1317 }
 0x12a   : > { %v1128_v17 = vpop.permute.xlu0 %1127  ;;  %v1479_v24 = vsel %vm1473_vm8, %v1462_v8, %v1318_v11 }
 0x12b   : > { %1079 = vrot.lane.b32.xlu1 %v823_v13, %s2288_s22  ;;  %2148 = vmatmul.mubr.msk.f32.gmra.mrb[4].mxu0 %vm1499_vm9, %v1479_v24  ;;  %v1429_v55 = vsel %vm1422_vm5, %v1412_v53, %v1128_v17 }
 0x12c   : > { %1017 = vrot.lane.b32.xlu0 %v808_v14, %s2287_s17 }
 0x12d   : > { %v2874_v22 = vpop.permute.xlu1 %939 }
 0x12e   : > { %v2876_v26 = vpop.permute.xlu0 %877  ;;  %v1380_v3 = vsel %vm1371_vm2, %v1363_v48, %v2874_v22 }
 0x12f   : > { %1331 = vrot.lane.b32.xlu1 %v839_v20, %s2292_s21  ;;  %v1364_v60 = vsel %vm611_vm1, %v2661_v62, %v2876_v26 }
 0x130   : > { %1269 = vrot.lane.b32.xlu0 %v824_v25, %s2291_s26 }
 0x131   : > { %v1192_v27 = vpop.permute.xlu1 %1191 }
 0x132   : > { %v1130_v28 = vpop.permute.xlu0 %1129  ;;  %v1446_v54 = vsel %vm1439_vm6, %v1429_v55, %v1192_v27 }
 0x133   : > { %1143 = vrot.lane.b32.xlu1 %v839_v20, %s2289_s16  ;;  %v1430_v1 = vsel %vm1422_vm5, %v1413_v51, %v1130_v28 }
 0x134   : > { %1081 = vrot.lane.b32.xlu0 %v824_v25, %s2288_s22 }
 0x135   : > { %v1004_v35 = vpop.permute.xlu1 %1003 }
 0x136   : > { %v2882_v29 = vpop.permute.xlu0 %941  ;;  %v1397_v8 = vsel %vm1388_vm3, %v1380_v3, %v1004_v35 }
 0x137   : > { %1145 = vrot.lane.b32.xlu1 %v793_v33, %s2289_s16  ;;  %v1381_v21 = vsel %vm1371_vm2, %v1364_v60, %v2882_v29 }
 0x138   : > { %1333 = vrot.lane.b32.xlu0 %v793_v33, %s2292_s21 }
 0x139   : > { %v1256_v37 = vpop.permute.xlu1 %1255 }
 0x13a   : > { %v1194_v38 = vpop.permute.xlu0 %1193  ;;  %v1463_v43 = vsel %vm1456_vm7, %v1446_v54, %v1256_v37 }
 0x13b   : > { %1209 = vrot.lane.b32.xlu1 %v810_v18, %s2290_s18  ;;  %v1447_v56 = vsel %vm1439_vm6, %v1430_v1, %v1194_v38 }
 0x13c   : > { %1207 = vrot.lane.b32.xlu0 %v809_v23, %s2290_s18 }
 0x13d   : > { %v1068_v46 = vpop.permute.xlu1 %1067 }
 0x13e   : > { %v1006_v49 = vpop.permute.xlu0 %1005  ;;  %v1414_v24 = vsel %vm1405_vm4, %v1397_v8, %v1068_v46 }
 0x13f   : > { %1273 = vrot.lane.b32.xlu1 %v826_v41, %s2291_s26  ;;  %v1398_v22 = vsel %vm1388_vm3, %v1381_v21, %v1006_v49 }
 0x140   : > { %1271 = vrot.lane.b32.xlu0 %v825_v42, %s2291_s26 }
 0x141   : > { %v1320_v58 = vpop.permute.xlu1 %1319 }
 0x142   : > { %v1258_v59 = vpop.permute.xlu0 %1257  ;;  %v1480_v50 = vsel %vm1473_vm8, %v1463_v43, %v1320_v58 }
 0x143   : > { %1337 = vrot.lane.b32.xlu1 %v842_v36, %s2292_s21  ;;  %2150 = vmatprep.mubr.msk.f32.mxu0 %vm1499_vm9, %v1480_v50  ;;  %v1464_v44 = vsel %vm1456_vm7, %v1447_v56, %v1258_v59 }
 0x144   : > { %1335 = vrot.lane.b32.xlu0 %v841_v57, %s2292_s21 }
 0x145   : > { %v1070_v5 = vpop.permute.xlu1 %1069 }
 0x146   : > { %v880_v40 = vpop.permute.xlu0 %879  ;;  %v1415_v37 = vsel %vm1405_vm4, %v1398_v22, %v1070_v5 }
 0x147   : > { %v1365_v36 = vsel %vm611_vm1, %v2677_v4, %v880_v40 }
 0x149   : > { %v1322_v6 = vpop.permute.xlu1 %1321 }
 0x14a   : > { %v1132_v9 = vpop.permute.xlu0 %1131  ;;  %v1481_v7 = vsel %vm1473_vm8, %v1464_v44, %v1322_v6 }
 0x14b   : > { %2151 = vmatmul.mubr.msk.f32.gmra.mrb[6].mxu0 %vm1499_vm9, %v1481_v7  ;;  %v1431_v20 = vsel %vm1422_vm5, %v1414_v24, %v1132_v9 }
 0x14d   : > { %v944_v52 = vpop.permute.xlu1 %943 }
 0x14e   : > { %v882_v12 = vpop.permute.xlu0 %881  ;;  %v1382_v57 = vsel %vm1371_vm2, %v1365_v36, %v944_v52 }
 0x14f   : > { %v1366_v4 = vsel %vm611_vm1, %v2689_v10, %v882_v12 }
 0x151   : > { %v1196_v13 = vpop.permute.xlu1 %1195 }
 0x152   : > { %v1134_v0 = vpop.permute.xlu0 %1133  ;;  %v1448_v25 = vsel %vm1439_vm6, %v1431_v20, %v1196_v13 }
 0x153   : > { %v1432_v38 = vsel %vm1422_vm5, %v1415_v37, %v1134_v0 }
 0x155   : > { %v1008_v14 = vpop.permute.xlu1 %1007 }
 0x156   : > { %v946_v16 = vpop.permute.xlu0 %945  ;;  %v1399_v43 = vsel %vm1388_vm3, %v1382_v57, %v1008_v14 }
 0x157   : > { %v1383_v40 = vsel %vm1371_vm2, %v1366_v4, %v946_v16 }
 0x159   : > { %v1260_v30 = vpop.permute.xlu1 %1259 }
 0x15a   : > { %v1198_v19 = vpop.permute.xlu0 %1197  ;;  %v1465_v27 = vsel %vm1456_vm7, %v1448_v25, %v1260_v30 }
 0x15b   : > { %v1449_v39 = vsel %vm1439_vm6, %v1432_v38, %v1198_v19 }
 0x15d   : > { %v1072_v11 = vpop.permute.xlu1 %1071 }
 0x15e   : > { %v1010_v17 = vpop.permute.xlu0 %1009  ;;  %v1416_v50 = vsel %vm1405_vm4, %v1399_v43, %v1072_v11 }
 0x15f   : > { %v1400_v56 = vsel %vm1388_vm3, %v1383_v40, %v1010_v17 }
 0x161   : > { %v1324_v28 = vpop.permute.xlu1 %1323 }
 0x162   : > { %v1262_v33 = vpop.permute.xlu0 %1261  ;;  %v1482_v18 = vsel %vm1473_vm8, %v1465_v27, %v1324_v28 }
 0x163   : > { %2153 = vmatprep.mubr.msk.f32.mxu1 %vm1499_vm9, %v1482_v18  ;;  %v1466_v34 = vsel %vm1456_vm7, %v1449_v39, %v1262_v33 }
 0x165   : > { %v1074_v35 = vpop.permute.xlu1 %1073 }
 0x166   : > { %v884_v23 = vpop.permute.xlu0 %883  ;;  %v1417_v9 = vsel %vm1405_vm4, %v1400_v56, %v1074_v35 }
 0x167   : > { %v1367_v17 = vsel %vm611_vm1, %v2717_v31, %v884_v23 }
 0x169   : > { %v1326_v41 = vpop.permute.xlu1 %1325 }
 0x16a   : > { %v1136_v42 = vpop.permute.xlu0 %1135  ;;  %v1483_v62 = vsel %vm1473_vm8, %v1466_v34, %v1326_v41 }
 0x16b   : > { %2154 = vmatmul.mubr.msk.f32.vlgmr.msra.gmra.mrb[0].mxu1 %vm1499_vm9, %v1483_v62  ;;  %v1433_v61 = vsel %vm1422_vm5, %v1416_v50, %v1136_v42 }
 0x16d   : > { %v948_v26 = vpop.permute.xlu1 %947 }
 0x16e   : > { %v886_v29 = vpop.permute.xlu0 %885  ;;  %v1384_v24 = vsel %vm1371_vm2, %v1367_v17, %v948_v26 }
 0x16f   : > { %v1368_v31 = vsel %vm611_vm1, %v2739_v47, %v886_v29 }
 0x171   : > { %v1200_v45 = vpop.permute.xlu1 %1199 }
 0x172   : > { %v1138_v46 = vpop.permute.xlu0 %1137  ;;  %v1450_v63 = vsel %vm1439_vm6, %v1433_v61, %v1200_v45 }
 0x173   : > { %v1434_v7 = vsel %vm1422_vm5, %v1417_v9, %v1138_v46 }
 0x175   : > { %v1012_v49 = vpop.permute.xlu1 %1011 }
 0x176   : > { %v950_v53 = vpop.permute.xlu0 %949  ;;  %v1401_v20 = vsel %vm1388_vm3, %v1384_v24, %v1012_v49 }
 0x177   : > { %v1385_v23 = vsel %vm1371_vm2, %v1368_v31, %v950_v53 }
 0x179   : > { %v1264_v55 = vpop.permute.xlu1 %1263 }
 0x17a   : > { %v1202_v54 = vpop.permute.xlu0 %1201  ;;  %v1467_v2 = vsel %vm1456_vm7, %v1450_v63, %v1264_v55 }
 0x17b   : > { %v1451_v52 = vsel %vm1439_vm6, %v1434_v7, %v1202_v54 }
 0x17d   : > { %v1076_v58 = vpop.permute.xlu1 %1075 }
 0x17e   : > { %v1014_v59 = vpop.permute.xlu0 %1013  ;;  %v1418_v28 = vsel %vm1405_vm4, %v1401_v20, %v1076_v58 }
 0x17f   : > { %v1402_v37 = vsel %vm1388_vm3, %v1385_v23, %v1014_v59 }
 0x181   : > { %v1328_v5 = vpop.permute.xlu1 %1327 }
 0x182   : > { %v1266_v51 = vpop.permute.xlu0 %1265  ;;  %v1484_v1 = vsel %vm1473_vm8, %v1467_v2, %v1328_v5 }
 0x183   : > { %2156 = vmatprep.mubr.msk.f32.mxu1 %vm1499_vm9, %v1484_v1  ;;  %v1468_v13 = vsel %vm1456_vm7, %v1451_v52, %v1266_v51 }
 0x185   : > { %v1078_v44 = vpop.permute.xlu1 %1077 }
 0x186   : > { %v888_v6 = vpop.permute.xlu0 %887  ;;  %v1419_v34 = vsel %vm1405_vm4, %v1402_v37, %v1078_v44 }
 0x187   : > { %v1369_v49 = vsel %vm611_vm1, %v2778_v15, %v888_v6 }
 0x189   : > { %v1330_v0 = vpop.permute.xlu1 %1329 }
 0x18a   : > { %v1140_v14 = vpop.permute.xlu0 %1139  ;;  %v1485_v10 = vsel %vm1473_vm8, %v1468_v13, %v1330_v0 }
 0x18b   : > { %2157 = vmatmul.mubr.msk.f32.gmra.mrb[2].mxu1 %vm1499_vm9, %v1485_v10  ;;  %v1435_v33 = vsel %vm1422_vm5, %v1418_v28, %v1140_v14 }
 0x18d   : > { %v952_v12 = vpop.permute.xlu1 %951 }
 0x18e   : > { %v890_v16 = vpop.permute.xlu0 %889  ;;  %v1386_v55 = vsel %vm1371_vm2, %v1369_v49, %v952_v12 }
 0x18f   : > { %v1370_v53 = vsel %vm611_vm1, %v2802_v32, %v890_v16 }
 0x191   : > { %v1204_v30 = vpop.permute.xlu1 %1203 }
 0x192   : > { %v1142_v19 = vpop.permute.xlu0 %1141  ;;  %v1452_v18 = vsel %vm1439_vm6, %v1435_v33, %v1204_v30 }
 0x193   : > { %v1436_v41 = vsel %vm1422_vm5, %v1419_v34, %v1142_v19 }
 0x195   : > { %v1016_v48 = vpop.permute.xlu1 %1015 }
 0x196   : > { %v954_v3 = vpop.permute.xlu0 %953  ;;  %v1403_v36 = vsel %vm1388_vm3, %v1386_v55, %v1016_v48 }
 0x197   : > { %v1387_v54 = vsel %vm1371_vm2, %v1370_v53, %v954_v3 }
 0x199   : > { %v1268_v8 = vpop.permute.xlu1 %1267 }
 0x19a   : > { %v1206_v11 = vpop.permute.xlu0 %1205  ;;  %v1469_v60 = vsel %vm1456_vm7, %v1452_v18, %v1268_v8 }
 0x19b   : > { %v1453_v42 = vsel %vm1439_vm6, %v1436_v41, %v1206_v11 }
 0x19d   : > { %v1080_v25 = vpop.permute.xlu1 %1079 }
 0x19e   : > { %v1018_v27 = vpop.permute.xlu0 %1017  ;;  %v1420_v59 = vsel %vm1405_vm4, %v1403_v36, %v1080_v25 }
 0x19f   : > { %v1404_v57 = vsel %vm1388_vm3, %v1387_v54, %v1018_v27 }
 0x1a1   : > { %v1332_v21 = vpop.permute.xlu1 %1331 }
 0x1a2   : > { %v1270_v22 = vpop.permute.xlu0 %1269  ;;  %v1486_v35 = vsel %vm1473_vm8, %v1469_v60, %v1332_v21 }
 0x1a3   : > { %2159 = vmatprep.mubr.msk.f32.mxu1 %vm1499_vm9, %v1486_v35  ;;  %v1470_v62 = vsel %vm1456_vm7, %v1453_v42, %v1270_v22 }
 0x1a5   : > { %v1144_v38 = vpop.permute.xlu1 %1143 }
 0x1a6   : > { %v1082_v39 = vpop.permute.xlu0 %1081  ;;  %v1437_v15 = vsel %vm1422_vm5, %v1420_v59, %v1144_v38 }
 0x1a7   : > { %v1421_v50 = vsel %vm1405_vm4, %v1404_v57, %v1082_v39 }
 0x1a9   : > { %v1146_v26 = vpop.permute.xlu1 %1145 }
 0x1aa   : > { %v1334_v45 = vpop.permute.xlu0 %1333  ;;  %v1438_v61 = vsel %vm1422_vm5, %v1421_v50, %v1146_v26 }
 0x1ab   : > { %v1487_v47 = vsel %vm1473_vm8, %v1470_v62, %v1334_v45 }
 0x1ac   : > { %2160 = vmatmul.mubr.msk.f32.gmra.mrb[4].mxu1 %vm1499_vm9, %v1487_v47 }
 0x1ad   : > { %v1210_v29 = vpop.permute.xlu1 %1209 }
 0x1ae   : > { %v1208_v46 = vpop.permute.xlu0 %1207  ;;  %v1455_v32 = vsel %vm1439_vm6, %v1438_v61, %v1210_v29 }
 0x1af   : > { %v1454_v63 = vsel %vm1439_vm6, %v1437_v15, %v1208_v46 }
 0x1b1   : > { %v1274_v43 = vpop.permute.xlu1 %1273 }
 0x1b2   : > { %v1272_v58 = vpop.permute.xlu0 %1271  ;;  %v1472_v2 = vsel %vm1456_vm7, %v1455_v32, %v1274_v43 }
 0x1b3   : > { %v1471_v5 = vsel %vm1456_vm7, %v1454_v63, %v1272_v58 }
 0x1b5   : > { %v1338_v51 = vpop.permute.xlu1 %1337 }
 0x1b6   : > { %v1336_v1 = vpop.permute.xlu0 %1335  ;;  %v1489_v4 = vsel %vm1473_vm8, %v1472_v2, %v1338_v51 }
 0x1b7   : > { %v1488_v40 = vsel %vm1473_vm8, %v1471_v5, %v1336_v1 }
 0x1b8   : > { %2162 = vmatprep.mubr.msk.f32.mxu1 %vm1499_vm9, %v1488_v40 }
 0x1b9   : > { %2163 = vmatmul.mubr.msk.f32.gmra.mrb[6].mxu1 %vm1499_vm9, %v1489_v4 }
 0x1be   : > { %v2143_v56 = vpop.f32.mrb[0].mxu0 }
 0x1bf   : > { %1694 = vst.msk [vmem:[%s2426_s12 + $0x8] sm:$0xff] %vm611_vm1, %v2143_v56  ;;  %v1710_v44 = vsel %vm611_vm1, %v2143_v56, 0.0  ;;  %v1748_v6 = vmul.f32 %v2143_v56, %v2143_v56  ;;  %v1614_v9 = vpop.f32.mrb[1].mxu0 }
 0x1c0   : > { %1693 = vst.msk [vmem:[%s2426_s12] sm:$0xff] %vm611_vm1, %v1614_v9  ;;  %v1709_v7 = vsel %vm611_vm1, %v1614_v9, 0.0  ;;  %v1747_v52 = vmul.f32 %v1614_v9, %v1614_v9 }
 0x1c1   : > { %v1764_v13 = vsel %vm611_vm1, %v1748_v6, 0.0  ;;  %v1711_v0 = vadd.f32 %v1710_v44, %v1709_v7 }
 0x1c2   : > { %v1763_v14 = vsel %vm611_vm1, %v1747_v52, 0.0 }
 0x1c3   : > { %v1765_v10 = vadd.f32 %v1764_v13, %v1763_v14 }
 0x1de   : > { %v2146_v12 = vpop.f32.mrb[2].mxu0 }
 0x1df   : > { %1696 = vst.msk [vmem:[%s2426_s12 + $0x18] sm:$0xff] %vm611_vm1, %v2146_v12  ;;  %v1624_v16 = vpop.f32.mrb[3].mxu0  ;;  %v1750_v30 = vmul.f32 %v2146_v12, %v2146_v12  ;;  %v1714_v8 = vsel %vm611_vm1, %v2146_v12, 0.0 }
 0x1e0   : > { %1695 = vst.msk [vmem:[%s2426_s12 + $0x10] sm:$0xff] %vm611_vm1, %v1624_v16  ;;  %v1712_v19 = vsel %vm611_vm1, %v1624_v16, 0.0  ;;  %v1749_v48 = vmul.f32 %v1624_v16, %v1624_v16 }
 0x1e1   : > { %v1713_v3 = vadd.f32 %v1712_v19, %v1711_v0  ;;  %v1768_v20 = vsel %vm611_vm1, %v1750_v30, 0.0 }
 0x1e2   : > { %v1766_v11 = vsel %vm611_vm1, %v1749_v48, 0.0 }
 0x1e3   : > { %v1767_v17 = vadd.f32 %v1766_v11, %v1765_v10  ;;  %v1715_v24 = vadd.f32 %v1714_v8, %v1713_v3 }
 0x1e5   : > { %v1769_v25 = vadd.f32 %v1768_v20, %v1767_v17 }
 0x1fe   : > { %v2149_v27 = vpop.f32.mrb[4].mxu0 }
 0x1ff   : > { %1698 = vst.msk [vmem:[%s2426_s12 + $0x28] sm:$0xff] %vm611_vm1, %v2149_v27  ;;  %v1634_v28 = vpop.f32.mrb[5].mxu0  ;;  %v1752_v33 = vmul.f32 %v2149_v27, %v2149_v27  ;;  %v1718_v22 = vsel %vm611_vm1, %v2149_v27, 0.0 }
 0x200   : > { %1697 = vst.msk [vmem:[%s2426_s12 + $0x20] sm:$0xff] %vm611_vm1, %v1634_v28  ;;  %v1716_v18 = vsel %vm611_vm1, %v1634_v28, 0.0  ;;  %v1751_v60 = vmul.f32 %v1634_v28, %v1634_v28 }
 0x201   : > { %v1717_v21 = vadd.f32 %v1716_v18, %v1715_v24  ;;  %v1772_v37 = vsel %vm611_vm1, %v1752_v33, 0.0 }
 0x202   : > { %v1770_v35 = vsel %vm611_vm1, %v1751_v60, 0.0 }
 0x203   : > { %v1771_v31 = vadd.f32 %v1770_v35, %v1769_v25  ;;  %v1719_v23 = vadd.f32 %v1718_v22, %v1717_v21 }
 0x205   : > { %v1773_v38 = vadd.f32 %v1772_v37, %v1771_v31 }
 0x21e   : > { %v2152_v39 = vpop.f32.mrb[6].mxu0 }
 0x21f   : > { %1700 = vst.msk [vmem:[%s2426_s12 + $0x38] sm:$0xff] %vm611_vm1, %v2152_v39  ;;  %v1644_v34 = vpop.f32.mrb[7].mxu0  ;;  %v1754_v41 = vmul.f32 %v2152_v39, %v2152_v39  ;;  %v1722_v45 = vsel %vm611_vm1, %v2152_v39, 0.0 }
 0x220   : > { %1699 = vst.msk [vmem:[%s2426_s12 + $0x30] sm:$0xff] %vm611_vm1, %v1644_v34  ;;  %v1720_v42 = vsel %vm611_vm1, %v1644_v34, 0.0  ;;  %v1753_v62 = vmul.f32 %v1644_v34, %v1644_v34 }
 0x221   : > { %v1721_v26 = vadd.f32 %v1720_v42, %v1719_v23  ;;  %v1776_v49 = vsel %vm611_vm1, %v1754_v41, 0.0 }
 0x222   : > { %v1774_v47 = vsel %vm611_vm1, %v1753_v62, 0.0 }
 0x223   : > { %v1723_v29 = vadd.f32 %v1722_v45, %v1721_v26  ;;  %v1775_v46 = vadd.f32 %v1774_v47, %v1773_v38 }
 0x225   : > { %v1777_v53 = vadd.f32 %v1776_v49, %v1775_v46 }
 0x23e   : > { %v2155_v55 = vpop.f32.mrb[0].mxu1 }
 0x23f   : > { %1702 = vst.msk [vmem:[%s2426_s12 + $0x48] sm:$0xff] %vm611_vm1, %v2155_v55  ;;  %v1654_v54 = vpop.f32.mrb[1].mxu1  ;;  %v1756_v36 = vmul.f32 %v2155_v55, %v2155_v55  ;;  %v1726_v59 = vsel %vm611_vm1, %v2155_v55, 0.0 }
 0x240   : > { %1701 = vst.msk [vmem:[%s2426_s12 + $0x40] sm:$0xff] %vm611_vm1, %v1654_v54  ;;  %v1724_v57 = vsel %vm611_vm1, %v1654_v54, 0.0  ;;  %v1755_v43 = vmul.f32 %v1654_v54, %v1654_v54 }
 0x241   : > { %v1725_v58 = vadd.f32 %v1724_v57, %v1723_v29  ;;  %v1780_v32 = vsel %vm611_vm1, %v1756_v36, 0.0 }
 0x242   : > { %v1778_v50 = vsel %vm611_vm1, %v1755_v43, 0.0 }
 0x243   : > { %v1779_v15 = vadd.f32 %v1778_v50, %v1777_v53  ;;  %v1727_v61 = vadd.f32 %v1726_v59, %v1725_v58 }
 0x245   : > { %v1781_v63 = vadd.f32 %v1780_v32, %v1779_v15 }
 0x25e   : > { %v2158_v2 = vpop.f32.mrb[2].mxu1 }
 0x25f   : > { %1704 = vst.msk [vmem:[%s2426_s12 + $0x58] sm:$0xff] %vm611_vm1, %v2158_v2  ;;  %v1664_v5 = vpop.f32.mrb[3].mxu1  ;;  %v1758_v51 = vmul.f32 %v2158_v2, %v2158_v2  ;;  %v1730_v56 = vsel %vm611_vm1, %v2158_v2, 0.0 }
 0x260   : > { %1703 = vst.msk [vmem:[%s2426_s12 + $0x50] sm:$0xff] %vm611_vm1, %v1664_v5  ;;  %v1728_v1 = vsel %vm611_vm1, %v1664_v5, 0.0  ;;  %v1757_v4 = vmul.f32 %v1664_v5, %v1664_v5 }
 0x261   : > { %v1729_v40 = vadd.f32 %v1728_v1, %v1727_v61  ;;  %v1784_v7 = vsel %vm611_vm1, %v1758_v51, 0.0 }
 0x262   : > { %v1782_v44 = vsel %vm611_vm1, %v1757_v4, 0.0 }
 0x263   : > { %v1783_v6 = vadd.f32 %v1782_v44, %v1781_v63  ;;  %v1731_v9 = vadd.f32 %v1730_v56, %v1729_v40 }
 0x265   : > { %v1785_v52 = vadd.f32 %v1784_v7, %v1783_v6 }
 0x27f   : > { %v2161_v13 = vpop.f32.mrb[4].mxu1 }
 0x280   : > { %1706 = vst.msk [vmem:[%s2426_s12 + $0x68] sm:$0xff] %vm611_vm1, %v2161_v13  ;;  %v1674_v0 = vpop.f32.mrb[5].mxu1  ;;  %v1760_v14 = vmul.f32 %v2161_v13, %v2161_v13  ;;  %v1734_v30 = vsel %vm611_vm1, %v2161_v13, 0.0 }
 0x281   : > { %1705 = vst.msk [vmem:[%s2426_s12 + $0x60] sm:$0xff] %vm611_vm1, %v1674_v0  ;;  %v1732_v10 = vsel %vm611_vm1, %v1674_v0, 0.0  ;;  %v1759_v12 = vmul.f32 %v1674_v0, %v1674_v0 }
 0x282   : > { %v1733_v16 = vadd.f32 %v1732_v10, %v1731_v9  ;;  %v1788_v8 = vsel %vm611_vm1, %v1760_v14, 0.0 }
 0x283   : > { %v1786_v19 = vsel %vm611_vm1, %v1759_v12, 0.0 }
 0x284   : > { %v1787_v48 = vadd.f32 %v1786_v19, %v1785_v52  ;;  %v1735_v3 = vadd.f32 %v1734_v30, %v1733_v16 }
 0x286   : > { %v1789_v11 = vadd.f32 %v1788_v8, %v1787_v48 }
 0x28c   : > { %v2164_v17 = vpop.f32.mrb[6].mxu1 }
 0x28d   : > { %1708 = vst.msk [vmem:[%s2426_s12 + $0x78] sm:$0xff] %vm611_vm1, %v2164_v17  ;;  %v1684_v24 = vpop.f32.mrb[7].mxu1  ;;  %v1762_v20 = vmul.f32 %v2164_v17, %v2164_v17  ;;  %v1738_v33 = vsel %vm611_vm1, %v2164_v17, 0.0 }
 0x28e   : > { %1707 = vst.msk [vmem:[%s2426_s12 + $0x70] sm:$0xff] %vm611_vm1, %v1684_v24  ;;  %v1736_v25 = vsel %vm611_vm1, %v1684_v24, 0.0  ;;  %v1761_v27 = vmul.f32 %v1684_v24, %v1684_v24 }
 0x28f   : > { %v1737_v28 = vadd.f32 %v1736_v25, %v1735_v3  ;;  %v1792_v22 = vsel %vm611_vm1, %v1762_v20, 0.0 }
 0x290   : > { %v1790_v18 = vsel %vm611_vm1, %v1761_v27, 0.0 }
 0x291   : > { %v1739_v60 = vadd.f32 %v1738_v33, %v1737_v28  ;;  %v1791_v21 = vadd.f32 %v1790_v18, %v1789_v11 }
 0x293   : > { %v1740_v35 = vrot.slane %v1739_v60, 4  ;;  %v1793_v31 = vadd.f32 %v1792_v22, %v1791_v21 }
 0x295   : > { %v1741_v23 = vadd.f32 %v1740_v35, %v1739_v60  ;;  %v1794_v37 = vrot.slane %v1793_v31, 4 }
 0x297   : > { %v1742_v38 = vrot.slane %v1741_v23, 2  ;;  %v1795_v39 = vadd.f32 %v1794_v37, %v1793_v31 }
 0x299   : > { %v1743_v34 = vadd.f32 %v1742_v38, %v1741_v23  ;;  %v1796_v41 = vrot.slane %v1795_v39, 2 }
 0x29b   : > { %v1744_v42 = vrot.slane %v1743_v34, 1  ;;  %v1797_v62 = vadd.f32 %v1796_v41, %v1795_v39 }
 0x29d   : > { %v1745_v26 = vadd.f32 %v1744_v42, %v1743_v34  ;;  %v1798_v45 = vrot.slane %v1797_v62, 1 }
 0x29f   : > { %1746 = vst.msk [vmem:[%s503_s20] sm:$0x1] %vm511_vm0, %v1745_v26  ;;  %v1799_v47 = vadd.f32 %v1798_v45, %v1797_v62 }
 0x2a1   : > { %1800 = vst.msk [vmem:[%s510_s24] sm:$0x1] %vm511_vm0, %v1799_v47 }
 0x2a2 PF: > { %s19_s9 = sadd.s32 1, %s2280_s9   ;;  %s3103_s27 = smov %s2272_s29 }
 0x2a3   : > { %p16_p1 = scmp.ge.s32.totalorder %s19_s9, 6   ;;  %s3104_s28 = smov %s2276_s30 }
 0x2a4   : > { %s3105_s29 = smov %s3108_s10  ;;  %s3106_s30 = smov %s3112_s11 }
 0x2a5   :  { %18 = sbr.rel (!%p16_p1) target bundleno = 3 (0x3), region = 124 }

// kernel: double_conv.2
= control target key start
LH: loop header
LB: loop body
LE: loop exit
PB: predicated region body
PF: predicated region fallthrough
CT: control target
= control target key end

     0   :  { %s2144_s21 = smov 0   ;;  %s2146_s22 = smov 0   ;;  %s2823_s0 = inlined_call_operand.vmem [shape: f32[2,16,16,4], index: 0, kind: input, shape index: {}, may-alias: {0,1,2}]   ;;  %s2824_s1 = inlined_call_operand.vmem [shape: f32[2,16,16,4], index: 1, kind: input, shape index: {}, may-alias: {0,1,2}]   ;;  %s2825_s2 = inlined_call_operand.vmem [shape: f32[2,16,16,4], index: 2, kind: input, shape index: {}, may-alias: {0,1,2}]   ;;  %s2826_s3 = inlined_call_operand.vmem [shape: f32[36,8], index: 3, kind: input, shape index: {}]   ;;  %s2827_s4 = inlined_call_operand.vmem [shape: f32[2,16,16,8], index: 4, kind: output, shape index: {0}]   ;;  %s2828_s5 = inlined_call_operand.vmem [shape: f32[2,2,1,8], index: 5, kind: output, shape index: {1}]   ;;  %s2829_s6 = inlined_call_operand.vmem [shape: f32[2,2,1,8], index: 6, kind: output, shape index: {2}]  }
   0x1   :  { %2830 = sst [smem:[#allocation3_spill]] %s2823_s0  ;;  %s2148_s23 = smov 0  }
   0x2   :  { %s2150_s24 = smov 0   ;;  %s2152_s25 = smov 0  }
   0x3 LB: > { %s26_s26 = sadd.s32 1, %s2088_s23  ;;  %s29_s27 = sadd.s32 1, %s2092_s24  ;;  %s2096_s25 = sphi %s2152_s25, %s17_s25   ;;  %s2092_s24 = sphi %s2150_s24, %s2836_s24   ;;  %s2088_s23 = sphi %s2148_s23, %s2835_s23   ;;  %s2084_s22 = sphi %s2146_s22, %s2834_s22   ;;  %s2080_s21 = sphi %s2144_s21, %s2833_s21  }
   0x4   : > { %p27_p0 = scmp.ge.s32.totalorder %s26_s26, 2  ;;  %p1879_p1 = scmp.ge.s32.totalorder %s2096_s25, 1 }
   0x5   : > { %p307_p2 = scmp.lt.s32.totalorder %s2096_s25, 5 }
   0x6   : > { %s2838_s26 = smov (%p27_p0, %s26_s26), 0  ;;  %s2840_s27 = smov (!%p27_p0, %s29_s27), %s2092_s24 }
   0x7   : > { %p308_p3 = pnand %p1879_p1, %p307_p2  ;;  %p31_p4 = scmp.ge.s32.totalorder %s2840_s27, 2 }
   0x8   : > { %vm457_vm0 = vcmask (!%p308_p3), 24576   ;;  %s2179_s28 = sshll.u32 (!%p308_p3), %s2080_s21, 3  ;;  %p388_p5 = scmp.lt.s32.totalorder (!%p308_p3), %s2084_s22, 1  ;;  %v2098_v0 = vmov (!%p308_p3), 0.0   ;;  %vm495_vm1 = vcmask (!%p308_p3), 31744  }
   0x9   : > { %s2842_s27 = smov (%p31_p4, %s2840_s27), 0  ;;  %311 = sbr.rel (%p308_p3) target bundleno = 666 (0x29a), region = 36 }
   0xa   : > { %458 = vst.msk [vmem:[#allocation2] sm:$0x1] (!%p308_p3), %vm457_vm0, %v2098_v0  ;;  %459 = vst.msk [vmem:[#allocation2 + $0x18] sm:$0x1] (!%p308_p3), %vm457_vm0, %v2098_v0  ;;  %p390_p6 = scmp.lt.s32.totalorder (!%p308_p3), %s2179_s28, 15  ;;  %s1885_s29 = sadd.s32 (!%p308_p3), 4294967295, %s2179_s28 }
   0xb   : > { %460 = vst.msk [vmem:[#allocation2 + $0x30] sm:$0x1] (!%p308_p3), %vm457_vm0, %v2098_v0  ;;  %461 = vst.msk [vmem:[#allocation2 + $0x48] sm:$0x1] (!%p308_p3), %vm457_vm0, %v2098_v0  ;;  %p400_p7 = scmp.gt.s32.totalorder (!%p308_p3), %s1885_s29, 0  ;;  %p1886_p8 = scmp.lt.s32.totalorder (!%p308_p3), %s1885_s29, 15 }
   0xc   : > { %462 = vst.msk [vmem:[#allocation2 + $0x60] sm:$0x1] (!%p308_p3), %vm457_vm0, %v2098_v0  ;;  %463 = vst.msk [vmem:[#allocation2 + $0x78] sm:$0x1] (!%p308_p3), %vm457_vm0, %v2098_v0  ;;  %s1937_s10 = sadd.s32 (!%p308_p3), 8, %s2179_s28  ;;  %s2832_s0 = sld [smem:[#allocation3_spill]] (!%p308_p3) }
   0xd   : > { %464 = vst.msk [vmem:[#allocation2 + $0x90] sm:$0x1] (!%p308_p3), %vm457_vm0, %v2098_v0  ;;  %465 = vst.msk [vmem:[#allocation2 + $0xa8] sm:$0x1] (!%p308_p3), %vm457_vm0, %v2098_v0  ;;  %p2215_p9 = scmp.lt.s32.totalorder (!%p308_p3), %s1937_s10, 15  ;;  %p445_p10 = scmp.lt.s32.totalorder (!%p308_p3), %s2080_s21, 1 }
   0xe   : > { %466 = vst.msk [vmem:[#allocation2 + $0xc0] sm:$0x1] (!%p308_p3), %vm457_vm0, %v2098_v0  ;;  %467 = vst.msk [vmem:[#allocation2 + $0xd8] sm:$0x1] (!%p308_p3), %vm457_vm0, %v2098_v0  ;;  %p1907_p11 = scmp.ne.s32.totalorder (!%p308_p3), %s2080_s21, 0 }
   0xf   : > { %468 = vst.msk [vmem:[#allocation2 + $0x11] sm:$0x1] (!%p308_p3), %vm457_vm0, %v2098_v0  ;;  %469 = vst.msk [vmem:[#allocation2 + $0x29] sm:$0x1] (!%p308_p3), %vm457_vm0, %v2098_v0 }
  0x10   : > { %470 = vst.msk [vmem:[#allocation2 + $0x41] sm:$0x1] %vm457_vm0, %v2098_v0  ;;  %471 = vst.msk [vmem:[#allocation2 + $0x59] sm:$0x1] %vm457_vm0, %v2098_v0  ;;  %s2844_s22 = smov (!%p388_p5, %s2084_s22), 1  ;;  %s2846_s10 = smov (!%p2215_p9, %s1937_s10), 15 }
  0x11   : > { %472 = vst.msk [vmem:[#allocation2 + $0x71] sm:$0x1] %vm457_vm0, %v2098_v0  ;;  %473 = vst.msk [vmem:[#allocation2 + $0x89] sm:$0x1] %vm457_vm0, %v2098_v0  ;;  %s391_s30 = scalar_select %p390_p6, %s2179_s28, 15 }
  0x12   : > { %474 = vst.msk [vmem:[#allocation2 + $0xa1] sm:$0x1] %vm457_vm0, %v2098_v0  ;;  %475 = vst.msk [vmem:[#allocation2 + $0xb9] sm:$0x1] %vm457_vm0, %v2098_v0  ;;  %s2211_s7 = sshll.u32 %s2844_s22, 5  ;;  %s2850_s10 = smov (!%p2215_p9, %s2846_s10), 15 }
  0x13   : > { %476 = vst.msk [vmem:[#allocation2 + $0xd1] sm:$0x1] %vm457_vm0, %v2098_v0  ;;  %477 = vst.msk [vmem:[#allocation2 + $0xe9] sm:$0x1] %vm457_vm0, %v2098_v0  ;;  %s1881_s8 = sshll.u32 %s391_s30, 1  ;;  %s1905_s17 = sshll.u32 %s2844_s22, 1 }
  0x14   : > { %s394_s9 = sadd.s32 %s2211_s7, %s1881_s8  ;;  %v2099_v17 = vmov (!%p1907_p11), 0.0  }
  0x15   : > { %s1883_s11 = sshll.u32 %s394_s9, 3  ;;  %516 = vst.msk [vmem:[#allocation2 + $0x1] sm:$0xff] (!%p1907_p11), %vm495_vm1, %v2099_v17  ;;  %517 = vst.msk [vmem:[#allocation2 + $0x9] sm:$0xff] (!%p1907_p11), %vm495_vm1, %v2099_v17 }
  0x16   : > { %s2222_s15 = scalar_lea.vmem %s2832_s0, %s1883_s11  ;;  %s2227_s18 = scalar_lea.vmem %s2827_s4, %s1883_s11 }
  0x17   : > { %s401_s19 = scalar_select %p400_p7, %s1885_s29, 0  ;;  %v478_v1 = vld [vmem:[%s2222_s15] sm:$0xff]  ;;  %v479_v2 = vld [vmem:[%s2222_s15 + $0x8] sm:$0xff]  ;;  %v480_v3 = vld [vmem:[%s2222_s15 + $0x10] sm:$0xff] }
  0x18   : > { %496 = vst.msk [vmem:[#allocation2 + $0x19] sm:$0xff] %vm495_vm1, %v478_v1  ;;  %497 = vst.msk [vmem:[#allocation2 + $0x21] sm:$0xff] %vm495_vm1, %v479_v2  ;;  %v481_v4 = vld [vmem:[%s2222_s15 + $0x18] sm:$0xff]  ;;  %v482_v5 = vld [vmem:[%s2222_s15 + $0x20] sm:$0xff]  ;;  %s1898_s29 = sshll.u32 %s2850_s10, 1 }
  0x19   : > { %498 = vst.msk [vmem:[#allocation2 + $0x31] sm:$0xff] %vm495_vm1, %v480_v3  ;;  %v483_v6 = vld [vmem:[%s2222_s15 + $0x28] sm:$0xff]  ;;  %s2848_s19 = smov (!%p1886_p8, %s401_s19), 15  ;;  %499 = vst.msk [vmem:[#allocation2 + $0x39] sm:$0xff] %vm495_vm1, %v481_v4  ;;  %v484_v7 = vld [vmem:[%s2222_s15 + $0x30] sm:$0xff]  ;;  %s425_s8 = sadd.s32 %s1898_s29, %s2211_s7 }
  0x1a   : > { %500 = vst.msk [vmem:[#allocation2 + $0x49] sm:$0xff] %vm495_vm1, %v482_v5  ;;  %501 = vst.msk [vmem:[#allocation2 + $0x51] sm:$0xff] %vm495_vm1, %v483_v6  ;;  %v485_v8 = vld [vmem:[%s2222_s15 + $0x38] sm:$0xff]  ;;  %v486_v9 = vld [vmem:[%s2222_s15 + $0x40] sm:$0xff]  ;;  %s1891_s20 = sshll.u32 %s2848_s19, 1  ;;  %s1900_s13 = sshll.u32 %s425_s8, 3 }
  0x1b   : > { %502 = vst.msk [vmem:[#allocation2 + $0x61] sm:$0xff] %vm495_vm1, %v484_v7  ;;  %503 = vst.msk [vmem:[#allocation2 + $0x69] sm:$0xff] %vm495_vm1, %v485_v8  ;;  %v487_v10 = vld [vmem:[%s2222_s15 + $0x48] sm:$0xff]  ;;  %v488_v11 = vld [vmem:[%s2222_s15 + $0x50] sm:$0xff]  ;;  %s408_s28 = sadd.s32 %s1891_s20, %s2211_s7  ;;  %s427_s10 = scalar_lea.vmem %s2825_s2, %s1900_s13 }
  0x1c   : > { %504 = vst.msk [vmem:[#allocation2 + $0x79] sm:$0xff] %vm495_vm1, %v486_v9  ;;  %v489_v12 = vld [vmem:[%s2222_s15 + $0x58] sm:$0xff]  ;;  %505 = vst.msk [vmem:[#allocation2 + $0x81] sm:$0xff] %vm495_vm1, %v487_v10  ;;  %v490_v13 = vld [vmem:[%s2222_s15 + $0x60] sm:$0xff]  ;;  %s1893_s30 = sshll.u32 %s408_s28, 3  ;;  %515 = sbr.rel (%p1907_p11) target bundleno = 35 (0x23), region = 40 }
  0x1d   : > { %506 = vst.msk [vmem:[#allocation2 + $0x91] sm:$0xff] %vm495_vm1, %v488_v11  ;;  %507 = vst.msk [vmem:[#allocation2 + $0x99] sm:$0xff] %vm495_vm1, %v489_v12  ;;  %v491_v14 = vld [vmem:[%s2222_s15 + $0x68] sm:$0xff]  ;;  %v492_v15 = vld [vmem:[%s2222_s15 + $0x70] sm:$0xff]  ;;  %s410_s12 = scalar_lea.vmem %s2824_s1, %s1893_s30 }
  0x1e   : > { %508 = vst.msk [vmem:[#allocation2 + $0xa9] sm:$0xff] %vm495_vm1, %v490_v13  ;;  %509 = vst.msk [vmem:[#allocation2 + $0xb1] sm:$0xff] %vm495_vm1, %v491_v14  ;;  %v493_v16 = vld [vmem:[%s2222_s15 + $0x78] sm:$0xff]  ;;  %s446_s19 = scalar_select %p445_p10, %s2080_s21, 1 }
  0x1f   : > { %510 = vst.msk [vmem:[#allocation2 + $0xc1] sm:$0xff] %vm495_vm1, %v492_v15  ;;  %511 = vst.msk [vmem:[#allocation2 + $0xc9] sm:$0xff] %vm495_vm1, %v493_v16 }
  0x20   : > { %s2282_s20 = sadd.s32 %s1905_s17, %s446_s19 }
  0x21   : > { %s449_s7 = scalar_lea.vmem %s2828_s5, %s2282_s20  ;;  %s456_s30 = scalar_lea.vmem %s2829_s6, %s2282_s20 }
  0x23 PF: > { %p1908_p12 = scmp.le.s32.totalorder %s2080_s21, 0 }
  0x24   : > { %v522_v18 = vld [vmem:[%s410_s12] sm:$0xff] (!%p1908_p12)  ;;  %v523_v19 = vld [vmem:[%s410_s12 + $0x8] sm:$0xff] (!%p1908_p12) }
  0x25   : > { %521 = sbr.rel (%p1908_p12) target bundleno = 44 (0x2c), region = 44  ;;  %524 = vst.msk [vmem:[#allocation2 + $0x1] sm:$0xff] (!%p1908_p12), %vm495_vm1, %v522_v18  ;;  %525 = vst.msk [vmem:[#allocation2 + $0x9] sm:$0xff] (!%p1908_p12), %vm495_vm1, %v523_v19 }
  0x2c PF: > { %p1909_p13 = scmp.ne.s32.totalorder %s2080_s21, 1 }
  0x2d   : > { %v2100_v20 = vmov (!%p1909_p13), 0.0  }
  0x2e   : > { %529 = sbr.rel (%p1909_p13) target bundleno = 53 (0x35), region = 48  ;;  %531 = vst.msk [vmem:[#allocation2 + $0xd9] sm:$0xff] (!%p1909_p13), %vm495_vm1, %v2100_v20  ;;  %532 = vst.msk [vmem:[#allocation2 + $0xe1] sm:$0xff] (!%p1909_p13), %vm495_vm1, %v2100_v20 }
  0x35 PF: > { %p1910_p0 = scmp.ge.s32.totalorder %s2080_s21, 1 }
  0x36   : > { %v537_v21 = vld [vmem:[%s427_s10] sm:$0xff] (!%p1910_p0)  ;;  %v538_v22 = vld [vmem:[%s427_s10 + $0x8] sm:$0xff] (!%p1910_p0) }
  0x37   : > { %536 = sbr.rel (%p1910_p0) target bundleno = 62 (0x3e), region = 52  ;;  %540 = vst.msk [vmem:[#allocation2 + $0xd9] sm:$0xff] (!%p1910_p0), %vm495_vm1, %v537_v21  ;;  %541 = vst.msk [vmem:[#allocation2 + $0xe1] sm:$0xff] (!%p1910_p0), %vm495_vm1, %v538_v22 }
  0x3e PF: > { %v574_v23 = vld [vmem:[#allocation2 + $0x2] sm:$0xff]  ;;  %s2101_s0 = smov 8   ;;  %s2102_s22 = smov 4   ;;  %v575_v25 = vld [vmem:[#allocation2 + $0xa] sm:$0xff]  ;;  %v2310_v28 = vld [vmem:[#allocation2 + $0x18] sm:$0xff]  ;;  %vm1388_vm2 = vcmask 1043456  }
  0x3f   : > { %v558_v24 = vld [vmem:[#allocation2 + $0x1] sm:$0xff]  ;;  %767 = vrot.lane.b32.xlu1 %v574_v23, %s2101_s0  ;;  %v559_v26 = vld [vmem:[#allocation2 + $0x9] sm:$0xff]  ;;  %s2103_s21 = smov 12   ;;  %v560_v29 = vld [vmem:[#allocation2 + $0x19] sm:$0xff]  ;;  %s2104_s8 = smov 16   ;;  %vm1215_vm3 = vcmask 64512  }
  0x40   : > { %703 = vrot.lane.b32.xlu0 %v558_v24, %s2102_s22  ;;  %v2308_v27 = vld [vmem:[#allocation2 + $0x20] sm:$0xff]  ;;  %s2105_s9 = smov 20   ;;  %v2322_v32 = vld [vmem:[#allocation2 + $0x30] sm:$0xff]  ;;  %v1335_v35 = vld [vmem:[%s2826_s3 + $0x8] sm:$0xff]  ;;  %s2106_s16 = smov 24   ;;  %vm1232_vm4 = vcmask 97280  }
  0x41   : > { %v622_v30 = vld [vmem:[#allocation2 + $0x1a] sm:$0xff]  ;;  %v623_v33 = vld [vmem:[#allocation2 + $0x22] sm:$0xff]  ;;  %v1336_v37 = vld [vmem:[%s2826_s3 + $0x10] sm:$0xff]  ;;  %s2107_s28 = smov 28   ;;  %s2108_s12 = smov 32   ;;  %vm1249_vm5 = vcmask 130048  }
  0x42   : > { %v607_v31 = vld [vmem:[#allocation2 + $0x21] sm:$0xff]  ;;  %v1337_v38 = vld [vmem:[%s2826_s3 + $0x18] sm:$0xff]  ;;  %v657_v47 = vld [vmem:[#allocation2 + $0x49] sm:$0xff]  ;;  %vm1266_vm6 = vcmask 162816   ;;  %vm1283_vm7 = vcmask 195584   ;;  %vm1300_vm8 = vcmask 228352  }
  0x43   : > { %769 = vrot.lane.b32.xlu1 %v575_v25, %s2101_s0  ;;  %v1334_v34 = vld [vmem:[%s2826_s3] sm:$0xff]  ;;  %v655_v39 = vld [vmem:[#allocation2 + $0x31] sm:$0xff]  ;;  %v1997_v41 = vpack.c.bf16 %v1337_v38, %v1336_v37  ;;  %v2361_v46 = vld [vmem:[#allocation2 + $0x48] sm:$0xff]  ;;  %vm1317_vm9 = vcmask 261120   ;;  %vm1339_vm10 = vcmask 293888   ;;  %vm1590_vm11 = vcmask 57344  }
  0x44   : > { %705 = vrot.lane.b32.xlu0 %v559_v26, %s2102_s22  ;;  %v1993_v36 = vpack.c.bf16 %v1335_v35, %v1334_v34  ;;  %v2342_v40 = vld [vmem:[#allocation2 + $0x38] sm:$0xff]  ;;  %v1338_v42 = vld [vmem:[%s2826_s3 + $0x20] sm:$0xf]  ;;  %v2369_v48 = vld [vmem:[#allocation2 + $0x50] sm:$0xff] }
  0x45   : > { %v671_v43 = vld [vmem:[#allocation2 + $0x32] sm:$0xff]  ;;  %v672_v45 = vld [vmem:[#allocation2 + $0x3a] sm:$0xff]  ;;  %v673_v49 = vld [vmem:[#allocation2 + $0x4a] sm:$0xff] }
  0x46   : > { %1994 = vmatprep.subr.bf16.mxu0 %v1993_v36  ;;  %2001 = vmatprep.subr.bf16.mxu1 %v1993_v36  ;;  %v656_v44 = vld [vmem:[#allocation2 + $0x39] sm:$0xff]  ;;  %v658_v50 = vld [vmem:[#allocation2 + $0x51] sm:$0xff]  ;;  %v659_v53 = vld [vmem:[#allocation2 + $0x61] sm:$0xff] }
  0x47   : > { %833 = vrot.lane.b32.xlu1 %v2308_v27, %s2103_s21  ;;  %1996 = vmatpush3.bf16.msra.mxu0 %v1993_v36  ;;  %v674_v51 = vld [vmem:[#allocation2 + $0x52] sm:$0xff]  ;;  %v2385_v52 = vld [vmem:[#allocation2 + $0x60] sm:$0xff]  ;;  %v2393_v54 = vld [vmem:[#allocation2 + $0x68] sm:$0xff] }
  0x48   : > { %831 = vrot.lane.b32.xlu0 %v2310_v28, %s2103_s21  ;;  %2004 = vmatpush3.bf16.msra.mxu1 %v1993_v36  ;;  %v675_v55 = vld [vmem:[#allocation2 + $0x62] sm:$0xff]  ;;  %v676_v57 = vld [vmem:[#allocation2 + $0x6a] sm:$0xff]  ;;  %v2409_v60 = vld [vmem:[#allocation2 + $0x78] sm:$0xff] }
  0x49   : > { %1998 = vmatprep.subr.bf16.mxu0 %v1997_v41  ;;  %2002 = vmatprep.subr.bf16.mxu1 %v1997_v41  ;;  %v660_v56 = vld [vmem:[#allocation2 + $0x69] sm:$0xff]  ;;  %v661_v1 = vld [vmem:[#allocation2 + $0x79] sm:$0xff]  ;;  %v662_v8 = vld [vmem:[#allocation2 + $0x81] sm:$0xff] }
  0x4a   : > { %v2421_v2 = vld [vmem:[#allocation2 + $0x80] sm:$0xff]  ;;  %v2449_v21 = vld [vmem:[#allocation2 + $0x90] sm:$0xff]  ;;  %v543_v25 = vld [vmem:[#allocation2 + $0x8] sm:$0xff] }
  0x4b   : > { %707 = vrot.lane.b32.xlu1 %v560_v29, %s2102_s22  ;;  %2000 = vmatpush3.bf16.msra.mxu0 %v1997_v41  ;;  %v677_v7 = vld [vmem:[#allocation2 + $0x7a] sm:$0xff]  ;;  %v678_v13 = vld [vmem:[#allocation2 + $0x82] sm:$0xff]  ;;  %v663_v38 = vld [vmem:[#allocation2 + $0x91] sm:$0xff] }
  0x4c   : > { %895 = vrot.lane.b32.xlu0 %v560_v29, %s2104_s8  ;;  %2005 = vmatpush3.bf16.msra.mxu1 %v1997_v41  ;;  %v542_v16 = vld [vmem:[#allocation2] sm:$0xff] }
  0x4d   : > { %1967 = vmatprep.subr.msk.mxu0 %vm1388_vm2, %v1338_v42  ;;  %2003 = vmatprep.subr.msk.mxu1 %vm1388_vm2, %v1338_v42 }
  0x4f   : > { %959 = vrot.lane.b32.xlu1 %v622_v30, %s2105_s9  ;;  %1968 = vmatpush3.msk.msra.mxu0 %vm1388_vm2, %v1338_v42 }
  0x50   : > { %897 = vrot.lane.b32.xlu0 %v607_v31, %s2104_s8  ;;  %2006 = vmatpush3.msk.msra.mxu1 %vm1388_vm2, %v1338_v42 }
  0x53   : > { %771 = vrot.lane.b32.xlu1 %v622_v30, %s2101_s0 }
  0x54   : > { %709 = vrot.lane.b32.xlu0 %v607_v31, %s2102_s22 }
  0x57   : > { %1023 = vrot.lane.b32.xlu1 %v2322_v32, %s2106_s16 }
  0x58   : > { %961 = vrot.lane.b32.xlu0 %v623_v33, %s2105_s9 }
  0x5b   : > { %835 = vrot.lane.b32.xlu1 %v2322_v32, %s2103_s21 }
  0x5c   : > { %773 = vrot.lane.b32.xlu0 %v623_v33, %s2101_s0 }
  0x5f   : > { %1087 = vrot.lane.b32.xlu1 %v655_v39, %s2107_s28 }
  0x60   : > { %1025 = vrot.lane.b32.xlu0 %v2342_v40, %s2106_s16 }
  0x63   : > { %899 = vrot.lane.b32.xlu1 %v655_v39, %s2104_s8 }
  0x64   : > { %837 = vrot.lane.b32.xlu0 %v2342_v40, %s2103_s21 }
  0x67   : > { %1151 = vrot.lane.b32.xlu1 %v671_v43, %s2108_s12 }
  0x68   : > { %1089 = vrot.lane.b32.xlu0 %v656_v44, %s2107_s28 }
  0x6b   : > { %901 = vrot.lane.b32.xlu1 %v656_v44, %s2104_s8 }
  0x6c   : > { %711 = vrot.lane.b32.xlu0 %v655_v39, %s2102_s22  ;;  %v2471_v39 = vld [vmem:[#allocation2 + $0x98] sm:$0xff] }
  0x6f   : > { %1153 = vrot.lane.b32.xlu1 %v672_v45, %s2108_s12 }
  0x70   : > { %963 = vrot.lane.b32.xlu0 %v671_v43, %s2105_s9 }
  0x73   : > { %775 = vrot.lane.b32.xlu1 %v671_v43, %s2101_s0 }
  0x74   : > { %713 = vrot.lane.b32.xlu0 %v656_v44, %s2102_s22 }
  0x77   : > { %1027 = vrot.lane.b32.xlu1 %v2361_v46, %s2106_s16 }
  0x78   : > { %965 = vrot.lane.b32.xlu0 %v672_v45, %s2105_s9 }
  0x7b   : > { %839 = vrot.lane.b32.xlu1 %v2361_v46, %s2103_s21 }
  0x7c   : > { %777 = vrot.lane.b32.xlu0 %v672_v45, %s2101_s0 }
  0x7f   : > { %1091 = vrot.lane.b32.xlu1 %v657_v47, %s2107_s28 }
  0x80   : > { %1029 = vrot.lane.b32.xlu0 %v2369_v48, %s2106_s16 }
  0x83   : > { %903 = vrot.lane.b32.xlu1 %v657_v47, %s2104_s8 }
  0x84   : > { %841 = vrot.lane.b32.xlu0 %v2369_v48, %s2103_s21 }
  0x87   : > { %1155 = vrot.lane.b32.xlu1 %v673_v49, %s2108_s12 }
  0x88   : > { %1093 = vrot.lane.b32.xlu0 %v658_v50, %s2107_s28 }
  0x8b   : > { %905 = vrot.lane.b32.xlu1 %v658_v50, %s2104_s8 }
  0x8c   : > { %715 = vrot.lane.b32.xlu0 %v657_v47, %s2102_s22 }
  0x8f   : > { %1157 = vrot.lane.b32.xlu1 %v674_v51, %s2108_s12 }
  0x90   : > { %967 = vrot.lane.b32.xlu0 %v673_v49, %s2105_s9 }
  0x93   : > { %779 = vrot.lane.b32.xlu1 %v673_v49, %s2101_s0 }
  0x94   : > { %717 = vrot.lane.b32.xlu0 %v658_v50, %s2102_s22 }
  0x97   : > { %1031 = vrot.lane.b32.xlu1 %v2385_v52, %s2106_s16 }
  0x98   : > { %969 = vrot.lane.b32.xlu0 %v674_v51, %s2105_s9 }
  0x9b   : > { %843 = vrot.lane.b32.xlu1 %v2385_v52, %s2103_s21 }
  0x9c   : > { %781 = vrot.lane.b32.xlu0 %v674_v51, %s2101_s0 }
  0x9f   : > { %1095 = vrot.lane.b32.xlu1 %v659_v53, %s2107_s28 }
  0xa0   : > { %1033 = vrot.lane.b32.xlu0 %v2393_v54, %s2106_s16 }
  0xa3   : > { %907 = vrot.lane.b32.xlu1 %v659_v53, %s2104_s8 }
  0xa4   : > { %845 = vrot.lane.b32.xlu0 %v2393_v54, %s2103_s21 }
  0xa7   : > { %1159 = vrot.lane.b32.xlu1 %v675_v55, %s2108_s12 }
  0xa8   : > { %1097 = vrot.lane.b32.xlu0 %v660_v56, %s2107_s28 }
  0xab   : > { %909 = vrot.lane.b32.xlu1 %v660_v56, %s2104_s8 }
  0xac   : > { %719 = vrot.lane.b32.xlu0 %v659_v53, %s2102_s22 }
  0xaf   : > { %1161 = vrot.lane.b32.xlu1 %v676_v57, %s2108_s12 }
  0xb0   : > { %971 = vrot.lane.b32.xlu0 %v675_v55, %s2105_s9 }
  0xb1   : > { %v768_v58 = vpop.permute.xlu1 %767 }
  0xb2   : > { %v704_v59 = vpop.permute.xlu0 %703 }
  0xb3   : > { %783 = vrot.lane.b32.xlu1 %v675_v55, %s2101_s0  ;;  %v1199_v17 = vsel %vm495_vm1, %v542_v16, %v704_v59  ;;  %v679_v55 = vld [vmem:[#allocation2 + $0x92] sm:$0xff] }
  0xb4   : > { %721 = vrot.lane.b32.xlu0 %v660_v56, %s2102_s22  ;;  %v1216_v20 = vsel %vm1215_vm3, %v1199_v17, %v768_v58  ;;  %v664_v56 = vld [vmem:[#allocation2 + $0x99] sm:$0xff] }
  0xb5   : > { %v2411_v61 = vpop.permute.xlu1 %769 }
  0xb6   : > { %v706_v62 = vpop.permute.xlu0 %705 }
  0xb7   : > { %1035 = vrot.lane.b32.xlu1 %v2409_v60, %s2106_s16  ;;  %v1200_v31 = vsel %vm495_vm1, %v543_v25, %v706_v62  ;;  %v680_v62 = vld [vmem:[#allocation2 + $0x9a] sm:$0xff] }
  0xb8   : > { %973 = vrot.lane.b32.xlu0 %v676_v57, %s2105_s9  ;;  %v1217_v37 = vsel %vm1215_vm3, %v1200_v31, %v2411_v61 }
  0xb9   : > { %v2416_v63 = vpop.permute.xlu1 %833 }
  0xba   : > { %v832_v0 = vpop.permute.xlu0 %831  ;;  %v1234_v41 = vsel %vm1232_vm4, %v1217_v37, %v2416_v63 }
  0xbb   : > { %847 = vrot.lane.b32.xlu1 %v2409_v60, %s2103_s21  ;;  %v1233_v22 = vsel %vm1232_vm4, %v1216_v20, %v832_v0  ;;  %v665_v20 = vld [vmem:[#allocation2 + $0xa9] sm:$0xff] }
  0xbc   : > { %785 = vrot.lane.b32.xlu0 %v676_v57, %s2101_s0 }
  0xbd   : > { %v2423_v3 = vpop.permute.xlu1 %707 }
  0xbe   : > { %v896_v4 = vpop.permute.xlu0 %895 }
  0xbf   : > { %1099 = vrot.lane.b32.xlu1 %v661_v1, %s2107_s28  ;;  %v1250_v26 = vsel %vm1249_vm5, %v1233_v22, %v896_v4  ;;  %v2534_v22 = vld [vmem:[#allocation2 + $0xb0] sm:$0xff] }
  0xc0   : > { %1037 = vrot.lane.b32.xlu0 %v2421_v2, %s2106_s16 }
  0xc1   : > { %v960_v5 = vpop.permute.xlu1 %959 }
  0xc2   : > { %v898_v6 = vpop.permute.xlu0 %897  ;;  %v1267_v29 = vsel %vm1266_vm6, %v1250_v26, %v960_v5  ;;  %v1201_v5 = vsel %vm495_vm1, %v2310_v28, %v2423_v3 }
  0xc3   : > { %911 = vrot.lane.b32.xlu1 %v661_v1, %s2104_s8  ;;  %v1251_v44 = vsel %vm1249_vm5, %v1234_v41, %v898_v6  ;;  %v682_v41 = vld [vmem:[#allocation2 + $0xb2] sm:$0xff] }
  0xc4   : > { %849 = vrot.lane.b32.xlu0 %v2421_v2, %s2103_s21 }
  0xc5   : > { %v2431_v9 = vpop.permute.xlu1 %771 }
  0xc6   : > { %v2433_v10 = vpop.permute.xlu0 %709  ;;  %v1218_v6 = vsel %vm1215_vm3, %v1201_v5, %v2431_v9  ;;  %v667_v5 = vld [vmem:[#allocation2 + $0xc1] sm:$0xff] }
  0xc7   : > { %1163 = vrot.lane.b32.xlu1 %v677_v7, %s2108_s12 }
  0xc8   : > { %1101 = vrot.lane.b32.xlu0 %v662_v8, %s2107_s28 }
  0xc9   : > { %v1024_v11 = vpop.permute.xlu1 %1023 }
  0xca   : > { %v962_v12 = vpop.permute.xlu0 %961  ;;  %v1284_v30 = vsel %vm1283_vm7, %v1267_v29, %v1024_v11 }
  0xcb   : > { %913 = vrot.lane.b32.xlu1 %v662_v8, %s2104_s8  ;;  %v1268_v45 = vsel %vm1266_vm6, %v1251_v44, %v962_v12 }
  0xcc   : > { %723 = vrot.lane.b32.xlu0 %v661_v1, %s2102_s22 }
  0xcd   : > { %v2439_v14 = vpop.permute.xlu1 %835 }
  0xce   : > { %v2441_v15 = vpop.permute.xlu0 %773 }
  0xcf   : > { %1165 = vrot.lane.b32.xlu1 %v678_v13, %s2108_s12 }
  0xd0   : > { %975 = vrot.lane.b32.xlu0 %v677_v7, %s2105_s9 }
  0xd1   : > { %v1088_v18 = vpop.permute.xlu1 %1087 }
  0xd2   : > { %v1026_v19 = vpop.permute.xlu0 %1025  ;;  %v1301_v33 = vsel %vm1300_vm8, %v1284_v30, %v1088_v18  ;;  %v1202_v18 = vsel %vm495_vm1, %v2308_v27, %v2433_v10 }
  0xd3   : > { %787 = vrot.lane.b32.xlu1 %v677_v7, %s2101_s0  ;;  %v1285_v47 = vsel %vm1283_vm7, %v1268_v45, %v1026_v19  ;;  %v2510_v7 = vld [vmem:[#allocation2 + $0xa8] sm:$0xff]  ;;  %v1219_v19 = vsel %vm1215_vm3, %v1202_v18, %v2441_v15 }
  0xd4   : > { %725 = vrot.lane.b32.xlu0 %v662_v8, %s2102_s22  ;;  %v1235_v8 = vsel %vm1232_vm4, %v1218_v6, %v2439_v14  ;;  %v652_v6 = vld [vmem:[#allocation2 + $0xc8] sm:$0xff] }
  0xd5   : > { %v2452_v23 = vpop.permute.xlu1 %899 }
  0xd6   : > { %v2454_v24 = vpop.permute.xlu0 %837 }
  0xd7   : > { %1039 = vrot.lane.b32.xlu1 %v2449_v21, %s2106_s16 }
  0xd8   : > { %977 = vrot.lane.b32.xlu0 %v678_v13, %s2105_s9 }
  0xd9   : > { %v1152_v34 = vpop.permute.xlu1 %1151 }
  0xda   : > { %v1090_v35 = vpop.permute.xlu0 %1089  ;;  %v1318_v36 = vsel %vm1317_vm9, %v1301_v33, %v1152_v34  ;;  %v681_v33 = vld [vmem:[#allocation2 + $0xaa] sm:$0xff] }
  0xdb   : > { %851 = vrot.lane.b32.xlu1 %v2449_v21, %s2103_s21  ;;  %1969 = vmatprep.mubr.msk.f32.mxu0 %vm1339_vm10, %v1318_v36  ;;  %v1302_v49 = vsel %vm1300_vm8, %v1285_v47, %v1090_v35  ;;  %v666_v34 = vld [vmem:[#allocation2 + $0xb1] sm:$0xff] }
  0xdc   : > { %789 = vrot.lane.b32.xlu0 %v678_v13, %s2101_s0  ;;  %v1252_v13 = vsel %vm1249_vm5, %v1235_v8, %v2452_v23  ;;  %v1236_v23 = vsel %vm1232_vm4, %v1219_v19, %v2454_v24 }
  0xdd   : > { %v902_v42 = vpop.permute.xlu1 %901 }
  0xde   : > { %v2475_v43 = vpop.permute.xlu0 %711  ;;  %v1253_v27 = vsel %vm1249_vm5, %v1236_v23, %v902_v42  ;;  %v637_v23 = vld [vmem:[#allocation2 + $0xca] sm:$0xff] }
  0xdf   : > { %1103 = vrot.lane.b32.xlu1 %v663_v38, %s2107_s28 }
  0xe0   : > { %1041 = vrot.lane.b32.xlu0 %v2471_v39, %s2106_s16 }
  0xe1   : > { %v1154_v50 = vpop.permute.xlu1 %1153 }
  0xe2   : > { %v964_v51 = vpop.permute.xlu0 %963  ;;  %v1319_v53 = vsel %vm1317_vm9, %v1302_v49, %v1154_v50  ;;  %v1203_v49 = vsel %vm495_vm1, %v2322_v32, %v2475_v43 }
  0xe3   : > { %915 = vrot.lane.b32.xlu1 %v663_v38, %s2104_s8  ;;  %1970 = vmatmul.mubr.msk.f32.vlgmr.msra.gmra.mrb[0].mxu0 %vm1339_vm10, %v1319_v53  ;;  %v1269_v28 = vsel %vm1266_vm6, %v1252_v13, %v964_v51  ;;  %v651_v51 = vld [vmem:[#allocation2 + $0xc0] sm:$0xff] }
  0xe4   : > { %853 = vrot.lane.b32.xlu0 %v2471_v39, %s2103_s21 }
  0xe5   : > { %v2489_v57 = vpop.permute.xlu1 %775 }
  0xe6   : > { %v2491_v58 = vpop.permute.xlu0 %713  ;;  %v1220_v50 = vsel %vm1215_vm3, %v1203_v49, %v2489_v57  ;;  %v685_v49 = vld [vmem:[#allocation2 + $0xda] sm:$0xff] }
  0xe7   : > { %1167 = vrot.lane.b32.xlu1 %v679_v55, %s2108_s12 }
  0xe8   : > { %1105 = vrot.lane.b32.xlu0 %v664_v56, %s2107_s28 }
  0xe9   : > { %v1028_v59 = vpop.permute.xlu1 %1027 }
  0xea   : > { %v966_v61 = vpop.permute.xlu0 %965  ;;  %v1286_v3 = vsel %vm1283_vm7, %v1269_v28, %v1028_v59 }
  0xeb   : > { %917 = vrot.lane.b32.xlu1 %v664_v56, %s2104_s8  ;;  %v1270_v10 = vsel %vm1266_vm6, %v1253_v27, %v966_v61 }
  0xec   : > { %727 = vrot.lane.b32.xlu0 %v663_v38, %s2102_s22 }
  0xed   : > { %v2497_v63 = vpop.permute.xlu1 %839 }
  0xee   : > { %v2499_v0 = vpop.permute.xlu0 %777  ;;  %v1237_v53 = vsel %vm1232_vm4, %v1220_v50, %v2497_v63  ;;  %v1204_v63 = vsel %vm495_vm1, %v2342_v40, %v2491_v58 }
  0xef   : > { %1169 = vrot.lane.b32.xlu1 %v680_v62, %s2108_s12 }
  0xf0   : > { %979 = vrot.lane.b32.xlu0 %v679_v55, %s2105_s9 }
  0xf1   : > { %v1092_v1 = vpop.permute.xlu1 %1091 }
  0xf2   : > { %v1030_v4 = vpop.permute.xlu0 %1029  ;;  %v1303_v9 = vsel %vm1300_vm8, %v1286_v3, %v1092_v1 }
  0xf3   : > { %791 = vrot.lane.b32.xlu1 %v679_v55, %s2101_s0  ;;  %v1287_v15 = vsel %vm1283_vm7, %v1270_v10, %v1030_v4  ;;  %v1221_v4 = vsel %vm1215_vm3, %v1204_v63, %v2499_v0  ;;  %v654_v10 = vld [vmem:[#allocation2 + $0xe0] sm:$0xff] }
  0xf4   : > { %729 = vrot.lane.b32.xlu0 %v664_v56, %s2102_s22 }
  0xf5   : > { %v904_v11 = vpop.permute.xlu1 %903 }
  0xf6   : > { %v2514_v12 = vpop.permute.xlu0 %841  ;;  %v1254_v59 = vsel %vm1249_vm5, %v1237_v53, %v904_v11 }
  0xf7   : > { %1043 = vrot.lane.b32.xlu1 %v2510_v7, %s2106_s16  ;;  %v1238_v8 = vsel %vm1232_vm4, %v1221_v4, %v2514_v12  ;;  %v683_v12 = vld [vmem:[#allocation2 + $0xc2] sm:$0xff] }
  0xf8   : > { %981 = vrot.lane.b32.xlu0 %v680_v62, %s2105_s9 }
  0xf9   : > { %v1156_v16 = vpop.permute.xlu1 %1155 }
  0xfa   : > { %v1094_v17 = vpop.permute.xlu0 %1093  ;;  %v1320_v14 = vsel %vm1317_vm9, %v1303_v9, %v1156_v16 }
  0xfb   : > { %855 = vrot.lane.b32.xlu1 %v2510_v7, %s2103_s21  ;;  %1972 = vmatprep.mubr.msk.f32.mxu0 %vm1339_vm10, %v1320_v14  ;;  %v1304_v29 = vsel %vm1300_vm8, %v1287_v15, %v1094_v17  ;;  %v668_v17 = vld [vmem:[#allocation2 + $0xc9] sm:$0xff]  ;;  %v653_v15 = vld [vmem:[#allocation2 + $0xd8] sm:$0xff] }
  0xfc   : > { %793 = vrot.lane.b32.xlu0 %v680_v62, %s2101_s0 }
  0xfd   : > { %v906_v25 = vpop.permute.xlu1 %905 }
  0xfe   : > { %v2538_v26 = vpop.permute.xlu0 %715  ;;  %v1255_v28 = vsel %vm1249_vm5, %v1238_v8, %v906_v25 }
  0xff   : > { %1107 = vrot.lane.b32.xlu1 %v665_v20, %s2107_s28 }
 0x100   : > { %1045 = vrot.lane.b32.xlu0 %v2534_v22, %s2106_s16 }
 0x101   : > { %v1158_v30 = vpop.permute.xlu1 %1157 }
 0x102   : > { %v968_v31 = vpop.permute.xlu0 %967  ;;  %v1321_v24 = vsel %vm1317_vm9, %v1304_v29, %v1158_v30 }
 0x103   : > { %919 = vrot.lane.b32.xlu1 %v665_v20, %s2104_s8  ;;  %1973 = vmatmul.mubr.msk.f32.gmra.mrb[2].mxu0 %vm1339_vm10, %v1321_v24  ;;  %v1271_v61 = vsel %vm1266_vm6, %v1254_v59, %v968_v31  ;;  %v1205_v31 = vsel %vm495_vm1, %v2361_v46, %v2538_v26  ;;  %v686_v26 = vld [vmem:[#allocation2 + $0xe2] sm:$0xff] }
 0x104   : > { %857 = vrot.lane.b32.xlu0 %v2534_v22, %s2103_s21 }
 0x105   : > { %v2552_v35 = vpop.permute.xlu1 %779 }
 0x106   : > { %v2554_v36 = vpop.permute.xlu0 %717  ;;  %v1222_v24 = vsel %vm1215_vm3, %v1205_v31, %v2552_v35 }
 0x107   : > { %1171 = vrot.lane.b32.xlu1 %v681_v33, %s2108_s12  ;;  %v1206_v53 = vsel %vm495_vm1, %v2369_v48, %v2554_v36 }
 0x108   : > { %1109 = vrot.lane.b32.xlu0 %v666_v34, %s2107_s28 }
 0x109   : > { %v1032_v37 = vpop.permute.xlu1 %1031 }
 0x10a   : > { %v970_v38 = vpop.permute.xlu0 %969  ;;  %v1288_v32 = vsel %vm1283_vm7, %v1271_v61, %v1032_v37 }
 0x10b   : > { %921 = vrot.lane.b32.xlu1 %v666_v34, %s2104_s8  ;;  %v1272_v40 = vsel %vm1266_vm6, %v1255_v28, %v970_v38 }
 0x10c   : > { %731 = vrot.lane.b32.xlu0 %v665_v20, %s2102_s22 }
 0x10d   : > { %v2560_v42 = vpop.permute.xlu1 %843 }
 0x10e   : > { %v2562_v44 = vpop.permute.xlu0 %781  ;;  %v1239_v37 = vsel %vm1232_vm4, %v1222_v24, %v2560_v42 }
 0x10f   : > { %1173 = vrot.lane.b32.xlu1 %v682_v41, %s2108_s12 }
 0x110   : > { %983 = vrot.lane.b32.xlu0 %v681_v33, %s2105_s9 }
 0x111   : > { %v1096_v45 = vpop.permute.xlu1 %1095 }
 0x112   : > { %v1034_v47 = vpop.permute.xlu0 %1033  ;;  %v1305_v43 = vsel %vm1300_vm8, %v1288_v32, %v1096_v45 }
 0x113   : > { %795 = vrot.lane.b32.xlu1 %v681_v33, %s2101_s0  ;;  %v1289_v58 = vsel %vm1283_vm7, %v1272_v40, %v1034_v47  ;;  %v670_v33 = vld [vmem:[#allocation2 + $0xe1] sm:$0xff] }
 0x114   : > { %733 = vrot.lane.b32.xlu0 %v666_v34, %s2102_s22  ;;  %v669_v34 = vld [vmem:[#allocation2 + $0xd9] sm:$0xff] }
 0x115   : > { %v908_v55 = vpop.permute.xlu1 %907 }
 0x116   : > { %v2575_v56 = vpop.permute.xlu0 %845  ;;  %v1256_v45 = vsel %vm1249_vm5, %v1239_v37, %v908_v55  ;;  %v1223_v55 = vsel %vm1215_vm3, %v1206_v53, %v2562_v44 }
 0x117   : > { %1047 = vrot.lane.b32.xlu1 %v651_v51, %s2106_s16  ;;  %v1240_v59 = vsel %vm1232_vm4, %v1223_v55, %v2575_v56 }
 0x118   : > { %985 = vrot.lane.b32.xlu0 %v682_v41, %s2105_s9 }
 0x119   : > { %v1160_v57 = vpop.permute.xlu1 %1159 }
 0x11a   : > { %v1098_v62 = vpop.permute.xlu0 %1097  ;;  %v1322_v1 = vsel %vm1317_vm9, %v1305_v43, %v1160_v57 }
 0x11b   : > { %859 = vrot.lane.b32.xlu1 %v651_v51, %s2103_s21  ;;  %1975 = vmatprep.mubr.msk.f32.mxu0 %vm1339_vm10, %v1322_v1  ;;  %v1306_v0 = vsel %vm1300_vm8, %v1289_v58, %v1098_v62 }
 0x11c   : > { %797 = vrot.lane.b32.xlu0 %v682_v41, %s2101_s0 }
 0x11d   : > { %v910_v11 = vpop.permute.xlu1 %909 }
 0x11e   : > { %v2594_v13 = vpop.permute.xlu0 %719  ;;  %v1257_v43 = vsel %vm1249_vm5, %v1240_v59, %v910_v11 }
 0x11f   : > { %1111 = vrot.lane.b32.xlu1 %v667_v5, %s2107_s28  ;;  %v1207_v40 = vsel %vm495_vm1, %v2385_v52, %v2594_v13 }
 0x120   : > { %1049 = vrot.lane.b32.xlu0 %v652_v6, %s2106_s16 }
 0x121   : > { %v1162_v3 = vpop.permute.xlu1 %1161 }
 0x122   : > { %v972_v9 = vpop.permute.xlu0 %971  ;;  %v1323_v16 = vsel %vm1317_vm9, %v1306_v0, %v1162_v3 }
 0x123   : > { %923 = vrot.lane.b32.xlu1 %v667_v5, %s2104_s8  ;;  %1976 = vmatmul.mubr.msk.f32.gmra.mrb[4].mxu0 %vm1339_vm10, %v1323_v16  ;;  %v1273_v47 = vsel %vm1266_vm6, %v1256_v45, %v972_v9 }
 0x124   : > { %861 = vrot.lane.b32.xlu0 %v652_v6, %s2103_s21 }
 0x125   : > { %v2606_v14 = vpop.permute.xlu1 %783 }
 0x126   : > { %v2608_v18 = vpop.permute.xlu0 %721  ;;  %v1224_v58 = vsel %vm1215_vm3, %v1207_v40, %v2606_v14 }
 0x127   : > { %1175 = vrot.lane.b32.xlu1 %v683_v12, %s2108_s12  ;;  %v1208_v52 = vsel %vm495_vm1, %v2393_v54, %v2608_v18 }
 0x128   : > { %1113 = vrot.lane.b32.xlu0 %v668_v17, %s2107_s28 }
 0x129   : > { %v1036_v19 = vpop.permute.xlu1 %1035 }
 0x12a   : > { %v974_v20 = vpop.permute.xlu0 %973  ;;  %v1290_v46 = vsel %vm1283_vm7, %v1273_v47, %v1036_v19 }
 0x12b   : > { %987 = vrot.lane.b32.xlu1 %v683_v12, %s2105_s9  ;;  %v1274_v57 = vsel %vm1266_vm6, %v1257_v43, %v974_v20 }
 0x12c   : > { %925 = vrot.lane.b32.xlu0 %v668_v17, %s2104_s8 }
 0x12d   : > { %v848_v25 = vpop.permute.xlu1 %847 }
 0x12e   : > { %v2614_v27 = vpop.permute.xlu0 %785  ;;  %v1241_v0 = vsel %vm1232_vm4, %v1224_v58, %v848_v25 }
 0x12f   : > { %989 = vrot.lane.b32.xlu1 %v637_v23, %s2105_s9  ;;  %v1225_v13 = vsel %vm1215_vm3, %v1208_v52, %v2614_v27 }
 0x130   : > { %1177 = vrot.lane.b32.xlu0 %v637_v23, %s2108_s12 }
 0x131   : > { %v1100_v29 = vpop.permute.xlu1 %1099 }
 0x132   : > { %v1038_v30 = vpop.permute.xlu0 %1037  ;;  %v1307_v35 = vsel %vm1300_vm8, %v1290_v46, %v1100_v29 }
 0x133   : > { %1053 = vrot.lane.b32.xlu1 %v654_v10, %s2106_s16  ;;  %v1291_v48 = vsel %vm1283_vm7, %v1274_v57, %v1038_v30 }
 0x134   : > { %1051 = vrot.lane.b32.xlu0 %v653_v15, %s2106_s16 }
 0x135   : > { %v912_v38 = vpop.permute.xlu1 %911 }
 0x136   : > { %v850_v41 = vpop.permute.xlu0 %849  ;;  %v1258_v16 = vsel %vm1249_vm5, %v1241_v0, %v912_v38 }
 0x137   : > { %1117 = vrot.lane.b32.xlu1 %v670_v33, %s2107_s28  ;;  %v1242_v14 = vsel %vm1232_vm4, %v1225_v13, %v850_v41 }
 0x138   : > { %1115 = vrot.lane.b32.xlu0 %v669_v34, %s2107_s28 }
 0x139   : > { %v1164_v50 = vpop.permute.xlu1 %1163 }
 0x13a   : > { %v1102_v51 = vpop.permute.xlu0 %1101  ;;  %v1324_v42 = vsel %vm1317_vm9, %v1307_v35, %v1164_v50 }
 0x13b   : > { %1181 = vrot.lane.b32.xlu1 %v686_v26, %s2108_s12  ;;  %1978 = vmatprep.mubr.msk.f32.mxu0 %vm1339_vm10, %v1324_v42  ;;  %v1308_v36 = vsel %vm1300_vm8, %v1291_v48, %v1102_v51 }
 0x13c   : > { %1179 = vrot.lane.b32.xlu0 %v685_v49, %s2108_s12 }
 0x13d   : > { %v914_v61 = vpop.permute.xlu1 %913 }
 0x13e   : > { %v724_v32 = vpop.permute.xlu0 %723  ;;  %v1259_v29 = vsel %vm1249_vm5, %v1242_v14, %v914_v61 }
 0x13f   : > { %v1209_v26 = vsel %vm495_vm1, %v2409_v60, %v724_v32 }
 0x141   : > { %v1166_v62 = vpop.permute.xlu1 %1165 }
 0x142   : > { %v976_v1 = vpop.permute.xlu0 %975  ;;  %v1325_v63 = vsel %vm1317_vm9, %v1308_v36, %v1166_v62 }
 0x143   : > { %1979 = vmatmul.mubr.msk.f32.gmra.mrb[6].mxu0 %vm1339_vm10, %v1325_v63  ;;  %v1275_v12 = vsel %vm1266_vm6, %v1258_v16, %v976_v1 }
 0x145   : > { %v788_v44 = vpop.permute.xlu1 %787 }
 0x146   : > { %v726_v4 = vpop.permute.xlu0 %725  ;;  %v1226_v49 = vsel %vm1215_vm3, %v1209_v26, %v788_v44 }
 0x147   : > { %v1210_v60 = vsel %vm495_vm1, %v2421_v2, %v726_v4 }
 0x149   : > { %v1040_v5 = vpop.permute.xlu1 %1039 }
 0x14a   : > { %v978_v56 = vpop.permute.xlu0 %977  ;;  %v1292_v17 = vsel %vm1283_vm7, %v1275_v12, %v1040_v5 }
 0x14b   : > { %v1276_v30 = vsel %vm1266_vm6, %v1259_v29, %v978_v56 }
 0x14d   : > { %v852_v6 = vpop.permute.xlu1 %851 }
 0x14e   : > { %v790_v8 = vpop.permute.xlu0 %789  ;;  %v1243_v35 = vsel %vm1232_vm4, %v1226_v49, %v852_v6 }
 0x14f   : > { %v1227_v32 = vsel %vm1215_vm3, %v1210_v60, %v790_v8 }
 0x151   : > { %v1104_v28 = vpop.permute.xlu1 %1103 }
 0x152   : > { %v1042_v11 = vpop.permute.xlu0 %1041  ;;  %v1309_v19 = vsel %vm1300_vm8, %v1292_v17, %v1104_v28 }
 0x153   : > { %v1293_v31 = vsel %vm1283_vm7, %v1276_v30, %v1042_v11 }
 0x155   : > { %v916_v3 = vpop.permute.xlu1 %915 }
 0x156   : > { %v854_v9 = vpop.permute.xlu0 %853  ;;  %v1260_v42 = vsel %vm1249_vm5, %v1243_v35, %v916_v3 }
 0x157   : > { %v1244_v48 = vsel %vm1232_vm4, %v1227_v32, %v854_v9 }
 0x159   : > { %v1168_v20 = vpop.permute.xlu1 %1167 }
 0x15a   : > { %v1106_v23 = vpop.permute.xlu0 %1105  ;;  %v1326_v10 = vsel %vm1317_vm9, %v1309_v19, %v1168_v20 }
 0x15b   : > { %1981 = vmatprep.mubr.msk.f32.mxu1 %vm1339_vm10, %v1326_v10  ;;  %v1310_v24 = vsel %vm1300_vm8, %v1293_v31, %v1106_v23 }
 0x15d   : > { %v918_v25 = vpop.permute.xlu1 %917 }
 0x15e   : > { %v728_v15 = vpop.permute.xlu0 %727  ;;  %v1261_v1 = vsel %vm1249_vm5, %v1244_v48, %v918_v25 }
 0x15f   : > { %v1211_v9 = vsel %vm495_vm1, %v2449_v21, %v728_v15 }
 0x161   : > { %v1170_v33 = vpop.permute.xlu1 %1169 }
 0x162   : > { %v980_v34 = vpop.permute.xlu0 %979  ;;  %v1327_v54 = vsel %vm1317_vm9, %v1310_v24, %v1170_v33 }
 0x163   : > { %1982 = vmatmul.mubr.msk.f32.vlgmr.msra.gmra.mrb[0].mxu1 %vm1339_vm10, %v1327_v54  ;;  %v1277_v53 = vsel %vm1266_vm6, %v1260_v42, %v980_v34 }
 0x165   : > { %v792_v18 = vpop.permute.xlu1 %791 }
 0x166   : > { %v730_v27 = vpop.permute.xlu0 %729  ;;  %v1228_v16 = vsel %vm1215_vm3, %v1211_v9, %v792_v18 }
 0x167   : > { %v1212_v21 = vsel %vm495_vm1, %v2471_v39, %v730_v27 }
 0x169   : > { %v1044_v37 = vpop.permute.xlu1 %1043 }
 0x16a   : > { %v982_v38 = vpop.permute.xlu0 %981  ;;  %v1294_v55 = vsel %vm1283_vm7, %v1277_v53, %v1044_v37 }
 0x16b   : > { %v1278_v63 = vsel %vm1266_vm6, %v1261_v1, %v982_v38 }
 0x16d   : > { %v856_v41 = vpop.permute.xlu1 %855 }
 0x16e   : > { %v794_v45 = vpop.permute.xlu0 %793  ;;  %v1245_v12 = vsel %vm1232_vm4, %v1228_v16, %v856_v41 }
 0x16f   : > { %v1229_v15 = vsel %vm1215_vm3, %v1212_v21, %v794_v45 }
 0x171   : > { %v1108_v47 = vpop.permute.xlu1 %1107 }
 0x172   : > { %v1046_v46 = vpop.permute.xlu0 %1045  ;;  %v1311_v59 = vsel %vm1300_vm8, %v1294_v55, %v1108_v47 }
 0x173   : > { %v1295_v44 = vsel %vm1283_vm7, %v1278_v63, %v1046_v46 }
 0x175   : > { %v920_v50 = vpop.permute.xlu1 %919 }
 0x176   : > { %v858_v51 = vpop.permute.xlu0 %857  ;;  %v1262_v20 = vsel %vm1249_vm5, %v1245_v12, %v920_v50 }
 0x177   : > { %v1246_v29 = vsel %vm1232_vm4, %v1229_v15, %v858_v51 }
 0x179   : > { %v1172_v61 = vpop.permute.xlu1 %1171 }
 0x17a   : > { %v1110_v43 = vpop.permute.xlu0 %1109  ;;  %v1328_v57 = vsel %vm1317_vm9, %v1311_v59, %v1172_v61 }
 0x17b   : > { %1984 = vmatprep.mubr.msk.f32.mxu1 %vm1339_vm10, %v1328_v57  ;;  %v1312_v5 = vsel %vm1300_vm8, %v1295_v44, %v1110_v43 }
 0x17d   : > { %v922_v36 = vpop.permute.xlu1 %921 }
 0x17e   : > { %v732_v62 = vpop.permute.xlu0 %731  ;;  %v1263_v24 = vsel %vm1249_vm5, %v1246_v29, %v922_v36 }
 0x17f   : > { %v1213_v41 = vsel %vm495_vm1, %v2510_v7, %v732_v62 }
 0x181   : > { %v1174_v56 = vpop.permute.xlu1 %1173 }
 0x182   : > { %v984_v6 = vpop.permute.xlu0 %983  ;;  %v1329_v2 = vsel %vm1317_vm9, %v1312_v5, %v1174_v56 }
 0x183   : > { %1985 = vmatmul.mubr.msk.f32.gmra.mrb[2].mxu1 %vm1339_vm10, %v1329_v2  ;;  %v1279_v23 = vsel %vm1266_vm6, %v1262_v20, %v984_v6 }
 0x185   : > { %v796_v4 = vpop.permute.xlu1 %795 }
 0x186   : > { %v734_v8 = vpop.permute.xlu0 %733  ;;  %v1230_v47 = vsel %vm1215_vm3, %v1213_v41, %v796_v4 }
 0x187   : > { %v1214_v45 = vsel %vm495_vm1, %v2534_v22, %v734_v8 }
 0x189   : > { %v1048_v28 = vpop.permute.xlu1 %1047 }
 0x18a   : > { %v986_v11 = vpop.permute.xlu0 %985  ;;  %v1296_v10 = vsel %vm1283_vm7, %v1279_v23, %v1048_v28 }
 0x18b   : > { %v1280_v33 = vsel %vm1266_vm6, %v1263_v24, %v986_v11 }
 0x18d   : > { %v860_v40 = vpop.permute.xlu1 %859 }
 0x18e   : > { %v798_v58 = vpop.permute.xlu0 %797  ;;  %v1247_v26 = vsel %vm1232_vm4, %v1230_v47, %v860_v40 }
 0x18f   : > { %v1231_v46 = vsel %vm1215_vm3, %v1214_v45, %v798_v58 }
 0x191   : > { %v1112_v0 = vpop.permute.xlu1 %1111 }
 0x192   : > { %v1050_v3 = vpop.permute.xlu0 %1049  ;;  %v1313_v52 = vsel %vm1300_vm8, %v1296_v10, %v1112_v0 }
 0x193   : > { %v1297_v34 = vsel %vm1283_vm7, %v1280_v33, %v1050_v3 }
 0x195   : > { %v924_v17 = vpop.permute.xlu1 %923 }
 0x196   : > { %v862_v19 = vpop.permute.xlu0 %861  ;;  %v1264_v51 = vsel %vm1249_vm5, %v1247_v26, %v924_v17 }
 0x197   : > { %v1248_v49 = vsel %vm1232_vm4, %v1231_v46, %v862_v19 }
 0x199   : > { %v1176_v13 = vpop.permute.xlu1 %1175 }
 0x19a   : > { %v1114_v14 = vpop.permute.xlu0 %1113  ;;  %v1330_v25 = vsel %vm1317_vm9, %v1313_v52, %v1176_v13 }
 0x19b   : > { %1987 = vmatprep.mubr.msk.f32.mxu1 %vm1339_vm10, %v1330_v25  ;;  %v1314_v54 = vsel %vm1300_vm8, %v1297_v34, %v1114_v14 }
 0x19d   : > { %v988_v30 = vpop.permute.xlu1 %987 }
 0x19e   : > { %v926_v31 = vpop.permute.xlu0 %925  ;;  %v1281_v7 = vsel %vm1266_vm6, %v1264_v51, %v988_v30 }
 0x19f   : > { %v1265_v42 = vsel %vm1249_vm5, %v1248_v49, %v926_v31 }
 0x1a1   : > { %v990_v18 = vpop.permute.xlu1 %989 }
 0x1a2   : > { %v1178_v37 = vpop.permute.xlu0 %1177  ;;  %v1282_v53 = vsel %vm1266_vm6, %v1265_v42, %v990_v18 }
 0x1a3   : > { %v1331_v39 = vsel %vm1317_vm9, %v1314_v54, %v1178_v37 }
 0x1a4   : > { %1988 = vmatmul.mubr.msk.f32.gmra.mrb[4].mxu1 %vm1339_vm10, %v1331_v39 }
 0x1a5   : > { %v1054_v27 = vpop.permute.xlu1 %1053 }
 0x1a6   : > { %v1052_v38 = vpop.permute.xlu0 %1051  ;;  %v1299_v22 = vsel %vm1283_vm7, %v1282_v53, %v1054_v27 }
 0x1a7   : > { %v1298_v55 = vsel %vm1283_vm7, %v1281_v7, %v1052_v38 }
 0x1a9   : > { %v1118_v35 = vpop.permute.xlu1 %1117 }
 0x1aa   : > { %v1116_v50 = vpop.permute.xlu0 %1115  ;;  %v1316_v59 = vsel %vm1300_vm8, %v1299_v22, %v1118_v35 }
 0x1ab   : > { %v1315_v61 = vsel %vm1300_vm8, %v1298_v55, %v1116_v50 }
 0x1ad   : > { %v1182_v43 = vpop.permute.xlu1 %1181 }
 0x1ae   : > { %v1180_v57 = vpop.permute.xlu0 %1179  ;;  %v1333_v60 = vsel %vm1317_vm9, %v1316_v59, %v1182_v43 }
 0x1af   : > { %v1332_v32 = vsel %vm1317_vm9, %v1315_v61, %v1180_v57 }
 0x1b0   : > { %1990 = vmatprep.mubr.msk.f32.mxu1 %vm1339_vm10, %v1332_v32 }
 0x1b1   : > { %1991 = vmatmul.mubr.msk.f32.gmra.mrb[6].mxu1 %vm1339_vm10, %v1333_v60 }
 0x1b6   : > { %v1971_v48 = vpop.f32.mrb[0].mxu0 }
 0x1b7   : > { %1538 = vst.msk [vmem:[%s2227_s18 + $0x8] sm:$0xff] %vm1215_vm3, %v1971_v48  ;;  %v1554_v36 = vsel %vm1215_vm3, %v1971_v48, 0.0  ;;  %v1593_v62 = vmul.f32 %v1971_v48, %v1971_v48  ;;  %v1458_v1 = vpop.f32.mrb[1].mxu0 }
 0x1b8   : > { %1537 = vst.msk [vmem:[%s2227_s18] sm:$0xff] %vm1215_vm3, %v1458_v1  ;;  %v1553_v63 = vsel %vm1215_vm3, %v1458_v1, 0.0  ;;  %v1592_v44 = vmul.f32 %v1458_v1, %v1458_v1 }
 0x1b9   : > { %v1609_v5 = vsel %vm1215_vm3, %v1593_v62, 0.0  ;;  %v1555_v56 = vadd.f32 %v1554_v36, %v1553_v63 }
 0x1ba   : > { %v1608_v6 = vsel %vm1215_vm3, %v1592_v44, 0.0 }
 0x1bb   : > { %v1610_v2 = vadd.f32 %v1609_v5, %v1608_v6 }
 0x1d6   : > { %v1974_v4 = vpop.f32.mrb[2].mxu0 }
 0x1d7   : > { %1540 = vst.msk [vmem:[%s2227_s18 + $0x18] sm:$0xff] %vm1215_vm3, %v1974_v4  ;;  %v1468_v8 = vpop.f32.mrb[3].mxu0  ;;  %v1595_v28 = vmul.f32 %v1974_v4, %v1974_v4  ;;  %v1558_v0 = vsel %vm1215_vm3, %v1974_v4, 0.0 }
 0x1d8   : > { %1539 = vst.msk [vmem:[%s2227_s18 + $0x10] sm:$0xff] %vm1215_vm3, %v1468_v8  ;;  %v1556_v11 = vsel %vm1215_vm3, %v1468_v8, 0.0  ;;  %v1594_v40 = vmul.f32 %v1468_v8, %v1468_v8 }
 0x1d9   : > { %v1557_v58 = vadd.f32 %v1556_v11, %v1555_v56  ;;  %v1613_v12 = vsel %vm1215_vm3, %v1595_v28, 0.0 }
 0x1da   : > { %v1611_v3 = vsel %vm1215_vm3, %v1594_v40, 0.0 }
 0x1db   : > { %v1612_v9 = vadd.f32 %v1611_v3, %v1610_v2  ;;  %v1559_v16 = vadd.f32 %v1558_v0, %v1557_v58 }
 0x1dd   : > { %v1614_v17 = vadd.f32 %v1613_v12, %v1612_v9 }
 0x1f6   : > { %v1977_v19 = vpop.f32.mrb[4].mxu0 }
 0x1f7   : > { %1542 = vst.msk [vmem:[%s2227_s18 + $0x28] sm:$0xff] %vm1215_vm3, %v1977_v19  ;;  %v1478_v20 = vpop.f32.mrb[5].mxu0  ;;  %v1597_v23 = vmul.f32 %v1977_v19, %v1977_v19  ;;  %v1562_v14 = vsel %vm1215_vm3, %v1977_v19, 0.0 }
 0x1f8   : > { %1541 = vst.msk [vmem:[%s2227_s18 + $0x20] sm:$0xff] %vm1215_vm3, %v1478_v20  ;;  %v1560_v10 = vsel %vm1215_vm3, %v1478_v20, 0.0  ;;  %v1596_v52 = vmul.f32 %v1478_v20, %v1478_v20 }
 0x1f9   : > { %v1561_v13 = vadd.f32 %v1560_v10, %v1559_v16  ;;  %v1617_v29 = vsel %vm1215_vm3, %v1597_v23, 0.0 }
 0x1fa   : > { %v1615_v25 = vsel %vm1215_vm3, %v1596_v52, 0.0 }
 0x1fb   : > { %v1616_v21 = vadd.f32 %v1615_v25, %v1614_v17  ;;  %v1563_v15 = vadd.f32 %v1562_v14, %v1561_v13 }
 0x1fd   : > { %v1618_v30 = vadd.f32 %v1617_v29, %v1616_v21 }
 0x216   : > { %v1980_v31 = vpop.f32.mrb[6].mxu0 }
 0x217   : > { %1544 = vst.msk [vmem:[%s2227_s18 + $0x38] sm:$0xff] %vm1215_vm3, %v1980_v31  ;;  %v1488_v24 = vpop.f32.mrb[7].mxu0  ;;  %v1599_v33 = vmul.f32 %v1980_v31, %v1980_v31  ;;  %v1566_v37 = vsel %vm1215_vm3, %v1980_v31, 0.0 }
 0x218   : > { %1543 = vst.msk [vmem:[%s2227_s18 + $0x30] sm:$0xff] %vm1215_vm3, %v1488_v24  ;;  %v1564_v34 = vsel %vm1215_vm3, %v1488_v24, 0.0  ;;  %v1598_v54 = vmul.f32 %v1488_v24, %v1488_v24 }
 0x219   : > { %v1565_v18 = vadd.f32 %v1564_v34, %v1563_v15  ;;  %v1621_v41 = vsel %vm1215_vm3, %v1599_v33, 0.0 }
 0x21a   : > { %v1619_v39 = vsel %vm1215_vm3, %v1598_v54, 0.0 }
 0x21b   : > { %v1567_v27 = vadd.f32 %v1566_v37, %v1565_v18  ;;  %v1620_v38 = vadd.f32 %v1619_v39, %v1618_v30 }
 0x21d   : > { %v1622_v45 = vadd.f32 %v1621_v41, %v1620_v38 }
 0x236   : > { %v1983_v47 = vpop.f32.mrb[0].mxu1 }
 0x237   : > { %1546 = vst.msk [vmem:[%s2227_s18 + $0x48] sm:$0xff] %vm1215_vm3, %v1983_v47  ;;  %v1498_v46 = vpop.f32.mrb[1].mxu1  ;;  %v1601_v26 = vmul.f32 %v1983_v47, %v1983_v47  ;;  %v1570_v51 = vsel %vm1215_vm3, %v1983_v47, 0.0 }
 0x238   : > { %1545 = vst.msk [vmem:[%s2227_s18 + $0x40] sm:$0xff] %vm1215_vm3, %v1498_v46  ;;  %v1568_v49 = vsel %vm1215_vm3, %v1498_v46, 0.0  ;;  %v1600_v35 = vmul.f32 %v1498_v46, %v1498_v46 }
 0x239   : > { %v1569_v50 = vadd.f32 %v1568_v49, %v1567_v27  ;;  %v1625_v22 = vsel %vm1215_vm3, %v1601_v26, 0.0 }
 0x23a   : > { %v1623_v42 = vsel %vm1215_vm3, %v1600_v35, 0.0 }
 0x23b   : > { %v1624_v7 = vadd.f32 %v1623_v42, %v1622_v45  ;;  %v1571_v53 = vadd.f32 %v1570_v51, %v1569_v50 }
 0x23d   : > { %v1626_v55 = vadd.f32 %v1625_v22, %v1624_v7 }
 0x256   : > { %v1986_v59 = vpop.f32.mrb[2].mxu1 }
 0x257   : > { %1548 = vst.msk [vmem:[%s2227_s18 + $0x58] sm:$0xff] %vm1215_vm3, %v1986_v59  ;;  %v1508_v61 = vpop.f32.mrb[3].mxu1  ;;  %v1603_v43 = vmul.f32 %v1986_v59, %v1986_v59  ;;  %v1574_v48 = vsel %vm1215_vm3, %v1986_v59, 0.0 }
 0x258   : > { %1547 = vst.msk [vmem:[%s2227_s18 + $0x50] sm:$0xff] %vm1215_vm3, %v1508_v61  ;;  %v1572_v57 = vsel %vm1215_vm3, %v1508_v61, 0.0  ;;  %v1602_v60 = vmul.f32 %v1508_v61, %v1508_v61 }
 0x259   : > { %v1573_v32 = vadd.f32 %v1572_v57, %v1571_v53  ;;  %v1629_v63 = vsel %vm1215_vm3, %v1603_v43, 0.0 }
 0x25a   : > { %v1627_v36 = vsel %vm1215_vm3, %v1602_v60, 0.0 }
 0x25b   : > { %v1628_v62 = vadd.f32 %v1627_v36, %v1626_v55  ;;  %v1575_v1 = vadd.f32 %v1574_v48, %v1573_v32 }
 0x25d   : > { %v1630_v44 = vadd.f32 %v1629_v63, %v1628_v62 }
 0x277   : > { %v1989_v5 = vpop.f32.mrb[4].mxu1 }
 0x278   : > { %1550 = vst.msk [vmem:[%s2227_s18 + $0x68] sm:$0xff] %vm1215_vm3, %v1989_v5  ;;  %v1518_v56 = vpop.f32.mrb[5].mxu1  ;;  %v1605_v6 = vmul.f32 %v1989_v5, %v1989_v5  ;;  %v1578_v28 = vsel %vm1215_vm3, %v1989_v5, 0.0 }
 0x279   : > { %1549 = vst.msk [vmem:[%s2227_s18 + $0x60] sm:$0xff] %vm1215_vm3, %v1518_v56  ;;  %v1576_v2 = vsel %vm1215_vm3, %v1518_v56, 0.0  ;;  %v1604_v4 = vmul.f32 %v1518_v56, %v1518_v56 }
 0x27a   : > { %v1577_v8 = vadd.f32 %v1576_v2, %v1575_v1  ;;  %v1633_v0 = vsel %vm1215_vm3, %v1605_v6, 0.0 }
 0x27b   : > { %v1631_v11 = vsel %vm1215_vm3, %v1604_v4, 0.0 }
 0x27c   : > { %v1632_v40 = vadd.f32 %v1631_v11, %v1630_v44  ;;  %v1579_v58 = vadd.f32 %v1578_v28, %v1577_v8 }
 0x27e   : > { %v1634_v3 = vadd.f32 %v1633_v0, %v1632_v40 }
 0x284   : > { %v1992_v9 = vpop.f32.mrb[6].mxu1 }
 0x285   : > { %1552 = vst.msk [vmem:[%s2227_s18 + $0x78] sm:$0xff] %vm1215_vm3, %v1992_v9  ;;  %v1528_v16 = vpop.f32.mrb[7].mxu1  ;;  %v1607_v12 = vmul.f32 %v1992_v9, %v1992_v9  ;;  %v1582_v23 = vsel %vm1215_vm3, %v1992_v9, 0.0 }
 0x286   : > { %1551 = vst.msk [vmem:[%s2227_s18 + $0x70] sm:$0xff] %vm1215_vm3, %v1528_v16  ;;  %v1580_v17 = vsel %vm1215_vm3, %v1528_v16, 0.0  ;;  %v1606_v19 = vmul.f32 %v1528_v16, %v1528_v16 }
 0x287   : > { %v1581_v20 = vadd.f32 %v1580_v17, %v1579_v58  ;;  %v1637_v14 = vsel %vm1215_vm3, %v1607_v12, 0.0 }
 0x288   : > { %v1635_v10 = vsel %vm1215_vm3, %v1606_v19, 0.0 }
 0x289   : > { %v1583_v52 = vadd.f32 %v1582_v23, %v1581_v20  ;;  %v1636_v13 = vadd.f32 %v1635_v10, %v1634_v3 }
 0x28b   : > { %v1584_v25 = vrot.slane %v1583_v52, 4  ;;  %v1638_v21 = vadd.f32 %v1637_v14, %v1636_v13 }
 0x28d   : > { %v1585_v15 = vadd.f32 %v1584_v25, %v1583_v52  ;;  %v1639_v29 = vrot.slane %v1638_v21, 4 }
 0x28f   : > { %v1586_v30 = vrot.slane %v1585_v15, 2  ;;  %v1640_v31 = vadd.f32 %v1639_v29, %v1638_v21 }
 0x291   : > { %v1587_v24 = vadd.f32 %v1586_v30, %v1585_v15  ;;  %v1641_v33 = vrot.slane %v1640_v31, 2 }
 0x293   : > { %v1588_v34 = vrot.slane %v1587_v24, 1  ;;  %v1642_v54 = vadd.f32 %v1641_v33, %v1640_v31 }
 0x295   : > { %v1589_v18 = vadd.f32 %v1588_v34, %v1587_v24  ;;  %v1643_v37 = vrot.slane %v1642_v54, 1 }
 0x297   : > { %1591 = vst.msk [vmem:[%s449_s7] sm:$0x1] %vm1590_vm11, %v1589_v18  ;;  %v1644_v39 = vadd.f32 %v1643_v37, %v1642_v54 }
 0x299   : > { %1645 = vst.msk [vmem:[%s456_s30] sm:$0x1] %vm1590_vm11, %v1644_v39 }
 0x29a PF: > { %s17_s25 = sadd.s32 1, %s2096_s25   ;;  %s2833_s21 = smov %s2088_s23 }
 0x29b   : > { %p14_p1 = scmp.ge.s32.totalorder %s17_s25, 6   ;;  %s2834_s22 = smov %s2092_s24 }
 0x29c   : > { %s2835_s23 = smov %s2838_s26  ;;  %s2836_s24 = smov %s2842_s27 }
 0x29d   :  { %16 = sbr.rel (!%p14_p1) target bundleno = 3 (0x3), region = 116 }

</bundles_post_ra>
